<compile_context>
chip_gen: v7x
topology: tpu7x:2x2x1
jax: 0.10.0
libtpu: 0.0.40
codegen_flags: <defaults>
</compile_context>

<pallas_src>
import numpy as np
import jax
import jax.numpy as jnp
from jax.experimental import pallas as pl
from jax.experimental.pallas import tpu as pltpu


# ----------------------------------------------------------------------------
# Pallas kernel
# ----------------------------------------------------------------------------
def asa_kernel(x_ref, w5_ref, b5_ref, a5_ref, wp_ref, bp_ref, ap_ref,
               fbias_ref, tbias_ref, o_ref):
    x2d = x_ref[0]                        # (N, C) with N = F*T, row index r = f*T + t
    compute = jnp.bfloat16                # MXU operand dtype (f32 accumulation)

    def head(i):
        # 1x1 conv (BN + score-scale folded wrapper-side) + PReLU for one head.
        y = jnp.dot(x2d, w5_ref[i], preferred_element_type=jnp.float32) + b5_ref[i]
        y = jnp.where(y >= 0.0, y, a5_ref[i] * y)
        return y.astype(compute)          # (N, dc) bf16 operand for the MXU

    qf, kf, v, qt, kt = head(0), head(1), head(2), head(3), head(4)

    def softmax_rows(s):                  # all f32 (VPU/EUP/XLU), per review
        m = jnp.max(s, axis=-1, keepdims=True)
        e = jnp.exp(s - m)
        return e * pl.reciprocal(jnp.sum(e, axis=-1, keepdims=True), approx=True)

    contract_last = (((1,), (1,)), ((), ()))      # Q @ K^T without materializing K^T

    # ---- frequency attention: attend over f, independently per time step ----
    sf = jax.lax.dot_general(qf, kf, contract_last,
                             preferred_element_type=jnp.float32) + fbias_ref[...]
    pf = softmax_rows(sf).astype(compute)
    f_out = jnp.dot(pf, v, preferred_element_type=jnp.float32)       # (N, dc) f32

    # ---- (causal) time attention: attend over t, independently per frequency ----
    st = jax.lax.dot_general(qt, kt, contract_last,
                             preferred_element_type=jnp.float32) + tbias_ref[...]
    pt = softmax_rows(st).astype(compute)
    t_out = jnp.dot(pt, f_out.astype(compute),
                    preferred_element_type=jnp.float32)               # (N, dc) f32

    # ---- projection (1x1 conv + BN + PReLU) + residual ----
    y = jnp.dot(t_out, wp_ref[...], preferred_element_type=jnp.float32) + bp_ref[...]
    y = jnp.where(y >= 0.0, y, ap_ref[...] * y)
    o_ref[0] = (y + x2d).astype(o_ref.dtype)


# ----------------------------------------------------------------------------
# Parameter construction (deterministic, mirrors the nn.Module __init__ shapes)
# ----------------------------------------------------------------------------
def init_raw_params(key, c=64):
    dc = c // 4
    ks = jax.random.split(key, 18)

    def branch(k0, k1, k2, k3, k4, k5, cout, cin):
        return dict(
            w=0.1 * jax.random.normal(k0, (cout, cin), jnp.float32),   # Conv2d weight (Cout, Cin, 1, 1) squeezed
            g=1.0 + 0.1 * jax.random.normal(k1, (cout,), jnp.float32),  # BN gamma
            b=0.1 * jax.random.normal(k2, (cout,), jnp.float32),        # BN beta
            m=0.1 * jax.random.normal(k3, (cout,), jnp.float32),        # BN running_mean
            v=1.0 + 0.1 * jnp.abs(jax.random.normal(k4, (cout,), jnp.float32)),  # BN running_var
            a=0.25 + 0.01 * jax.random.normal(k5, (cout,), jnp.float32),  # PReLU alpha
        )

    return dict(
        f_qkv=branch(*ks[0:6], 3 * dc, c),
        t_qk=branch(*ks[6:12], 2 * dc, c),
        proj=branch(*ks[12:18], c, dc),
    )


def fold_params(raw):
    """Fold BN (eval mode) into the 1x1 conv weights, split the interleaved einops
    channel groups into per-head weights, and fold the 1/(sqrt(d_c)+1e-10) score
    scale into the qf/qt weights+biases (PReLU is positively homogeneous)."""
    eps = 1e-5

    def fold(p):
        s = p['g'] / jnp.sqrt(p['v'] + eps)
        w = p['w'].T * s[None, :]          # (Cin, Cout) effective weight
        b = p['b'] - p['m'] * s            # effective per-channel shift
        return w, b, p['a']

    wf, bf, af = fold(raw['f_qkv'])        # (C, 3*dc)
    wt, bt, at = fold(raw['t_qk'])         # (C, 2*dc)
    wp, bp, ap = fold(raw['proj'])         # (dc, C)

    # einops 'b (c k) f t -> k b c f t': group j takes output channels j::K.
    w5 = jnp.stack([wf[:, 0::3], wf[:, 1::3], wf[:, 2::3],
                    wt[:, 0::2], wt[:, 1::2]], axis=0)                # (5, C, dc)
    b5 = jnp.stack([bf[0::3], bf[1::3], bf[2::3],
                    bt[0::2], bt[1::2]], axis=0)[:, None, :]          # (5, 1, dc)
    a5 = jnp.stack([af[0::3], af[1::3], af[2::3],
                    at[0::2], at[1::2]], axis=0)[:, None, :]          # (5, 1, dc)

    # Fold the score scale into the qf (head 0) and qt (head 3) projections.
    dc = wp.shape[0]
    inv_scale = 1.0 / (dc ** 0.5 + 1e-10)
    head_scale = jnp.array([inv_scale, 1.0, 1.0, inv_scale, 1.0],
                           jnp.float32).reshape(5, 1, 1)
    w5 = w5 * head_scale
    b5 = b5 * head_scale
    return w5, b5, a5, wp, bp[None, :], ap[None, :]


def make_mask_biases(F_, T_, causal):
    """Additive (N, N) score biases (0 valid / -1e30 masked), row index r = f*T + t."""
    NEG = np.float32(-1e30)
    r = np.arange(F_ * T_)
    rf, rt = r // T_, r % T_
    fmask = rt[:, None] == rt[None, :]                         # same time step
    tmask = rf[:, None] == rf[None, :]                         # same frequency
    if causal:
        tmask &= rt[None, :] <= rt[:, None]                    # causal within each f
    fbias = np.where(fmask, np.float32(0.0), NEG)
    tbias = np.where(tmask, np.float32(0.0), NEG)
    return jnp.asarray(fbias), jnp.asarray(tbias)


# ----------------------------------------------------------------------------
# Wrapper calling pallas_call
# ----------------------------------------------------------------------------
def asa_forward(x_bcft, raw_params, causal=True):
    B, C, F_, T_ = x_bcft.shape
    N = F_ * T_
    params = fold_params(raw_params)
    fbias, tbias = make_mask_biases(F_, T_, causal)
    # NCHW -> channels-last, flattened over (F, T): row r = f*T + t.
    x = jnp.transpose(x_bcft, (0, 2, 3, 1)).reshape(B, N, C).astype(jnp.float32)

    def full_spec(arr):
        nd = arr.ndim
        return pl.BlockSpec(arr.shape, lambda b, nd=nd: (0,) * nd)  # resident operand

    in_specs = [pl.BlockSpec((1, N, C), lambda b: (b, 0, 0))]
    in_specs += [full_spec(p) for p in params]
    in_specs += [full_spec(fbias), full_spec(tbias)]

    out = pl.pallas_call(
        asa_kernel,
        out_shape=jax.ShapeDtypeStruct((B, N, C), jnp.float32),
        grid=(B,),
        in_specs=in_specs,
        out_specs=pl.BlockSpec((1, N, C), lambda b: (b, 0, 0)),
        compiler_params=pltpu.CompilerParams(
            dimension_semantics=("parallel",)),   # v7x: one batch element per TC
    )(x, *params, fbias, tbias)

    return jnp.transpose(out.reshape(B, F_, T_, C), (0, 3, 1, 2))  # back to (B, C, F, T)


# ----------------------------------------------------------------------------
# Pure-JAX reference mirroring the PyTorch forward (NCHW, interleaved split)
# ----------------------------------------------------------------------------
def asa_reference(x, raw, causal=True):
    B, C, F_, T_ = x.shape
    dc = C // 4
    eps = 1e-5

    def block(inp, p):
        y = jnp.einsum('oc,bcft->boft', p['w'], inp)
        s = p['g'] / jnp.sqrt(p['v'] + eps)
        y = y * s[None, :, None, None] + (p['b'] - p['m'] * s)[None, :, None, None]
        return jnp.where(y >= 0.0, y, p['a'][None, :, None, None] * y)

    scale = dc ** 0.5 + 1e-10

    fqkv = block(x, raw['f_qkv'])
    qf, kf, v = fqkv[:, 0::3], fqkv[:, 1::3], fqkv[:, 2::3]
    f_score = jnp.einsum('bcft,bcyt->btfy', qf, kf) / scale
    f_score = jax.nn.softmax(f_score, axis=-1)
    f_out = jnp.einsum('btfy,bcyt->bcft', f_score, v)

    tqk = block(x, raw['t_qk'])
    qt, kt = tqk[:, 0::2], tqk[:, 1::2]
    t_score = jnp.einsum('bcft,bcfy->bfty', qt, kt) / scale
    if causal:
        mask = jnp.triu(jnp.ones((T_, T_), dtype=bool), k=1)
        t_score = jnp.where(mask[None, None], -jnp.finfo(t_score.dtype).max, t_score)
    t_score = jax.nn.softmax(t_score, axis=-1)
    t_out = jnp.einsum('bfty,bcfy->bcft', t_score, f_out)

    out = block(t_out, raw['proj'])
    return out + x


# ----------------------------------------------------------------------------
if __name__ == "__main__":
    key = jax.random.PRNGKey(0)
    kx, kp = jax.random.split(key)

    B, c, F_, T_ = 2, 64, 16, 16            # inp: B C F T (module default c=64)
    x = jax.random.normal(kx, (B, c, F_, T_), dtype=jnp.float32)
    raw = init_raw_params(kp, c)

    out = jax.block_until_ready(asa_forward(x, raw, causal=True))
    ref = jax.block_until_ready(asa_reference(x, raw, causal=True))

    # Tolerance covers the bf16 attention-matmul operands + approx reciprocal.
    if not np.allclose(np.asarray(out), np.asarray(ref), atol=4e-2, rtol=4e-2):
        err = float(jnp.max(jnp.abs(out - ref)))
        raise AssertionError(f"Pallas ASA mismatch vs reference, max abs err = {err}")

    print("KERNEL_OK")
</pallas_src>

<mosaic_0001>
module attributes {stable_mosaic.version = 11 : i64} {
  func.func @asa_kernel(%arg0: i32, %arg1: memref<1x256x64xf32, #tpu.memory_space<vmem>>, %arg2: memref<5x64x16xf32, #tpu.memory_space<vmem>>, %arg3: memref<5x1x16xf32, #tpu.memory_space<vmem>>, %arg4: memref<5x1x16xf32, #tpu.memory_space<vmem>>, %arg5: memref<16x64xf32, #tpu.memory_space<vmem>>, %arg6: memref<1x64xf32, #tpu.memory_space<vmem>>, %arg7: memref<1x64xf32, #tpu.memory_space<vmem>>, %arg8: memref<256x256xf32, #tpu.memory_space<vmem>>, %arg9: memref<256x256xf32, #tpu.memory_space<vmem>>, %arg10: memref<1x256x64xf32, #tpu.memory_space<vmem>>) attributes {dimension_semantics = [#tpu.dimension_semantics<parallel>], iteration_bounds = array<i64: 2>, scalar_prefetch = 0 : i64, scratch_operands = 0 : i64, tpu.core_type = #tpu.core_type<tc>, window_params = [{transform_indices = @transform_0, window_bounds = array<i64: 1, 256, 64>}, {pipeline_mode = #tpu.pipeline_mode<synchronous>, transform_indices = @transform_1, window_bounds = array<i64: 5, 64, 16>}, {pipeline_mode = #tpu.pipeline_mode<synchronous>, transform_indices = @transform_2, window_bounds = array<i64: 5, 1, 16>}, {pipeline_mode = #tpu.pipeline_mode<synchronous>, transform_indices = @transform_3, window_bounds = array<i64: 5, 1, 16>}, {pipeline_mode = #tpu.pipeline_mode<synchronous>, transform_indices = @transform_4, window_bounds = array<i64: 16, 64>}, {pipeline_mode = #tpu.pipeline_mode<synchronous>, transform_indices = @transform_5, window_bounds = array<i64: 1, 64>}, {pipeline_mode = #tpu.pipeline_mode<synchronous>, transform_indices = @transform_6, window_bounds = array<i64: 1, 64>}, {pipeline_mode = #tpu.pipeline_mode<synchronous>, transform_indices = @transform_7, window_bounds = array<i64: 256, 256>}, {pipeline_mode = #tpu.pipeline_mode<synchronous>, transform_indices = @transform_8, window_bounds = array<i64: 256, 256>}, {transform_indices = @transform_9, window_bounds = array<i64: 1, 256, 64>}]} {
    %c0 = arith.constant 0 : index
    %c0_0 = arith.constant 0 : index
    %c0_1 = arith.constant 0 : index
    %0 = vector.load %arg1[%c0, %c0_0, %c0_1] : memref<1x256x64xf32, #tpu.memory_space<vmem>>, vector<1x256x64xf32>
    %1 = vector.shape_cast %0 : vector<1x256x64xf32> to vector<256x64xf32>
    %c0_2 = arith.constant 0 : index
    %c0_3 = arith.constant 0 : index
    %c0_4 = arith.constant 0 : index
    %2 = vector.load %arg2[%c0_2, %c0_3, %c0_4] : memref<5x64x16xf32, #tpu.memory_space<vmem>>, vector<1x64x16xf32>
    %3 = vector.shape_cast %2 : vector<1x64x16xf32> to vector<64x16xf32>
    %cst = arith.constant dense<0.000000e+00> : vector<256x16xf32>
    %4 = tpu.matmul %1, %3, %cst {dimension_numbers = #tpu.dot_dimension_numbers<[1], [0], [0], [1], [0, 0, 1, 1], [], []>} : vector<256x64xf32>, vector<64x16xf32>, vector<256x16xf32> -> vector<256x16xf32>
    %c0_5 = arith.constant 0 : index
    %c0_6 = arith.constant 0 : index
    %c0_7 = arith.constant 0 : index
    %5 = vector.load %arg3[%c0_5, %c0_6, %c0_7] : memref<5x1x16xf32, #tpu.memory_space<vmem>>, vector<1x1x16xf32>
    %6 = vector.shape_cast %5 : vector<1x1x16xf32> to vector<1x16xf32>
    %7 = vector.broadcast %6 : vector<1x16xf32> to vector<256x16xf32>
    %8 = arith.addf %4, %7 : vector<256x16xf32>
    %cst_8 = arith.constant 0.000000e+00 : f32
    %9 = vector.broadcast %cst_8 : f32 to vector<256x16xf32>
    %10 = arith.cmpf oge, %8, %9 : vector<256x16xf32>
    %c0_9 = arith.constant 0 : index
    %c0_10 = arith.constant 0 : index
    %c0_11 = arith.constant 0 : index
    %11 = vector.load %arg4[%c0_9, %c0_10, %c0_11] : memref<5x1x16xf32, #tpu.memory_space<vmem>>, vector<1x1x16xf32>
    %12 = vector.shape_cast %11 : vector<1x1x16xf32> to vector<1x16xf32>
    %13 = vector.broadcast %12 : vector<1x16xf32> to vector<256x16xf32>
    %14 = arith.mulf %13, %8 : vector<256x16xf32>
    %15 = arith.select %10, %8, %14 : vector<256x16xi1>, vector<256x16xf32>
    %16 = arith.truncf %15 : vector<256x16xf32> to vector<256x16xbf16>
    %c1 = arith.constant 1 : index
    %c0_12 = arith.constant 0 : index
    %c0_13 = arith.constant 0 : index
    %17 = vector.load %arg2[%c1, %c0_12, %c0_13] : memref<5x64x16xf32, #tpu.memory_space<vmem>>, vector<1x64x16xf32>
    %18 = vector.shape_cast %17 : vector<1x64x16xf32> to vector<64x16xf32>
    %cst_14 = arith.constant dense<0.000000e+00> : vector<256x16xf32>
    %19 = tpu.matmul %1, %18, %cst_14 {dimension_numbers = #tpu.dot_dimension_numbers<[1], [0], [0], [1], [0, 0, 1, 1], [], []>} : vector<256x64xf32>, vector<64x16xf32>, vector<256x16xf32> -> vector<256x16xf32>
    %c1_15 = arith.constant 1 : index
    %c0_16 = arith.constant 0 : index
    %c0_17 = arith.constant 0 : index
    %20 = vector.load %arg3[%c1_15, %c0_16, %c0_17] : memref<5x1x16xf32, #tpu.memory_space<vmem>>, vector<1x1x16xf32>
    %21 = vector.shape_cast %20 : vector<1x1x16xf32> to vector<1x16xf32>
    %22 = vector.broadcast %21 : vector<1x16xf32> to vector<256x16xf32>
    %23 = arith.addf %19, %22 : vector<256x16xf32>
    %cst_18 = arith.constant 0.000000e+00 : f32
    %24 = vector.broadcast %cst_18 : f32 to vector<256x16xf32>
    %25 = arith.cmpf oge, %23, %24 : vector<256x16xf32>
    %c1_19 = arith.constant 1 : index
    %c0_20 = arith.constant 0 : index
    %c0_21 = arith.constant 0 : index
    %26 = vector.load %arg4[%c1_19, %c0_20, %c0_21] : memref<5x1x16xf32, #tpu.memory_space<vmem>>, vector<1x1x16xf32>
    %27 = vector.shape_cast %26 : vector<1x1x16xf32> to vector<1x16xf32>
    %28 = vector.broadcast %27 : vector<1x16xf32> to vector<256x16xf32>
    %29 = arith.mulf %28, %23 : vector<256x16xf32>
    %30 = arith.select %25, %23, %29 : vector<256x16xi1>, vector<256x16xf32>
    %31 = arith.truncf %30 : vector<256x16xf32> to vector<256x16xbf16>
    %c2 = arith.constant 2 : index
    %c0_22 = arith.constant 0 : index
    %c0_23 = arith.constant 0 : index
    %32 = vector.load %arg2[%c2, %c0_22, %c0_23] : memref<5x64x16xf32, #tpu.memory_space<vmem>>, vector<1x64x16xf32>
    %33 = vector.shape_cast %32 : vector<1x64x16xf32> to vector<64x16xf32>
    %cst_24 = arith.constant dense<0.000000e+00> : vector<256x16xf32>
    %34 = tpu.matmul %1, %33, %cst_24 {dimension_numbers = #tpu.dot_dimension_numbers<[1], [0], [0], [1], [0, 0, 1, 1], [], []>} : vector<256x64xf32>, vector<64x16xf32>, vector<256x16xf32> -> vector<256x16xf32>
    %c2_25 = arith.constant 2 : index
    %c0_26 = arith.constant 0 : index
    %c0_27 = arith.constant 0 : index
    %35 = vector.load %arg3[%c2_25, %c0_26, %c0_27] : memref<5x1x16xf32, #tpu.memory_space<vmem>>, vector<1x1x16xf32>
    %36 = vector.shape_cast %35 : vector<1x1x16xf32> to vector<1x16xf32>
    %37 = vector.broadcast %36 : vector<1x16xf32> to vector<256x16xf32>
    %38 = arith.addf %34, %37 : vector<256x16xf32>
    %cst_28 = arith.constant 0.000000e+00 : f32
    %39 = vector.broadcast %cst_28 : f32 to vector<256x16xf32>
    %40 = arith.cmpf oge, %38, %39 : vector<256x16xf32>
    %c2_29 = arith.constant 2 : index
    %c0_30 = arith.constant 0 : index
    %c0_31 = arith.constant 0 : index
    %41 = vector.load %arg4[%c2_29, %c0_30, %c0_31] : memref<5x1x16xf32, #tpu.memory_space<vmem>>, vector<1x1x16xf32>
    %42 = vector.shape_cast %41 : vector<1x1x16xf32> to vector<1x16xf32>
    %43 = vector.broadcast %42 : vector<1x16xf32> to vector<256x16xf32>
    %44 = arith.mulf %43, %38 : vector<256x16xf32>
    %45 = arith.select %40, %38, %44 : vector<256x16xi1>, vector<256x16xf32>
    %46 = arith.truncf %45 : vector<256x16xf32> to vector<256x16xbf16>
    %c3 = arith.constant 3 : index
    %c0_32 = arith.constant 0 : index
    %c0_33 = arith.constant 0 : index
    %47 = vector.load %arg2[%c3, %c0_32, %c0_33] : memref<5x64x16xf32, #tpu.memory_space<vmem>>, vector<1x64x16xf32>
    %48 = vector.shape_cast %47 : vector<1x64x16xf32> to vector<64x16xf32>
    %cst_34 = arith.constant dense<0.000000e+00> : vector<256x16xf32>
    %49 = tpu.matmul %1, %48, %cst_34 {dimension_numbers = #tpu.dot_dimension_numbers<[1], [0], [0], [1], [0, 0, 1, 1], [], []>} : vector<256x64xf32>, vector<64x16xf32>, vector<256x16xf32> -> vector<256x16xf32>
    %c3_35 = arith.constant 3 : index
    %c0_36 = arith.constant 0 : index
    %c0_37 = arith.constant 0 : index
    %50 = vector.load %arg3[%c3_35, %c0_36, %c0_37] : memref<5x1x16xf32, #tpu.memory_space<vmem>>, vector<1x1x16xf32>
    %51 = vector.shape_cast %50 : vector<1x1x16xf32> to vector<1x16xf32>
    %52 = vector.broadcast %51 : vector<1x16xf32> to vector<256x16xf32>
    %53 = arith.addf %49, %52 : vector<256x16xf32>
    %cst_38 = arith.constant 0.000000e+00 : f32
    %54 = vector.broadcast %cst_38 : f32 to vector<256x16xf32>
    %55 = arith.cmpf oge, %53, %54 : vector<256x16xf32>
    %c3_39 = arith.constant 3 : index
    %c0_40 = arith.constant 0 : index
    %c0_41 = arith.constant 0 : index
    %56 = vector.load %arg4[%c3_39, %c0_40, %c0_41] : memref<5x1x16xf32, #tpu.memory_space<vmem>>, vector<1x1x16xf32>
    %57 = vector.shape_cast %56 : vector<1x1x16xf32> to vector<1x16xf32>
    %58 = vector.broadcast %57 : vector<1x16xf32> to vector<256x16xf32>
    %59 = arith.mulf %58, %53 : vector<256x16xf32>
    %60 = arith.select %55, %53, %59 : vector<256x16xi1>, vector<256x16xf32>
    %61 = arith.truncf %60 : vector<256x16xf32> to vector<256x16xbf16>
    %c4 = arith.constant 4 : index
    %c0_42 = arith.constant 0 : index
    %c0_43 = arith.constant 0 : index
    %62 = vector.load %arg2[%c4, %c0_42, %c0_43] : memref<5x64x16xf32, #tpu.memory_space<vmem>>, vector<1x64x16xf32>
    %63 = vector.shape_cast %62 : vector<1x64x16xf32> to vector<64x16xf32>
    %cst_44 = arith.constant dense<0.000000e+00> : vector<256x16xf32>
    %64 = tpu.matmul %1, %63, %cst_44 {dimension_numbers = #tpu.dot_dimension_numbers<[1], [0], [0], [1], [0, 0, 1, 1], [], []>} : vector<256x64xf32>, vector<64x16xf32>, vector<256x16xf32> -> vector<256x16xf32>
    %c4_45 = arith.constant 4 : index
    %c0_46 = arith.constant 0 : index
    %c0_47 = arith.constant 0 : index
    %65 = vector.load %arg3[%c4_45, %c0_46, %c0_47] : memref<5x1x16xf32, #tpu.memory_space<vmem>>, vector<1x1x16xf32>
    %66 = vector.shape_cast %65 : vector<1x1x16xf32> to vector<1x16xf32>
    %67 = vector.broadcast %66 : vector<1x16xf32> to vector<256x16xf32>
    %68 = arith.addf %64, %67 : vector<256x16xf32>
    %cst_48 = arith.constant 0.000000e+00 : f32
    %69 = vector.broadcast %cst_48 : f32 to vector<256x16xf32>
    %70 = arith.cmpf oge, %68, %69 : vector<256x16xf32>
    %c4_49 = arith.constant 4 : index
    %c0_50 = arith.constant 0 : index
    %c0_51 = arith.constant 0 : index
    %71 = vector.load %arg4[%c4_49, %c0_50, %c0_51] : memref<5x1x16xf32, #tpu.memory_space<vmem>>, vector<1x1x16xf32>
    %72 = vector.shape_cast %71 : vector<1x1x16xf32> to vector<1x16xf32>
    %73 = vector.broadcast %72 : vector<1x16xf32> to vector<256x16xf32>
    %74 = arith.mulf %73, %68 : vector<256x16xf32>
    %75 = arith.select %70, %68, %74 : vector<256x16xi1>, vector<256x16xf32>
    %76 = arith.truncf %75 : vector<256x16xf32> to vector<256x16xbf16>
    %cst_52 = arith.constant dense<0.000000e+00> : vector<256x256xf32>
    %77 = tpu.matmul %16, %31, %cst_52 {dimension_numbers = #tpu.dot_dimension_numbers<[1], [1], [0], [0], [0, 0, 1, 0], [], []>} : vector<256x16xbf16>, vector<256x16xbf16>, vector<256x256xf32> -> vector<256x256xf32>
    %c0_53 = arith.constant 0 : index
    %c0_54 = arith.constant 0 : index
    %78 = vector.load %arg8[%c0_53, %c0_54] : memref<256x256xf32, #tpu.memory_space<vmem>>, vector<256x256xf32>
    %79 = arith.addf %77, %78 : vector<256x256xf32>
    %cst_55 = arith.constant dense<0xFF800000> : vector<256xf32>
    %80 = vector.multi_reduction <maximumf>, %79, %cst_55 [1] : vector<256x256xf32> to vector<256xf32>
    %81 = vector.shape_cast %80 : vector<256xf32> to vector<256x1xf32>
    %82 = vector.broadcast %81 : vector<256x1xf32> to vector<256x256xf32>
    %83 = arith.subf %79, %82 : vector<256x256xf32>
    %84 = math.exp %83 : vector<256x256xf32>
    %cst_56 = arith.constant dense<0.000000e+00> : vector<256xf32>
    %85 = vector.multi_reduction <add>, %84, %cst_56 [1] : vector<256x256xf32> to vector<256xf32>
    %86 = vector.shape_cast %85 : vector<256xf32> to vector<256x1xf32>
    %87 = tpu.reciprocal %86 {approx = true} : vector<256x1xf32> -> vector<256x1xf32>
    %88 = vector.broadcast %87 : vector<256x1xf32> to vector<256x256xf32>
    %89 = arith.mulf %84, %88 : vector<256x256xf32>
    %90 = arith.truncf %89 : vector<256x256xf32> to vector<256x256xbf16>
    %cst_57 = arith.constant dense<0.000000e+00> : vector<256x16xf32>
    %91 = tpu.matmul %90, %46, %cst_57 {dimension_numbers = #tpu.dot_dimension_numbers<[1], [0], [0], [1], [0, 0, 1, 1], [], []>} : vector<256x256xbf16>, vector<256x16xbf16>, vector<256x16xf32> -> vector<256x16xf32>
    %cst_58 = arith.constant dense<0.000000e+00> : vector<256x256xf32>
    %92 = tpu.matmul %61, %76, %cst_58 {dimension_numbers = #tpu.dot_dimension_numbers<[1], [1], [0], [0], [0, 0, 1, 0], [], []>} : vector<256x16xbf16>, vector<256x16xbf16>, vector<256x256xf32> -> vector<256x256xf32>
    %c0_59 = arith.constant 0 : index
    %c0_60 = arith.constant 0 : index
    %93 = vector.load %arg9[%c0_59, %c0_60] : memref<256x256xf32, #tpu.memory_space<vmem>>, vector<256x256xf32>
    %94 = arith.addf %92, %93 : vector<256x256xf32>
    %cst_61 = arith.constant dense<0xFF800000> : vector<256xf32>
    %95 = vector.multi_reduction <maximumf>, %94, %cst_61 [1] : vector<256x256xf32> to vector<256xf32>
    %96 = vector.shape_cast %95 : vector<256xf32> to vector<256x1xf32>
    %97 = vector.broadcast %96 : vector<256x1xf32> to vector<256x256xf32>
    %98 = arith.subf %94, %97 : vector<256x256xf32>
    %99 = math.exp %98 : vector<256x256xf32>
    %cst_62 = arith.constant dense<0.000000e+00> : vector<256xf32>
    %100 = vector.multi_reduction <add>, %99, %cst_62 [1] : vector<256x256xf32> to vector<256xf32>
    %101 = vector.shape_cast %100 : vector<256xf32> to vector<256x1xf32>
    %102 = tpu.reciprocal %101 {approx = true} : vector<256x1xf32> -> vector<256x1xf32>
    %103 = vector.broadcast %102 : vector<256x1xf32> to vector<256x256xf32>
    %104 = arith.mulf %99, %103 : vector<256x256xf32>
    %105 = arith.truncf %104 : vector<256x256xf32> to vector<256x256xbf16>
    %106 = arith.truncf %91 : vector<256x16xf32> to vector<256x16xbf16>
    %cst_63 = arith.constant dense<0.000000e+00> : vector<256x16xf32>
    %107 = tpu.matmul %105, %106, %cst_63 {dimension_numbers = #tpu.dot_dimension_numbers<[1], [0], [0], [1], [0, 0, 1, 1], [], []>} : vector<256x256xbf16>, vector<256x16xbf16>, vector<256x16xf32> -> vector<256x16xf32>
    %c0_64 = arith.constant 0 : index
    %c0_65 = arith.constant 0 : index
    %108 = vector.load %arg5[%c0_64, %c0_65] : memref<16x64xf32, #tpu.memory_space<vmem>>, vector<16x64xf32>
    %cst_66 = arith.constant dense<0.000000e+00> : vector<256x64xf32>
    %109 = tpu.matmul %107, %108, %cst_66 {dimension_numbers = #tpu.dot_dimension_numbers<[1], [0], [0], [1], [0, 0, 1, 1], [], []>} : vector<256x16xf32>, vector<16x64xf32>, vector<256x64xf32> -> vector<256x64xf32>
    %c0_67 = arith.constant 0 : index
    %c0_68 = arith.constant 0 : index
    %110 = vector.load %arg6[%c0_67, %c0_68] : memref<1x64xf32, #tpu.memory_space<vmem>>, vector<1x64xf32>
    %111 = vector.broadcast %110 : vector<1x64xf32> to vector<256x64xf32>
    %112 = arith.addf %109, %111 : vector<256x64xf32>
    %cst_69 = arith.constant 0.000000e+00 : f32
    %113 = vector.broadcast %cst_69 : f32 to vector<256x64xf32>
    %114 = arith.cmpf oge, %112, %113 : vector<256x64xf32>
    %c0_70 = arith.constant 0 : index
    %c0_71 = arith.constant 0 : index
    %115 = vector.load %arg7[%c0_70, %c0_71] : memref<1x64xf32, #tpu.memory_space<vmem>>, vector<1x64xf32>
    %116 = vector.broadcast %115 : vector<1x64xf32> to vector<256x64xf32>
    %117 = arith.mulf %116, %112 : vector<256x64xf32>
    %118 = arith.select %114, %112, %117 : vector<256x64xi1>, vector<256x64xf32>
    %119 = arith.addf %118, %1 : vector<256x64xf32>
    %c0_72 = arith.constant 0 : index
    %c0_73 = arith.constant 0 : index
    %c0_74 = arith.constant 0 : index
    %120 = vector.load %arg10[%c0_72, %c0_73, %c0_74] : memref<1x256x64xf32, #tpu.memory_space<vmem>>, vector<1x256x64xf32>
    %121 = vector.shape_cast %120 : vector<1x256x64xf32> to vector<256x64xf32>
    %122 = vector.shape_cast %119 : vector<256x64xf32> to vector<1x256x64xf32>
    tpu.vector_store %arg10[%c0_72, %c0_73, %c0_74], %122 {strides = array<i32>} : memref<1x256x64xf32, #tpu.memory_space<vmem>>, vector<1x256x64xf32>,
    return
  }
  func.func @transform_0(%arg0: i32) -> (i32, i32, i32) {
    %c0_i32 = arith.constant 0 : i32
    %c0_i32_0 = arith.constant 0 : i32
    %c0_i32_1 = arith.constant 0 : i32
    return %arg0, %c0_i32, %c0_i32_0 : i32, i32, i32
  }
  func.func @transform_1(%arg0: i32) -> (i32, i32, i32) {
    %c0_i32 = arith.constant 0 : i32
    %c0_i32_0 = arith.constant 0 : i32
    %c0_i32_1 = arith.constant 0 : i32
    %c0_i32_2 = arith.constant 0 : i32
    return %c0_i32, %c0_i32_0, %c0_i32_1 : i32, i32, i32
  }
  func.func @transform_2(%arg0: i32) -> (i32, i32, i32) {
    %c0_i32 = arith.constant 0 : i32
    %c0_i32_0 = arith.constant 0 : i32
    %c0_i32_1 = arith.constant 0 : i32
    %c0_i32_2 = arith.constant 0 : i32
    return %c0_i32, %c0_i32_0, %c0_i32_1 : i32, i32, i32
  }
  func.func @transform_3(%arg0: i32) -> (i32, i32, i32) {
    %c0_i32 = arith.constant 0 : i32
    %c0_i32_0 = arith.constant 0 : i32
    %c0_i32_1 = arith.constant 0 : i32
    %c0_i32_2 = arith.constant 0 : i32
    return %c0_i32, %c0_i32_0, %c0_i32_1 : i32, i32, i32
  }
  func.func @transform_4(%arg0: i32) -> (i32, i32) {
    %c0_i32 = arith.constant 0 : i32
    %c0_i32_0 = arith.constant 0 : i32
    %c0_i32_1 = arith.constant 0 : i32
    return %c0_i32, %c0_i32_0 : i32, i32
  }
  func.func @transform_5(%arg0: i32) -> (i32, i32) {
    %c0_i32 = arith.constant 0 : i32
    %c0_i32_0 = arith.constant 0 : i32
    %c0_i32_1 = arith.constant 0 : i32
    return %c0_i32, %c0_i32_0 : i32, i32
  }
  func.func @transform_6(%arg0: i32) -> (i32, i32) {
    %c0_i32 = arith.constant 0 : i32
    %c0_i32_0 = arith.constant 0 : i32
    %c0_i32_1 = arith.constant 0 : i32
    return %c0_i32, %c0_i32_0 : i32, i32
  }
  func.func @transform_7(%arg0: i32) -> (i32, i32) {
    %c0_i32 = arith.constant 0 : i32
    %c0_i32_0 = arith.constant 0 : i32
    %c0_i32_1 = arith.constant 0 : i32
    return %c0_i32, %c0_i32_0 : i32, i32
  }
  func.func @transform_8(%arg0: i32) -> (i32, i32) {
    %c0_i32 = arith.constant 0 : i32
    %c0_i32_0 = arith.constant 0 : i32
    %c0_i32_1 = arith.constant 0 : i32
    return %c0_i32, %c0_i32_0 : i32, i32
  }
  func.func @transform_9(%arg0: i32) -> (i32, i32, i32) {
    %c0_i32 = arith.constant 0 : i32
    %c0_i32_0 = arith.constant 0 : i32
    %c0_i32_1 = arith.constant 0 : i32
    return %arg0, %c0_i32, %c0_i32_0 : i32, i32, i32
  }
}

</mosaic_0001>

<bundles_post_ra>
// kernel: tpu_custom_call.1
= control target key start
LH: loop header
LB: loop body
LE: loop exit
PB: predicated region body
PF: predicated region fallthrough
CT: control target
= control target key end

     0   :  { %s6688_s30 = smov 0   ;;  %s10353_s0 = inlined_call_operand.vmem [shape: f32[2,256,64], index: 0, kind: input, shape index: {}]   ;;  %s10354_s1 = inlined_call_operand.vmem [shape: f32[5,64,16], index: 1, kind: input, shape index: {}]   ;;  %s10355_s2 = inlined_call_operand.vmem [shape: f32[5,1,16], index: 2, kind: input, shape index: {}]   ;;  %s10356_s3 = inlined_call_operand.vmem [shape: f32[5,1,16], index: 3, kind: input, shape index: {}]   ;;  %s10357_s4 = inlined_call_operand.vmem [shape: f32[16,64], index: 4, kind: input, shape index: {}]   ;;  %s10358_s5 = inlined_call_operand.vmem [shape: f32[1,64], index: 5, kind: input, shape index: {}]   ;;  %s10359_s6 = inlined_call_operand.vmem [shape: f32[1,64], index: 6, kind: input, shape index: {}]   ;;  %s10360_s7 = inlined_call_operand.vmem [shape: f32[256,256], index: 7, kind: input, shape index: {}]   ;;  %s10361_s8 = inlined_call_operand.vmem [shape: f32[256,256], index: 8, kind: input, shape index: {}]   ;;  %s10362_s9 = inlined_call_operand.vmem [shape: f32[2,256,64], index: 9, kind: output, shape index: {}]  }
   0x1 LB: > { %s4891_s10 = sadd.s32 4294967295, %s6636_s30   ;;  %p4895_p0 = scmp.ge.s32.totalorder %s6636_s30, 1  ;;  %s6636_s30 = sphi %s6688_s30, %s19_s30  }
   0x2   : > { %p287_p1 = scmp.lt.s32.totalorder %s6636_s30, 3 }
   0x4   : > { %p288_p2 = pnand %p4895_p0, %p287_p1 }
   0x6   : > { %291 = sbr.rel (%p288_p2) target bundleno = 1866 (0x74a), region = 56 }
   0xd   : > { %v366_v0 = vld [vmem:[%s10354_s1] sm:$0xff]  ;;  %v367_v1 = vld [vmem:[%s10354_s1 + $0x8] sm:$0xff]  ;;  %p323_p3 = scmp.lt.s32.totalorder %s4891_s10, 1  ;;  %v368_v5 = vld [vmem:[%s10354_s1 + $0x10] sm:$0xff]  ;;  %vm381_vm0 = vcmask 523264   ;;  %vm2334_vm1 = vcmask 130048  }
   0xe   : > { %v4934_v2 = vld [vmem:[%s10354_s1 + $0x40] sm:$0xff]  ;;  %v6106_v3 = vpack.c.bf16 %v367_v1, %v366_v0  ;;  %v4935_v4 = vld [vmem:[%s10354_s1 + $0x48] sm:$0xff]  ;;  %v369_v6 = vld [vmem:[%s10354_s1 + $0x18] sm:$0xff] }
   0xf   : > { %v6122_v7 = vpack.c.bf16 %v4935_v4, %v4934_v2  ;;  %v6110_v8 = vpack.c.bf16 %v369_v6, %v368_v5  ;;  %v4936_v9 = vld [vmem:[%s10354_s1 + $0x50] sm:$0xff]  ;;  %v4937_v10 = vld [vmem:[%s10354_s1 + $0x58] sm:$0xff]  ;;  %v370_v11 = vld [vmem:[%s10354_s1 + $0x20] sm:$0xff]  ;;  %s10800_s10 = smov (!%p323_p3, %s4891_s10), 1 }
  0x10   : > { %6107 = vmatprep.subr.bf16.mxu0 %v6106_v3  ;;  %v6126_v12 = vpack.c.bf16 %v4937_v10, %v4936_v9  ;;  %v371_v13 = vld [vmem:[%s10354_s1 + $0x28] sm:$0xff]  ;;  %v4938_v14 = vld [vmem:[%s10354_s1 + $0x60] sm:$0xff]  ;;  %s5178_s16 = sshll.u32 %s10800_s10, 8  ;;  %v372_v18 = vld [vmem:[%s10354_s1 + $0x30] sm:$0xff] }
  0x11   : > { %v4939_v15 = vld [vmem:[%s10354_s1 + $0x68] sm:$0xff]  ;;  %6123 = vmatprep.subr.bf16.mxu1 %v6122_v7  ;;  %6109 = vmatpush3.bf16.msra.mxu0 %v6106_v3  ;;  %v6114_v16 = vpack.c.bf16 %v371_v13, %v370_v11  ;;  %s6740_s19 = scalar_lea.vmem %s10353_s0, %s5178_s16  ;;  %v373_v19 = vld [vmem:[%s10354_s1 + $0x38] sm:$0xff]  ;;  %v4940_v21 = vld [vmem:[%s10354_s1 + $0x70] sm:$0xff]  ;;  %s10192_s22 = scalar_lea.vmem %s10362_s9, %s5178_s16 }
  0x12   : > { %6125 = vmatpush3.bf16.msra.mxu1 %v6122_v7  ;;  %6111 = vmatprep.subr.bf16.mxu0 %v6110_v8  ;;  %v6130_v17 = vpack.c.bf16 %v4939_v15, %v4938_v14  ;;  %v6749_v20 = vld [vmem:[%s6740_s19] sm:$0xff]  ;;  %v4941_v22 = vld [vmem:[%s10354_s1 + $0x78] sm:$0xff]  ;;  %v6118_v23 = vpack.c.bf16 %v373_v19, %v372_v18  ;;  %v4979_v26 = vld [vmem:[%s10354_s1 + $0x88] sm:$0xff] }
  0x13   : > { %6127 = vmatprep.subr.bf16.mxu1 %v6126_v12  ;;  %5750 = vmatprep.mubr.msk.f32.mxu0 %vm381_vm0, %v6749_v20  ;;  %v6134_v24 = vpack.c.bf16 %v4941_v22, %v4940_v21  ;;  %v4978_v25 = vld [vmem:[%s10354_s1 + $0x80] sm:$0xff]  ;;  %v4980_v28 = vld [vmem:[%s10354_s1 + $0x90] sm:$0xff]  ;;  %v4981_v29 = vld [vmem:[%s10354_s1 + $0x98] sm:$0xff] }
  0x14   : > { %5814 = vmatprep.mubr.msk.f32.mxu1 %vm381_vm0, %v6749_v20  ;;  %v6138_v27 = vpack.c.bf16 %v4979_v26, %v4978_v25  ;;  %v6774_v30 = vld [vmem:[%s6740_s19 + $0x8] sm:$0xff]  ;;  %v6777_v31 = vld [vmem:[%s6740_s19 + $0x10] sm:$0xff]  ;;  %v6142_v32 = vpack.c.bf16 %v4981_v29, %v4980_v28  ;;  %v4982_v33 = vld [vmem:[%s10354_s1 + $0xa0] sm:$0xff] }
  0x15   : > { %6113 = vmatpush3.bf16.msra.mxu0 %v6110_v8  ;;  %v4983_v34 = vld [vmem:[%s10354_s1 + $0xa8] sm:$0xff]  ;;  %v6792_v35 = vld [vmem:[%s6740_s19 + $0x18] sm:$0xff]  ;;  %v6797_v36 = vld [vmem:[%s6740_s19 + $0x20] sm:$0xff] }
  0x16   : > { %6129 = vmatpush3.bf16.msra.mxu1 %v6126_v12  ;;  %6115 = vmatprep.subr.bf16.mxu0 %v6114_v16  ;;  %v6146_v37 = vpack.c.bf16 %v4983_v34, %v4982_v33  ;;  %v4984_v38 = vld [vmem:[%s10354_s1 + $0xb0] sm:$0xff]  ;;  %v4985_v39 = vld [vmem:[%s10354_s1 + $0xb8] sm:$0xff]  ;;  %v6812_v40 = vld [vmem:[%s6740_s19 + $0x28] sm:$0xff] }
  0x17   : > { %6131 = vmatprep.subr.bf16.mxu1 %v6130_v17  ;;  %v6817_v41 = vld [vmem:[%s6740_s19 + $0x30] sm:$0xff]  ;;  %v6150_v42 = vpack.c.bf16 %v4985_v39, %v4984_v38  ;;  %v5066_v43 = vld [vmem:[%s10354_s1 + $0x100] sm:$0xff]  ;;  %v5067_v44 = vld [vmem:[%s10354_s1 + $0x108] sm:$0xff] }
  0x18   : > { %v6832_v45 = vld [vmem:[%s6740_s19 + $0x38] sm:$0xff]  ;;  %v6837_v46 = vld [vmem:[%s6740_s19 + $0x40] sm:$0xff]  ;;  %v6839_v47 = vpack.c.bf16 %v5067_v44, %v5066_v43  ;;  %v6848_v48 = vld [vmem:[%s6740_s19 + $0x48] sm:$0xff] }
  0x19   : > { %6117 = vmatpush3.bf16.msra.mxu0 %v6114_v16  ;;  %v6853_v49 = vld [vmem:[%s6740_s19 + $0x50] sm:$0xff]  ;;  %v6863_v50 = vld [vmem:[%s6740_s19 + $0x58] sm:$0xff]  ;;  %v6868_v51 = vld [vmem:[%s6740_s19 + $0x60] sm:$0xff] }
  0x1a   : > { %6133 = vmatpush3.bf16.msra.mxu1 %v6130_v17  ;;  %6119 = vmatprep.subr.bf16.mxu0 %v6118_v23  ;;  %v6877_v52 = vld [vmem:[%s6740_s19 + $0x68] sm:$0xff]  ;;  %v6882_v53 = vld [vmem:[%s6740_s19 + $0x70] sm:$0xff]  ;;  %v6891_v54 = vld [vmem:[%s6740_s19 + $0x78] sm:$0xff] }
  0x1b   : > { %6135 = vmatprep.subr.bf16.mxu1 %v6134_v24  ;;  %v6896_v55 = vld [vmem:[%s6740_s19 + $0x80] sm:$0xff]  ;;  %v6905_v56 = vld [vmem:[%s6740_s19 + $0x88] sm:$0xff]  ;;  %v6910_v57 = vld [vmem:[%s6740_s19 + $0x90] sm:$0xff] }
  0x1c   : > { %v6919_v58 = vld [vmem:[%s6740_s19 + $0x98] sm:$0xff]  ;;  %v6924_v59 = vld [vmem:[%s6740_s19 + $0xa0] sm:$0xff]  ;;  %v6933_v60 = vld [vmem:[%s6740_s19 + $0xa8] sm:$0xff] }
  0x1d   : > { %6121 = vmatpush3.bf16.msra.mxu0 %v6118_v23  ;;  %v6936_v61 = vld [vmem:[%s6740_s19 + $0xb0] sm:$0xff]  ;;  %v6945_v62 = vld [vmem:[%s6740_s19 + $0xb8] sm:$0xff]  ;;  %v6950_v63 = vld [vmem:[%s6740_s19 + $0xc0] sm:$0xff] }
  0x1e   : > { %6137 = vmatpush3.bf16.msra.mxu1 %v6134_v24  ;;  %6139 = vmatprep.subr.bf16.mxu0 %v6138_v27  ;;  %v6959_v0 = vld [vmem:[%s6740_s19 + $0xc8] sm:$0xff]  ;;  %v6964_v1 = vld [vmem:[%s6740_s19 + $0xd0] sm:$0xff]  ;;  %v6973_v2 = vld [vmem:[%s6740_s19 + $0xd8] sm:$0xff] }
  0x1f   : > { %v6978_v3 = vld [vmem:[%s6740_s19 + $0xe0] sm:$0xff]  ;;  %v5023_v5 = vld [vmem:[%s10354_s1 + $0xc8] sm:$0xff]  ;;  %v6998_v8 = vld [vmem:[%s6740_s19 + $0xf0] sm:$0xff] }
  0x20   : > { %5751 = vmatmul.mubr.msk.f32.vlgmr.msra.gmra.mrb[0].mxu0 %vm381_vm0, %v6774_v30  ;;  %v5022_v4 = vld [vmem:[%s10354_s1 + $0xc0] sm:$0xff]  ;;  %v6993_v6 = vld [vmem:[%s6740_s19 + $0xe8] sm:$0xff]  ;;  %v7007_v9 = vld [vmem:[%s6740_s19 + $0xf8] sm:$0xff] }
  0x21   : > { %5815 = vmatmul.mubr.msk.f32.vlgmr.msra.gmra.mrb[0].mxu1 %vm381_vm0, %v6774_v30  ;;  %5753 = vmatprep.mubr.msk.f32.mxu0 %vm381_vm0, %v6777_v31  ;;  %v6154_v7 = vpack.c.bf16 %v5023_v5, %v5022_v4  ;;  %v5068_v10 = vld [vmem:[%s10354_s1 + $0x110] sm:$0xff]  ;;  %v5069_v11 = vld [vmem:[%s10354_s1 + $0x118] sm:$0xff]  ;;  %v5070_v13 = vld [vmem:[%s10354_s1 + $0x120] sm:$0xff] }
  0x22   : > { %5817 = vmatprep.mubr.msk.f32.mxu1 %vm381_vm0, %v6777_v31  ;;  %6141 = vmatpush3.bf16.msra.mxu0 %v6138_v27  ;;  %v6174_v12 = vpack.c.bf16 %v5069_v11, %v5068_v10  ;;  %v5071_v14 = vld [vmem:[%s10354_s1 + $0x128] sm:$0xff]  ;;  %v5072_v16 = vld [vmem:[%s10354_s1 + $0x130] sm:$0xff]  ;;  %v5073_v17 = vld [vmem:[%s10354_s1 + $0x138] sm:$0xff] }
  0x23   : > { %6143 = vmatprep.subr.bf16.mxu0 %v6142_v32  ;;  %6155 = vmatprep.subr.bf16.mxu1 %v6154_v7  ;;  %v6178_v15 = vpack.c.bf16 %v5071_v14, %v5070_v13  ;;  %v6182_v18 = vpack.c.bf16 %v5073_v17, %v5072_v16  ;;  %v5024_v19 = vld [vmem:[%s10354_s1 + $0xd0] sm:$0xff]  ;;  %v5025_v21 = vld [vmem:[%s10354_s1 + $0xd8] sm:$0xff]  ;;  %v5026_v23 = vld [vmem:[%s10354_s1 + $0xe0] sm:$0xff] }
  0x24   : > { %5754 = vmatmul.mubr.msk.f32.gmra.mrb[2].mxu0 %vm381_vm0, %v6792_v35  ;;  %6157 = vmatpush3.bf16.msra.mxu1 %v6154_v7  ;;  %v6158_v22 = vpack.c.bf16 %v5025_v21, %v5024_v19  ;;  %v5027_v24 = vld [vmem:[%s10354_s1 + $0xe8] sm:$0xff]  ;;  %v5028_v26 = vld [vmem:[%s10354_s1 + $0xf0] sm:$0xff]  ;;  %v5029_v27 = vld [vmem:[%s10354_s1 + $0xf8] sm:$0xff] }
  0x25   : > { %5818 = vmatmul.mubr.msk.f32.gmra.mrb[2].mxu1 %vm381_vm0, %v6792_v35  ;;  %5756 = vmatprep.mubr.msk.f32.mxu0 %vm381_vm0, %v6797_v36  ;;  %v6162_v25 = vpack.c.bf16 %v5027_v24, %v5026_v23  ;;  %v6166_v28 = vpack.c.bf16 %v5029_v27, %v5028_v26  ;;  %v7254_v29 = vld [vmem:[%s10355_s2 + $0x1] ss:$0 sm:$0xff] }
  0x26   : > { %5820 = vmatprep.mubr.msk.f32.mxu1 %vm381_vm0, %v6797_v36  ;;  %6145 = vmatpush3.bf16.msra.mxu0 %v6142_v32  ;;  %v7264_v33 = vld [vmem:[%s10356_s3 + $0x1] ss:$0 sm:$0xff] }
  0x27   : > { %6147 = vmatprep.subr.bf16.mxu0 %v6146_v37  ;;  %6159 = vmatprep.subr.bf16.mxu1 %v6158_v22 }
  0x28   : > { %5757 = vmatmul.mubr.msk.f32.gmra.mrb[4].mxu0 %vm381_vm0, %v6812_v40  ;;  %6161 = vmatpush3.bf16.msra.mxu1 %v6158_v22 }
  0x29   : > { %5821 = vmatmul.mubr.msk.f32.gmra.mrb[4].mxu1 %vm381_vm0, %v6812_v40  ;;  %5759 = vmatprep.mubr.msk.f32.mxu0 %vm381_vm0, %v6817_v41 }
  0x2a   : > { %5823 = vmatprep.mubr.msk.f32.mxu1 %vm381_vm0, %v6817_v41  ;;  %6149 = vmatpush3.bf16.msra.mxu0 %v6146_v37 }
  0x2b   : > { %6151 = vmatprep.subr.bf16.mxu0 %v6150_v42  ;;  %6163 = vmatprep.subr.bf16.mxu1 %v6162_v25 }
  0x2c   : > { %5760 = vmatmul.mubr.msk.f32.gmra.mrb[6].mxu0 %vm381_vm0, %v6832_v45  ;;  %6165 = vmatpush3.bf16.msra.mxu1 %v6162_v25 }
  0x2d   : > { %5824 = vmatmul.mubr.msk.f32.gmra.mrb[6].mxu1 %vm381_vm0, %v6832_v45  ;;  %5762 = vmatprep.mubr.msk.f32.mxu0 %vm381_vm0, %v6837_v46 }
  0x2e   : > { %5826 = vmatprep.mubr.msk.f32.mxu1 %vm381_vm0, %v6837_v46  ;;  %6153 = vmatpush3.bf16.msra.mxu0 %v6150_v42 }
  0x2f   : > { %6171 = vmatprep.subr.bf16.mxu0 %v6839_v47  ;;  %6167 = vmatprep.subr.bf16.mxu1 %v6166_v28 }
  0x30   : > { %5763 = vmatmul.mubr.msk.f32.gmra.mrb[8].mxu0 %vm381_vm0, %v6848_v48  ;;  %6169 = vmatpush3.bf16.msra.mxu1 %v6166_v28 }
  0x31   : > { %5827 = vmatmul.mubr.msk.f32.gmra.mrb[8].mxu1 %vm381_vm0, %v6848_v48  ;;  %5765 = vmatprep.mubr.msk.f32.mxu0 %vm381_vm0, %v6853_v49 }
  0x32   : > { %5829 = vmatprep.mubr.msk.f32.mxu1 %vm381_vm0, %v6853_v49 }
  0x34   : > { %5766 = vmatmul.mubr.msk.f32.gmra.mrb[10].mxu0 %vm381_vm0, %v6863_v50 }
  0x35   : > { %5830 = vmatmul.mubr.msk.f32.gmra.mrb[10].mxu1 %vm381_vm0, %v6863_v50  ;;  %5768 = vmatprep.mubr.msk.f32.mxu0 %vm381_vm0, %v6868_v51 }
  0x36   : > { %5832 = vmatprep.mubr.msk.f32.mxu1 %vm381_vm0, %v6868_v51 }
  0x38   : > { %5769 = vmatmul.mubr.msk.f32.gmra.mrb[12].mxu0 %vm381_vm0, %v6877_v52 }
  0x39   : > { %5833 = vmatmul.mubr.msk.f32.gmra.mrb[12].mxu1 %vm381_vm0, %v6877_v52  ;;  %5771 = vmatprep.mubr.msk.f32.mxu0 %vm381_vm0, %v6882_v53 }
  0x3a   : > { %5835 = vmatprep.mubr.msk.f32.mxu1 %vm381_vm0, %v6882_v53 }
  0x3c   : > { %5772 = vmatmul.mubr.msk.f32.gmra.mrb[14].mxu0 %vm381_vm0, %v6891_v54 }
  0x3d   : > { %5836 = vmatmul.mubr.msk.f32.gmra.mrb[14].mxu1 %vm381_vm0, %v6891_v54  ;;  %5774 = vmatprep.mubr.msk.f32.mxu0 %vm381_vm0, %v6896_v55 }
  0x3e   : > { %5838 = vmatprep.mubr.msk.f32.mxu1 %vm381_vm0, %v6896_v55 }
  0x40   : > { %5775 = vmatmul.mubr.msk.f32.gmra.mrb[16].mxu0 %vm381_vm0, %v6905_v56 }
  0x41   : > { %5839 = vmatmul.mubr.msk.f32.gmra.mrb[16].mxu1 %vm381_vm0, %v6905_v56  ;;  %5777 = vmatprep.mubr.msk.f32.mxu0 %vm381_vm0, %v6910_v57 }
  0x42   : > { %5841 = vmatprep.mubr.msk.f32.mxu1 %vm381_vm0, %v6910_v57 }
  0x44   : > { %5778 = vmatmul.mubr.msk.f32.gmra.mrb[18].mxu0 %vm381_vm0, %v6919_v58 }
  0x45   : > { %5842 = vmatmul.mubr.msk.f32.gmra.mrb[18].mxu1 %vm381_vm0, %v6919_v58  ;;  %5780 = vmatprep.mubr.msk.f32.mxu0 %vm381_vm0, %v6924_v59 }
  0x46   : > { %5844 = vmatprep.mubr.msk.f32.mxu1 %vm381_vm0, %v6924_v59 }
  0x48   : > { %5781 = vmatmul.mubr.msk.f32.gmra.mrb[20].mxu0 %vm381_vm0, %v6933_v60 }
  0x49   : > { %5783 = vmatprep.mubr.msk.f32.mxu0 %vm381_vm0, %v6936_v61  ;;  %5845 = vmatmul.mubr.msk.f32.gmra.mrb[20].mxu1 %vm381_vm0, %v6933_v60 }
  0x4a   : > { %5847 = vmatprep.mubr.msk.f32.mxu1 %vm381_vm0, %v6936_v61 }
  0x4c   : > { %5784 = vmatmul.mubr.msk.f32.gmra.mrb[22].mxu0 %vm381_vm0, %v6945_v62 }
  0x4d   : > { %5786 = vmatprep.mubr.msk.f32.mxu0 %vm381_vm0, %v6950_v63  ;;  %5848 = vmatmul.mubr.msk.f32.gmra.mrb[22].mxu1 %vm381_vm0, %v6945_v62 }
  0x4e   : > { %5850 = vmatprep.mubr.msk.f32.mxu1 %vm381_vm0, %v6950_v63 }
  0x50   : > { %5787 = vmatmul.mubr.msk.f32.gmra.mrb[24].mxu0 %vm381_vm0, %v6959_v0 }
  0x51   : > { %5789 = vmatprep.mubr.msk.f32.mxu0 %vm381_vm0, %v6964_v1  ;;  %5851 = vmatmul.mubr.msk.f32.gmra.mrb[24].mxu1 %vm381_vm0, %v6959_v0 }
  0x52   : > { %5853 = vmatprep.mubr.msk.f32.mxu1 %vm381_vm0, %v6964_v1 }
  0x54   : > { %5790 = vmatmul.mubr.msk.f32.gmra.mrb[26].mxu0 %vm381_vm0, %v6973_v2 }
  0x55   : > { %5792 = vmatprep.mubr.msk.f32.mxu0 %vm381_vm0, %v6978_v3  ;;  %5854 = vmatmul.mubr.msk.f32.gmra.mrb[26].mxu1 %vm381_vm0, %v6973_v2 }
  0x56   : > { %5856 = vmatprep.mubr.msk.f32.mxu1 %vm381_vm0, %v6978_v3 }
  0x58   : > { %5793 = vmatmul.mubr.msk.f32.gmra.mrb[28].mxu0 %vm381_vm0, %v6993_v6 }
  0x59   : > { %5795 = vmatprep.mubr.msk.f32.mxu0 %vm381_vm0, %v6998_v8  ;;  %5857 = vmatmul.mubr.msk.f32.gmra.mrb[28].mxu1 %vm381_vm0, %v6993_v6 }
  0x5a   : > { %5859 = vmatprep.mubr.msk.f32.mxu1 %vm381_vm0, %v6998_v8 }
  0x5c   : > { %5796 = vmatmul.mubr.msk.f32.gmra.mrb[30].mxu0 %vm381_vm0, %v7007_v9 }
  0x5d   : > { %5878 = vmatprep.mubr.msk.f32.mxu0 %vm381_vm0, %v6749_v20  ;;  %5860 = vmatmul.mubr.msk.f32.gmra.mrb[30].mxu1 %vm381_vm0, %v7007_v9 }
  0x5e   : > { %5942 = vmatprep.mubr.msk.f32.mxu1 %vm381_vm0, %v6749_v20 }
  0x60   : > { %5879 = vmatmul.mubr.msk.f32.vlgmr.msra.gmra.mrb[32].mxu0 %vm381_vm0, %v6774_v30 }
  0x61   : > { %5881 = vmatprep.mubr.msk.f32.mxu0 %vm381_vm0, %v6777_v31  ;;  %6173 = vmatpush3.bf16.msra.mxu0 %v6839_v47 }
  0x62   : > { %6175 = vmatprep.subr.bf16.mxu0 %v6174_v12  ;;  %5943 = vmatmul.mubr.msk.f32.vlgmr.msra.gmra.mrb[32].mxu1 %vm381_vm0, %v6774_v30 }
  0x63   : > { %5945 = vmatprep.mubr.msk.f32.mxu1 %vm381_vm0, %v6777_v31 }
  0x64   : > { %5882 = vmatmul.mubr.msk.f32.gmra.mrb[34].mxu0 %vm381_vm0, %v6792_v35 }
  0x65   : > { %5884 = vmatprep.mubr.msk.f32.mxu0 %vm381_vm0, %v6797_v36  ;;  %6177 = vmatpush3.bf16.msra.mxu0 %v6174_v12 }
  0x66   : > { %6179 = vmatprep.subr.bf16.mxu0 %v6178_v15  ;;  %5946 = vmatmul.mubr.msk.f32.gmra.mrb[34].mxu1 %vm381_vm0, %v6792_v35 }
  0x67   : > { %5948 = vmatprep.mubr.msk.f32.mxu1 %vm381_vm0, %v6797_v36 }
  0x68   : > { %5885 = vmatmul.mubr.msk.f32.gmra.mrb[36].mxu0 %vm381_vm0, %v6812_v40 }
  0x69   : > { %5887 = vmatprep.mubr.msk.f32.mxu0 %vm381_vm0, %v6817_v41  ;;  %6181 = vmatpush3.bf16.msra.mxu0 %v6178_v15 }
  0x6a   : > { %6183 = vmatprep.subr.bf16.mxu0 %v6182_v18  ;;  %5949 = vmatmul.mubr.msk.f32.gmra.mrb[36].mxu1 %vm381_vm0, %v6812_v40 }
  0x6b   : > { %5951 = vmatprep.mubr.msk.f32.mxu1 %vm381_vm0, %v6817_v41 }
  0x6c   : > { %5888 = vmatmul.mubr.msk.f32.gmra.mrb[38].mxu0 %vm381_vm0, %v6832_v45 }
  0x6d   : > { %5890 = vmatprep.mubr.msk.f32.mxu0 %vm381_vm0, %v6837_v46  ;;  %6185 = vmatpush3.bf16.msra.mxu0 %v6182_v18 }
  0x6e   : > { %5952 = vmatmul.mubr.msk.f32.gmra.mrb[38].mxu1 %vm381_vm0, %v6832_v45 }
  0x6f   : > { %5954 = vmatprep.mubr.msk.f32.mxu1 %vm381_vm0, %v6837_v46 }
  0x70   : > { %5891 = vmatmul.mubr.msk.f32.gmra.mrb[40].mxu0 %vm381_vm0, %v6848_v48 }
  0x71   : > { %5893 = vmatprep.mubr.msk.f32.mxu0 %vm381_vm0, %v6853_v49 }
  0x72   : > { %5955 = vmatmul.mubr.msk.f32.gmra.mrb[40].mxu1 %vm381_vm0, %v6848_v48 }
  0x73   : > { %5957 = vmatprep.mubr.msk.f32.mxu1 %vm381_vm0, %v6853_v49 }
  0x74   : > { %5894 = vmatmul.mubr.msk.f32.gmra.mrb[42].mxu0 %vm381_vm0, %v6863_v50 }
  0x75   : > { %5896 = vmatprep.mubr.msk.f32.mxu0 %vm381_vm0, %v6868_v51 }
  0x76   : > { %5958 = vmatmul.mubr.msk.f32.gmra.mrb[42].mxu1 %vm381_vm0, %v6863_v50 }
  0x77   : > { %5960 = vmatprep.mubr.msk.f32.mxu1 %vm381_vm0, %v6868_v51 }
  0x78   : > { %5897 = vmatmul.mubr.msk.f32.gmra.mrb[44].mxu0 %vm381_vm0, %v6877_v52 }
  0x79   : > { %5899 = vmatprep.mubr.msk.f32.mxu0 %vm381_vm0, %v6882_v53 }
  0x7a   : > { %5961 = vmatmul.mubr.msk.f32.gmra.mrb[44].mxu1 %vm381_vm0, %v6877_v52 }
  0x7b   : > { %5963 = vmatprep.mubr.msk.f32.mxu1 %vm381_vm0, %v6882_v53 }
  0x7c   : > { %5900 = vmatmul.mubr.msk.f32.gmra.mrb[46].mxu0 %vm381_vm0, %v6891_v54 }
  0x7d   : > { %5902 = vmatprep.mubr.msk.f32.mxu0 %vm381_vm0, %v6896_v55 }
  0x7e   : > { %5964 = vmatmul.mubr.msk.f32.gmra.mrb[46].mxu1 %vm381_vm0, %v6891_v54 }
  0x7f   : > { %5966 = vmatprep.mubr.msk.f32.mxu1 %vm381_vm0, %v6896_v55 }
  0x80   : > { %5903 = vmatmul.mubr.msk.f32.gmra.mrb[48].mxu0 %vm381_vm0, %v6905_v56 }
  0x81   : > { %5905 = vmatprep.mubr.msk.f32.mxu0 %vm381_vm0, %v6910_v57 }
  0x82   : > { %5967 = vmatmul.mubr.msk.f32.gmra.mrb[48].mxu1 %vm381_vm0, %v6905_v56 }
  0x83   : > { %5969 = vmatprep.mubr.msk.f32.mxu1 %vm381_vm0, %v6910_v57 }
  0x84   : > { %5906 = vmatmul.mubr.msk.f32.gmra.mrb[50].mxu0 %vm381_vm0, %v6919_v58 }
  0x85   : > { %5908 = vmatprep.mubr.msk.f32.mxu0 %vm381_vm0, %v6924_v59 }
  0x86   : > { %5970 = vmatmul.mubr.msk.f32.gmra.mrb[50].mxu1 %vm381_vm0, %v6919_v58 }
  0x87   : > { %5972 = vmatprep.mubr.msk.f32.mxu1 %vm381_vm0, %v6924_v59 }
  0x88   : > { %5909 = vmatmul.mubr.msk.f32.gmra.mrb[52].mxu0 %vm381_vm0, %v6933_v60 }
  0x89   : > { %5911 = vmatprep.mubr.msk.f32.mxu0 %vm381_vm0, %v6936_v61 }
  0x8a   : > { %5973 = vmatmul.mubr.msk.f32.gmra.mrb[52].mxu1 %vm381_vm0, %v6933_v60 }
  0x8b   : > { %5975 = vmatprep.mubr.msk.f32.mxu1 %vm381_vm0, %v6936_v61 }
  0x8c   : > { %5912 = vmatmul.mubr.msk.f32.gmra.mrb[54].mxu0 %vm381_vm0, %v6945_v62 }
  0x8d   : > { %5914 = vmatprep.mubr.msk.f32.mxu0 %vm381_vm0, %v6950_v63 }
  0x8e   : > { %5976 = vmatmul.mubr.msk.f32.gmra.mrb[54].mxu1 %vm381_vm0, %v6945_v62 }
  0x8f   : > { %5978 = vmatprep.mubr.msk.f32.mxu1 %vm381_vm0, %v6950_v63 }
  0x90   : > { %5915 = vmatmul.mubr.msk.f32.gmra.mrb[56].mxu0 %vm381_vm0, %v6959_v0 }
  0x91   : > { %5917 = vmatprep.mubr.msk.f32.mxu0 %vm381_vm0, %v6964_v1 }
  0x92   : > { %5979 = vmatmul.mubr.msk.f32.gmra.mrb[56].mxu1 %vm381_vm0, %v6959_v0 }
  0x93   : > { %5981 = vmatprep.mubr.msk.f32.mxu1 %vm381_vm0, %v6964_v1 }
  0x94   : > { %5918 = vmatmul.mubr.msk.f32.gmra.mrb[58].mxu0 %vm381_vm0, %v6973_v2 }
  0x95   : > { %5920 = vmatprep.mubr.msk.f32.mxu0 %vm381_vm0, %v6978_v3 }
  0x96   : > { %5982 = vmatmul.mubr.msk.f32.gmra.mrb[58].mxu1 %vm381_vm0, %v6973_v2 }
  0x97   : > { %5984 = vmatprep.mubr.msk.f32.mxu1 %vm381_vm0, %v6978_v3 }
  0x98   : > { %5921 = vmatmul.mubr.msk.f32.gmra.mrb[60].mxu0 %vm381_vm0, %v6993_v6 }
  0x99   : > { %5923 = vmatprep.mubr.msk.f32.mxu0 %vm381_vm0, %v6998_v8 }
  0x9a   : > { %5985 = vmatmul.mubr.msk.f32.gmra.mrb[60].mxu1 %vm381_vm0, %v6993_v6 }
  0x9b   : > { %5987 = vmatprep.mubr.msk.f32.mxu1 %vm381_vm0, %v6998_v8 }
  0x9c   : > { %5924 = vmatmul.mubr.msk.f32.gmra.mrb[62].mxu0 %vm381_vm0, %v7007_v9 }
  0x9d   : > { %6006 = vmatprep.mubr.msk.f32.mxu0 %vm381_vm0, %v6749_v20  ;;  %v7249_v20 = vld [vmem:[%s10355_s2] ss:$0 sm:$0xff] }
  0x9e   : > { %5988 = vmatmul.mubr.msk.f32.gmra.mrb[62].mxu1 %vm381_vm0, %v7007_v9 }
  0xa0   : > { %6007 = vmatmul.mubr.msk.f32.vlgmr.msra.gmra.mrb[64].mxu0 %vm381_vm0, %v6774_v30 }
  0xa1   : > { %6009 = vmatprep.mubr.msk.f32.mxu0 %vm381_vm0, %v6777_v31  ;;  %v7259_v31 = vld [vmem:[%s10356_s3] ss:$0 sm:$0xff] }
  0xa4   : > { %6010 = vmatmul.mubr.msk.f32.gmra.mrb[66].mxu0 %vm381_vm0, %v6792_v35 }
  0xa5   : > { %6012 = vmatprep.mubr.msk.f32.mxu0 %vm381_vm0, %v6797_v36 }
  0xa8   : > { %6013 = vmatmul.mubr.msk.f32.gmra.mrb[68].mxu0 %vm381_vm0, %v6812_v40 }
  0xa9   : > { %6015 = vmatprep.mubr.msk.f32.mxu0 %vm381_vm0, %v6817_v41 }
  0xac   : > { %6016 = vmatmul.mubr.msk.f32.gmra.mrb[70].mxu0 %vm381_vm0, %v6832_v45 }
  0xad   : > { %6018 = vmatprep.mubr.msk.f32.mxu0 %vm381_vm0, %v6837_v46 }
  0xb0   : > { %6019 = vmatmul.mubr.msk.f32.gmra.mrb[72].mxu0 %vm381_vm0, %v6848_v48 }
  0xb1   : > { %6021 = vmatprep.mubr.msk.f32.mxu0 %vm381_vm0, %v6853_v49 }
  0xb4   : > { %6022 = vmatmul.mubr.msk.f32.gmra.mrb[74].mxu0 %vm381_vm0, %v6863_v50 }
  0xb5   : > { %6024 = vmatprep.mubr.msk.f32.mxu0 %vm381_vm0, %v6868_v51 }
  0xb8   : > { %6025 = vmatmul.mubr.msk.f32.gmra.mrb[76].mxu0 %vm381_vm0, %v6877_v52 }
  0xb9   : > { %6027 = vmatprep.mubr.msk.f32.mxu0 %vm381_vm0, %v6882_v53 }
  0xbc   : > { %6028 = vmatmul.mubr.msk.f32.gmra.mrb[78].mxu0 %vm381_vm0, %v6891_v54 }
  0xbd   : > { %6030 = vmatprep.mubr.msk.f32.mxu0 %vm381_vm0, %v6896_v55 }
  0xc0   : > { %6031 = vmatmul.mubr.msk.f32.gmra.mrb[80].mxu0 %vm381_vm0, %v6905_v56 }
  0xc1   : > { %6033 = vmatprep.mubr.msk.f32.mxu0 %vm381_vm0, %v6910_v57 }
  0xc4   : > { %6034 = vmatmul.mubr.msk.f32.gmra.mrb[82].mxu0 %vm381_vm0, %v6919_v58 }
  0xc5   : > { %6036 = vmatprep.mubr.msk.f32.mxu0 %vm381_vm0, %v6924_v59 }
  0xc8   : > { %6037 = vmatmul.mubr.msk.f32.gmra.mrb[84].mxu0 %vm381_vm0, %v6933_v60 }
  0xc9   : > { %6039 = vmatprep.mubr.msk.f32.mxu0 %vm381_vm0, %v6936_v61 }
  0xcc   : > { %6040 = vmatmul.mubr.msk.f32.gmra.mrb[86].mxu0 %vm381_vm0, %v6945_v62 }
  0xcd   : > { %6042 = vmatprep.mubr.msk.f32.mxu0 %vm381_vm0, %v6950_v63 }
  0xd0   : > { %6043 = vmatmul.mubr.msk.f32.gmra.mrb[88].mxu0 %vm381_vm0, %v6959_v0 }
  0xd1   : > { %6045 = vmatprep.mubr.msk.f32.mxu0 %vm381_vm0, %v6964_v1 }
  0xd4   : > { %6046 = vmatmul.mubr.msk.f32.gmra.mrb[90].mxu0 %vm381_vm0, %v6973_v2 }
  0xd5   : > { %6048 = vmatprep.mubr.msk.f32.mxu0 %vm381_vm0, %v6978_v3 }
  0xd8   : > { %6049 = vmatmul.mubr.msk.f32.gmra.mrb[92].mxu0 %vm381_vm0, %v6993_v6 }
  0xd9   : > { %6051 = vmatprep.mubr.msk.f32.mxu0 %vm381_vm0, %v6998_v8 }
  0xdc   : > { %6052 = vmatmul.mubr.msk.f32.gmra.mrb[94].mxu0 %vm381_vm0, %v7007_v9 }
  0xf3   : > { %v5752_v30 = vpop.f32.mrb[0].mxu0 }
  0xf4   : > { %v5816_v32 = vpop.f32.mrb[0].mxu1  ;;  %v550_v34 = vadd.f32 %v5752_v30, %v7249_v20  ;;  %v544_v35 = vpop.f32.mrb[1].mxu0 }
  0xf5   : > { %v911_v36 = vadd.f32 %v5816_v32, %v7254_v29  ;;  %v905_v37 = vpop.f32.mrb[1].mxu1  ;;  %v545_v38 = vadd.f32 %v7249_v20, %v544_v35 }
  0xf6   : > { %v906_v39 = vadd.f32 %v7254_v29, %v905_v37  ;;  %vm704_vm2 = vcmp.ge.f32.partialorder %v550_v34, 0.0  ;;  %v743_v40 = vmul.f32 %v7259_v31, %v550_v34 }
  0xf7   : > { %vm1065_vm3 = vcmp.ge.f32.partialorder %v911_v36, 0.0  ;;  %v1105_v41 = vmul.f32 %v7264_v33, %v911_v36  ;;  %vm703_vm4 = vcmp.ge.f32.partialorder %v545_v38, 0.0  ;;  %v742_v42 = vmul.f32 %v7259_v31, %v545_v38  ;;  %v5755_v43 = vpop.f32.mrb[2].mxu0 }
  0xf8   : > { %vm1064_vm5 = vcmp.ge.f32.partialorder %v906_v39, 0.0  ;;  %v1104_v44 = vmul.f32 %v7264_v33, %v906_v39  ;;  %v5819_v45 = vpop.f32.mrb[2].mxu1  ;;  %v775_v46 = vsel %vm704_vm2, %v550_v34, %v743_v40  ;;  %v560_v47 = vadd.f32 %v5755_v43, %v7249_v20  ;;  %v554_v48 = vpop.f32.mrb[3].mxu0 }
  0xf9   : > { %v1137_v49 = vsel %vm1065_vm3, %v911_v36, %v1105_v41  ;;  %v921_v50 = vadd.f32 %v5819_v45, %v7254_v29  ;;  %v915_v51 = vpop.f32.mrb[3].mxu1  ;;  %v774_v52 = vsel %vm703_vm4, %v545_v38, %v742_v42  ;;  %v555_v53 = vadd.f32 %v7249_v20, %v554_v48 }
  0xfa   : > { %v1136_v54 = vsel %vm1064_vm5, %v906_v39, %v1104_v44  ;;  %v916_v55 = vadd.f32 %v7254_v29, %v915_v51  ;;  %v7278_v56 = vpack.c.bf16 %v775_v46, %v774_v52  ;;  %vm706_vm6 = vcmp.ge.f32.partialorder %v560_v47, 0.0 }
  0xfb   : > { %vm1067_vm7 = vcmp.ge.f32.partialorder %v921_v50, 0.0  ;;  %v1107_v57 = vmul.f32 %v7264_v33, %v921_v50  ;;  %v1168_v58 = vpack.c.bf16 %v1137_v49, %v1136_v54  ;;  %v745_v59 = vmul.f32 %v7259_v31, %v560_v47  ;;  %v5758_v60 = vpop.f32.mrb[4].mxu0 }
  0xfc   : > { %vm1066_vm8 = vcmp.ge.f32.partialorder %v916_v55, 0.0  ;;  %v1106_v61 = vmul.f32 %v7264_v33, %v916_v55  ;;  %v5822_v62 = vpop.f32.mrb[4].mxu1  ;;  %vm705_vm9 = vcmp.ge.f32.partialorder %v555_v53, 0.0  ;;  %v744_v63 = vmul.f32 %v7259_v31, %v555_v53  ;;  %v564_v0 = vpop.f32.mrb[5].mxu0  ;;  %5396 = vmatprep.mubr.msk.bf16.mxu1 %vm2334_vm1, %v7278_v56 }
  0xfd   : > { %v1139_v1 = vsel %vm1067_vm7, %v921_v50, %v1107_v57  ;;  %v931_v2 = vadd.f32 %v5822_v62, %v7254_v29  ;;  %v925_v3 = vpop.f32.mrb[5].mxu1  ;;  %v777_v4 = vsel %vm706_vm6, %v560_v47, %v745_v59  ;;  %v570_v8 = vadd.f32 %v5758_v60, %v7249_v20 }
  0xfe   : > { %v1138_v5 = vsel %vm1066_vm8, %v916_v55, %v1106_v61  ;;  %v926_v6 = vadd.f32 %v7254_v29, %v925_v3  ;;  %v776_v7 = vsel %vm705_vm9, %v555_v53, %v744_v63  ;;  %v565_v21 = vadd.f32 %v7249_v20, %v564_v0 }
  0xff   : > { %vm1069_vm10 = vcmp.ge.f32.partialorder %v931_v2, 0.0  ;;  %v1109_v9 = vmul.f32 %v7264_v33, %v931_v2  ;;  %v1169_v10 = vpack.c.bf16 %v1139_v1, %v1138_v5  ;;  %v7291_v11 = vpack.c.bf16 %v777_v4, %v776_v7  ;;  %v5761_v12 = vpop.f32.mrb[6].mxu0 }
 0x100   : > { %vm1068_vm11 = vcmp.ge.f32.partialorder %v926_v6, 0.0  ;;  %v1108_v13 = vmul.f32 %v7264_v33, %v926_v6  ;;  %v5825_v14 = vpop.f32.mrb[6].mxu1  ;;  %v747_v15 = vmul.f32 %v7259_v31, %v570_v8  ;;  %v574_v16 = vpop.f32.mrb[7].mxu0  ;;  %vm708_vm12 = vcmp.ge.f32.partialorder %v570_v8, 0.0 }
 0x101   : > { %v7295_v17 = vsel %vm1069_vm10, %v931_v2, %v1109_v9  ;;  %v941_v18 = vadd.f32 %v5825_v14, %v7254_v29  ;;  %v935_v19 = vpop.f32.mrb[7].mxu1  ;;  %v7301_v24 = vsel %vm2334_vm1, %v1168_v58, 0  ;;  %v580_v25 = vadd.f32 %v5761_v12, %v7249_v20 }
 0x102   : > { %v1140_v22 = vsel %vm1068_vm11, %v926_v6, %v1108_v13  ;;  %v936_v23 = vadd.f32 %v7254_v29, %v935_v19  ;;  %vm707_vm14 = vcmp.ge.f32.partialorder %v565_v21, 0.0  ;;  %v779_v34 = vsel %vm708_vm12, %v570_v8, %v747_v15 }
 0x103   : > { %vm1071_vm13 = vcmp.ge.f32.partialorder %v941_v18, 0.0  ;;  %v1111_v26 = vmul.f32 %v7264_v33, %v941_v18  ;;  %v1170_v27 = vpack.c.bf16 %v7295_v17, %v1140_v22  ;;  %v5764_v28 = vpop.f32.mrb[8].mxu0  ;;  %v746_v35 = vmul.f32 %v7259_v31, %v565_v21 }
 0x104   : > { %vm1070_vm15 = vcmp.ge.f32.partialorder %v936_v23, 0.0  ;;  %v1110_v30 = vmul.f32 %v7264_v33, %v936_v23  ;;  %v5828_v32 = vpop.f32.mrb[8].mxu1  ;;  %v584_v36 = vpop.f32.mrb[9].mxu0  ;;  %vm710_vm2 = vcmp.ge.f32.partialorder %v580_v25, 0.0  ;;  %v749_v40 = vmul.f32 %v7259_v31, %v580_v25 }
 0x105   : > { %v7308_v37 = vsel %vm1071_vm13, %v941_v18, %v1111_v26  ;;  %v951_v38 = vadd.f32 %v5828_v32, %v7254_v29  ;;  %v945_v39 = vpop.f32.mrb[9].mxu1  ;;  %v778_v43 = vsel %vm707_vm14, %v565_v21, %v746_v35  ;;  %v575_v44 = vadd.f32 %v7249_v20, %v574_v16 }
 0x106   : > { %v1142_v41 = vsel %vm1070_vm15, %v936_v23, %v1110_v30  ;;  %v946_v42 = vadd.f32 %v7254_v29, %v945_v39  ;;  %v7316_v47 = vpack.c.bf16 %v779_v34, %v778_v43  ;;  %v7320_v51 = vsel %vm2334_vm1, %v1169_v10, 0 }
 0x107   : > { %vm1073_vm3 = vcmp.ge.f32.partialorder %v951_v38, 0.0  ;;  %v1113_v45 = vmul.f32 %v7264_v33, %v951_v38  ;;  %v1171_v46 = vpack.c.bf16 %v7308_v37, %v1142_v41  ;;  %v5767_v48 = vpop.f32.mrb[10].mxu0  ;;  %vm709_vm5 = vcmp.ge.f32.partialorder %v575_v44, 0.0 }
 0x108   : > { %vm1072_vm4 = vcmp.ge.f32.partialorder %v946_v42, 0.0  ;;  %v1112_v49 = vmul.f32 %v7264_v33, %v946_v42  ;;  %v5831_v50 = vpop.f32.mrb[10].mxu1  ;;  %v594_v52 = vpop.f32.mrb[11].mxu0  ;;  %v781_v57 = vsel %vm710_vm2, %v580_v25, %v749_v40  ;;  %v748_v58 = vmul.f32 %v7259_v31, %v575_v44 }
 0x109   : > { %v1145_v53 = vsel %vm1073_vm3, %v951_v38, %v1113_v45  ;;  %v961_v54 = vadd.f32 %v5831_v50, %v7254_v29  ;;  %v955_v55 = vpop.f32.mrb[11].mxu1  ;;  %v590_v61 = vadd.f32 %v5764_v28, %v7249_v20  ;;  %v585_v62 = vadd.f32 %v7249_v20, %v584_v36 }
 0x10a   : > { %v1144_v59 = vsel %vm1072_vm4, %v946_v42, %v1112_v49  ;;  %v956_v60 = vadd.f32 %v7254_v29, %v955_v55  ;;  %v780_v1 = vsel %vm709_vm5, %v575_v44, %v748_v58  ;;  %v7336_v10 = vsel %vm2334_vm1, %v1170_v27, 0 }
 0x10b   : > { %vm1075_vm6 = vcmp.ge.f32.partialorder %v961_v54, 0.0  ;;  %v1115_v63 = vmul.f32 %v7264_v33, %v961_v54  ;;  %v1172_v0 = vpack.c.bf16 %v1145_v53, %v1144_v59  ;;  %v5770_v2 = vpop.f32.mrb[12].mxu0  ;;  %v7330_v5 = vpack.c.bf16 %v781_v57, %v780_v1 }
 0x10c   : > { %vm1074_vm7 = vcmp.ge.f32.partialorder %v956_v60, 0.0  ;;  %v1114_v3 = vmul.f32 %v7264_v33, %v956_v60  ;;  %v5834_v4 = vpop.f32.mrb[12].mxu1  ;;  %vm712_vm8 = vcmp.ge.f32.partialorder %v590_v61, 0.0  ;;  %v604_v6 = vpop.f32.mrb[13].mxu0  ;;  %v751_v12 = vmul.f32 %v7259_v31, %v590_v61 }
 0x10d   : > { %v7332_v7 = vsel %vm1075_vm6, %v961_v54, %v1115_v63  ;;  %v971_v8 = vadd.f32 %v5834_v4, %v7254_v29  ;;  %v965_v9 = vpop.f32.mrb[13].mxu1  ;;  %vm711_vm9 = vcmp.ge.f32.partialorder %v585_v62, 0.0  ;;  %v750_v15 = vmul.f32 %v7259_v31, %v585_v62 }
 0x10e   : > { %v7339_v13 = vsel %vm1074_vm7, %v956_v60, %v1114_v3  ;;  %v966_v14 = vadd.f32 %v7254_v29, %v965_v9  ;;  %v783_v18 = vsel %vm712_vm8, %v590_v61, %v751_v12  ;;  %v600_v25 = vadd.f32 %v5767_v48, %v7249_v20 }
 0x10f   : > { %vm1077_vm10 = vcmp.ge.f32.partialorder %v971_v8, 0.0  ;;  %v1117_v16 = vmul.f32 %v7264_v33, %v971_v8  ;;  %v1173_v17 = vpack.c.bf16 %v7332_v7, %v7339_v13  ;;  %v5773_v19 = vpop.f32.mrb[14].mxu0  ;;  %v782_v23 = vsel %vm711_vm9, %v585_v62, %v750_v15 }
 0x110   : > { %vm1076_vm11 = vcmp.ge.f32.partialorder %v966_v14, 0.0  ;;  %v1116_v21 = vmul.f32 %v7264_v33, %v966_v14  ;;  %v5837_v22 = vpop.f32.mrb[14].mxu1  ;;  %v7348_v26 = vpop.f32.mrb[15].mxu0  ;;  %v7354_v32 = vsel %vm2334_vm1, %v1171_v46, 0  ;;  %v7356_v34 = vpack.c.bf16 %v783_v18, %v782_v23 }
 0x111   : > { %v7350_v27 = vsel %vm1077_vm10, %v971_v8, %v1117_v16  ;;  %v981_v28 = vadd.f32 %v5837_v22, %v7254_v29  ;;  %v975_v30 = vpop.f32.mrb[15].mxu1  ;;  %vm714_vm12 = vcmp.ge.f32.partialorder %v600_v25, 0.0  ;;  %v753_v37 = vmul.f32 %v7259_v31, %v600_v25 }
 0x112   : > { %v7358_v35 = vsel %vm1076_vm11, %v966_v14, %v1116_v21  ;;  %v976_v36 = vadd.f32 %v7254_v29, %v975_v30  ;;  %v595_v40 = vadd.f32 %v7249_v20, %v594_v52  ;;  %v7368_v44 = vsel %vm2334_vm1, %v1172_v0, 0 }
 0x113   : > { %vm1079_vm13 = vcmp.ge.f32.partialorder %v981_v28, 0.0  ;;  %v1119_v38 = vmul.f32 %v7264_v33, %v981_v28  ;;  %v1174_v39 = vpack.c.bf16 %v7350_v27, %v7358_v35  ;;  %v5776_v41 = vpop.f32.mrb[16].mxu0  ;;  %v610_v45 = vadd.f32 %v5770_v2, %v7249_v20 }
 0x114   : > { %vm1078_vm14 = vcmp.ge.f32.partialorder %v976_v36, 0.0  ;;  %v1118_v42 = vmul.f32 %v7264_v33, %v976_v36  ;;  %v5840_v43 = vpop.f32.mrb[16].mxu1  ;;  %v7371_v46 = vpop.f32.mrb[17].mxu0  ;;  %v785_v53 = vsel %vm714_vm12, %v600_v25, %v753_v37  ;;  %vm713_vm15 = vcmp.ge.f32.partialorder %v595_v40, 0.0 }
 0x115   : > { %v7373_v48 = vsel %vm1079_vm13, %v981_v28, %v1119_v38  ;;  %v991_v49 = vadd.f32 %v5840_v43, %v7254_v29  ;;  %v985_v50 = vpop.f32.mrb[17].mxu1  ;;  %v752_v55 = vmul.f32 %v7259_v31, %v595_v40  ;;  %vm716_vm2 = vcmp.ge.f32.partialorder %v610_v45, 0.0 }
 0x116   : > { %v7377_v52 = vsel %vm1078_vm14, %v976_v36, %v1118_v42  ;;  %v986_v54 = vadd.f32 %v7254_v29, %v985_v50  ;;  %v755_v58 = vmul.f32 %v7259_v31, %v610_v45  ;;  %v605_v59 = vadd.f32 %v7249_v20, %v604_v6 }
 0x117   : > { %vm1081_vm3 = vcmp.ge.f32.partialorder %v991_v49, 0.0  ;;  %v1121_v57 = vmul.f32 %v7264_v33, %v991_v49  ;;  %v5779_v60 = vpop.f32.mrb[18].mxu0  ;;  %v784_v63 = vsel %vm713_vm15, %v595_v40, %v752_v55  ;;  %v620_v0 = vadd.f32 %v5773_v19, %v7249_v20 }
 0x118   : > { %vm1080_vm4 = vcmp.ge.f32.partialorder %v986_v54, 0.0  ;;  %v1120_v61 = vmul.f32 %v7264_v33, %v986_v54  ;;  %v5843_v62 = vpop.f32.mrb[18].mxu1  ;;  %v7386_v1 = vpop.f32.mrb[19].mxu0  ;;  %v7389_v8 = vpack.c.bf16 %v785_v53, %v784_v63  ;;  %v787_v9 = vsel %vm716_vm2, %v610_v45, %v755_v58 }
 0x119   : > { %v1153_v2 = vsel %vm1081_vm3, %v991_v49, %v1121_v57  ;;  %v1001_v3 = vadd.f32 %v5843_v62, %v7254_v29  ;;  %v995_v4 = vpop.f32.mrb[19].mxu1  ;;  %vm715_vm5 = vcmp.ge.f32.partialorder %v605_v59, 0.0  ;;  %v754_v14 = vmul.f32 %v7259_v31, %v605_v59 }
 0x11a   : > { %v1152_v12 = vsel %vm1080_vm4, %v986_v54, %v1120_v61  ;;  %v996_v6 = vadd.f32 %v7254_v29, %v995_v4  ;;  %vm718_vm7 = vcmp.ge.f32.partialorder %v620_v0, 0.0  ;;  %v757_v23 = vmul.f32 %v7259_v31, %v620_v0 }
 0x11b   : > { %v1176_v15 = vpack.c.bf16 %v1153_v2, %v1152_v12  ;;  %vm1083_vm6 = vcmp.ge.f32.partialorder %v1001_v3, 0.0  ;;  %v1123_v16 = vmul.f32 %v7264_v33, %v1001_v3  ;;  %v7395_v18 = vpop.f32.mrb[20].mxu0  ;;  %v786_v22 = vsel %vm715_vm5, %v605_v59, %v754_v14 }
 0x11c   : > { %vm1082_vm8 = vcmp.ge.f32.partialorder %v996_v6, 0.0  ;;  %v1122_v19 = vmul.f32 %v7264_v33, %v996_v6  ;;  %v5846_v21 = vpop.f32.mrb[20].mxu1  ;;  %v7399_v25 = vpop.f32.mrb[21].mxu0  ;;  %v7403_v37 = vpack.c.bf16 %v787_v9, %v786_v22  ;;  %v615_v38 = vadd.f32 %v7249_v20, %v7348_v26 }
 0x11d   : > { %v1155_v28 = vsel %vm1083_vm6, %v1001_v3, %v1123_v16  ;;  %6190 = vmatprep.subr.msk.bf16.mxu1 %vm2334_vm1, %v1176_v15  ;;  %v1011_v30 = vadd.f32 %v5846_v21, %v7254_v29  ;;  %v1005_v36 = vpop.f32.mrb[21].mxu1  ;;  %v789_v43 = vsel %vm718_vm7, %v620_v0, %v757_v23  ;;  %v630_v45 = vadd.f32 %v5776_v41, %v7249_v20 }
 0x11e   : > { %v1154_v40 = vsel %vm1082_vm8, %v996_v6, %v1122_v19  ;;  %5381 = vmatpush3.bf16.xpose.msra.mxu1 %v7301_v24  ;;  %v1006_v42 = vadd.f32 %v7254_v29, %v1005_v36  ;;  %vm717_vm10 = vcmp.ge.f32.partialorder %v615_v38, 0.0  ;;  %v756_v55 = vmul.f32 %v7259_v31, %v615_v38 }
 0x11f   : > { %v1177_v49 = vpack.c.bf16 %v1155_v28, %v1154_v40  ;;  %vm1085_vm9 = vcmp.ge.f32.partialorder %v1011_v30, 0.0  ;;  %v1125_v50 = vmul.f32 %v7264_v33, %v1011_v30  ;;  %v7412_v53 = vpop.f32.mrb[22].mxu0  ;;  %vm720_vm12 = vcmp.ge.f32.partialorder %v630_v45, 0.0 }
 0x120   : > { %vm1084_vm11 = vcmp.ge.f32.partialorder %v1006_v42, 0.0  ;;  %v1124_v54 = vmul.f32 %v7264_v33, %v1006_v42  ;;  %v5849_v26 = vpop.f32.mrb[22].mxu1  ;;  %v7416_v24 = vpop.f32.mrb[23].mxu0  ;;  %v759_v59 = vmul.f32 %v7259_v31, %v630_v45  ;;  %v625_v61 = vadd.f32 %v7249_v20, %v7371_v46 }
 0x121   : > { %v1157_v57 = vsel %vm1085_vm9, %v1011_v30, %v1125_v50  ;;  %6191 = vmatprep.subr.msk.bf16.mxu1 %vm2334_vm1, %v1177_v49  ;;  %v1021_v41 = vadd.f32 %v5849_v26, %v7254_v29  ;;  %v1015_v58 = vpop.f32.mrb[23].mxu1  ;;  %v788_v0 = vsel %vm717_vm10, %v615_v38, %v756_v55  ;;  %v640_v2 = vadd.f32 %v5779_v60, %v7249_v20 }
 0x122   : > { %v1156_v62 = vsel %vm1084_vm11, %v1006_v42, %v1124_v54  ;;  %v1016_v63 = vadd.f32 %v7254_v29, %v1015_v58  ;;  %v7427_v9 = vpack.c.bf16 %v789_v43, %v788_v0  ;;  %v791_v46 = vsel %vm720_vm12, %v630_v45, %v759_v59 }
 0x123   : > { %v1178_v3 = vpack.c.bf16 %v1157_v57, %v1156_v62  ;;  %vm1087_vm13 = vcmp.ge.f32.partialorder %v1021_v41, 0.0  ;;  %v1127_v4 = vmul.f32 %v7264_v33, %v1021_v41  ;;  %v7429_v12 = vpop.f32.mrb[24].mxu0  ;;  %vm719_vm15 = vcmp.ge.f32.partialorder %v625_v61, 0.0 }
 0x124   : > { %vm1086_vm14 = vcmp.ge.f32.partialorder %v1016_v63, 0.0  ;;  %v1126_v6 = vmul.f32 %v7264_v33, %v1016_v63  ;;  %v5852_v14 = vpop.f32.mrb[24].mxu1  ;;  %v7433_v15 = vpop.f32.mrb[25].mxu0  ;;  %v758_v21 = vmul.f32 %v7259_v31, %v625_v61  ;;  %vm722_vm2 = vcmp.ge.f32.partialorder %v640_v2, 0.0 }
 0x125   : > { %v1159_v16 = vsel %vm1087_vm13, %v1021_v41, %v1127_v4  ;;  %v1031_v60 = vadd.f32 %v5852_v14, %v7254_v29  ;;  %v1025_v19 = vpop.f32.mrb[25].mxu1  ;;  %v761_v28 = vmul.f32 %v7259_v31, %v640_v2  ;;  %v1175_v30 = vpack.c.bf16 %v7373_v48, %v7377_v52 }
 0x126   : > { %5383 = vmatpush3.bf16.xpose.msra.mxu1 %v7320_v51  ;;  %v1158_v22 = vsel %vm1086_vm14, %v1016_v63, %v1126_v6  ;;  %v1026_v23 = vadd.f32 %v7254_v29, %v1025_v19  ;;  %v790_v40 = vsel %vm719_vm15, %v625_v61, %v758_v21  ;;  %v7452_v45 = vsel %vm2334_vm1, %v1173_v17, 0 }
 0x127   : > { %v1179_v36 = vpack.c.bf16 %v1159_v16, %v1158_v22  ;;  %6192 = vmatprep.subr.msk.bf16.mxu1 %vm2334_vm1, %v1178_v3  ;;  %vm1089_vm3 = vcmp.ge.f32.partialorder %v1031_v60, 0.0  ;;  %v1129_v38 = vmul.f32 %v7264_v33, %v1031_v60  ;;  %v7445_v42 = vpop.f32.mrb[26].mxu0  ;;  %v7454_v49 = vpack.c.bf16 %v791_v46, %v790_v40 }
 0x128   : > { %vm1088_vm4 = vcmp.ge.f32.partialorder %v1026_v23, 0.0  ;;  %v1128_v51 = vmul.f32 %v7264_v33, %v1026_v23  ;;  %v5855_v43 = vpop.f32.mrb[26].mxu1  ;;  %v7456_v50 = vpop.f32.mrb[27].mxu0  ;;  %v793_v57 = vsel %vm722_vm2, %v640_v2, %v761_v28  ;;  %v635_v41 = vadd.f32 %v7249_v20, %v7386_v1 }
 0x129   : > { %v7458_v54 = vsel %vm1089_vm3, %v1031_v60, %v1129_v38  ;;  %v1041_v26 = vadd.f32 %v5855_v43, %v7254_v29  ;;  %v1035_v55 = vpop.f32.mrb[27].mxu1  ;;  %v650_v13 = vadd.f32 %v7395_v18, %v7249_v20  ;;  %v645_v17 = vadd.f32 %v7249_v20, %v7399_v25 }
 0x12a   : > { %v7464_v58 = vsel %vm1088_vm4, %v1026_v23, %v1128_v51  ;;  %v1036_v7 = vadd.f32 %v7254_v29, %v1035_v55  ;;  %vm721_vm6 = vcmp.ge.f32.partialorder %v635_v41, 0.0  ;;  %v760_v0 = vmul.f32 %v7259_v31, %v635_v41 }
 0x12b   : > { %v1180_v59 = vpack.c.bf16 %v7458_v54, %v7464_v58  ;;  %vm1091_vm5 = vcmp.ge.f32.partialorder %v1041_v26, 0.0  ;;  %v1131_v61 = vmul.f32 %v7264_v33, %v1041_v26  ;;  %v7474_v62 = vpop.f32.mrb[28].mxu0  ;;  %vm724_vm8 = vcmp.ge.f32.partialorder %v650_v13, 0.0 }
 0x12c   : > { %vm1090_vm7 = vcmp.ge.f32.partialorder %v1036_v7, 0.0  ;;  %v1130_v1 = vmul.f32 %v7264_v33, %v1036_v7  ;;  %v5858_v63 = vpop.f32.mrb[28].mxu1  ;;  %v7478_v18 = vpop.f32.mrb[29].mxu0  ;;  %v763_v4 = vmul.f32 %v7259_v31, %v650_v13  ;;  %vm723_vm9 = vcmp.ge.f32.partialorder %v645_v17, 0.0 }
 0x12d   : > { %v7480_v2 = vsel %vm1091_vm5, %v1041_v26, %v1131_v61  ;;  %v1051_v25 = vadd.f32 %v5858_v63, %v7254_v29  ;;  %v1045_v3 = vpop.f32.mrb[29].mxu1  ;;  %v792_v46 = vsel %vm721_vm6, %v635_v41, %v760_v0  ;;  %v762_v16 = vmul.f32 %v7259_v31, %v645_v17 }
 0x12e   : > { %5385 = vmatpush3.bf16.xpose.msra.mxu1 %v7336_v10  ;;  %v7485_v6 = vsel %vm1090_vm7, %v1036_v7, %v1130_v1  ;;  %v1046_v14 = vadd.f32 %v7254_v29, %v1045_v3  ;;  %v7494_v21 = vpack.c.bf16 %v793_v57, %v792_v46  ;;  %v795_v28 = vsel %vm724_vm8, %v650_v13, %v763_v4 }
 0x12f   : > { %6193 = vmatprep.subr.msk.bf16.mxu1 %vm2334_vm1, %v1179_v36  ;;  %v1181_v60 = vpack.c.bf16 %v7480_v2, %v7485_v6  ;;  %vm1093_vm10 = vcmp.ge.f32.partialorder %v1051_v25, 0.0  ;;  %v1133_v19 = vmul.f32 %v7264_v33, %v1051_v25  ;;  %v5797_v22 = vpop.f32.mrb[30].mxu0  ;;  %v794_v38 = vsel %vm723_vm9, %v645_v17, %v762_v16 }
 0x130   : > { %vm1092_vm11 = vcmp.ge.f32.partialorder %v1046_v14, 0.0  ;;  %v1132_v10 = vmul.f32 %v7264_v33, %v1046_v14  ;;  %v5861_v23 = vpop.f32.mrb[30].mxu1  ;;  %v694_v40 = vpop.f32.mrb[31].mxu0  ;;  %v7502_v54 = vpack.c.bf16 %v795_v28, %v794_v38  ;;  %v660_v26 = vadd.f32 %v7412_v53, %v7249_v20 }
 0x131   : > { %v7499_v51 = vsel %vm1093_vm10, %v1051_v25, %v1133_v19  ;;  %v1061_v36 = vadd.f32 %v5861_v23, %v7254_v29  ;;  %v1055_v43 = vpop.f32.mrb[31].mxu1  ;;  %v655_v41 = vadd.f32 %v7249_v20, %v7416_v24  ;;  %v670_v58 = vadd.f32 %v7429_v12, %v7249_v20 }
 0x132   : > { %10463 = vst [vmem:[#allocation2_spill] sm:$0xff] %v7502_v54  ;;  %v7506_v55 = vsel %vm1092_vm11, %v1046_v14, %v1132_v10  ;;  %v1056_v57 = vadd.f32 %v7254_v29, %v1055_v43  ;;  %vm726_vm13 = vcmp.ge.f32.partialorder %v660_v26, 0.0  ;;  %v765_v61 = vmul.f32 %v7259_v31, %v660_v26 }
 0x133   : > { %v1182_v7 = vpack.c.bf16 %v7499_v51, %v7506_v55  ;;  %vm1095_vm12 = vcmp.ge.f32.partialorder %v1061_v36, 0.0  ;;  %v1135_v13 = vmul.f32 %v7264_v33, %v1061_v36  ;;  %v5880_v17 = vpop.f32.mrb[32].mxu0  ;;  %vm725_vm15 = vcmp.ge.f32.partialorder %v655_v41, 0.0 }
 0x134   : > { %vm1094_vm14 = vcmp.ge.f32.partialorder %v1056_v57, 0.0  ;;  %v1134_v53 = vmul.f32 %v7264_v33, %v1056_v57  ;;  %v1267_v29 = vpop.f32.mrb[33].mxu0  ;;  %v764_v24 = vmul.f32 %v7259_v31, %v655_v41  ;;  %vm728_vm2 = vcmp.ge.f32.partialorder %v670_v58, 0.0 }
 0x135   : > { %v7518_v1 = vsel %vm1095_vm12, %v1061_v36, %v1135_v13  ;;  %v767_v12 = vmul.f32 %v7259_v31, %v670_v58  ;;  %v797_v0 = vsel %vm726_vm13, %v660_v26, %v765_v61  ;;  %v665_v25 = vadd.f32 %v7249_v20, %v7433_v15  ;;  %v7561_v13 = vld [vmem:[%s10356_s3 + $0x2] ss:$0 sm:$0xff] }
 0x136   : > { %5387 = vmatpush3.bf16.xpose.msra.mxu1 %v7354_v32  ;;  %v7523_v63 = vsel %vm1094_vm14, %v1056_v57, %v1134_v53  ;;  %v680_v33 = vadd.f32 %v7445_v42, %v7249_v20  ;;  %v796_v4 = vsel %vm725_vm15, %v655_v41, %v764_v24  ;;  %v675_v46 = vadd.f32 %v7249_v20, %v7456_v50  ;;  %v7550_v57 = vld [vmem:[%s10355_s2 + $0x2] ss:$0 sm:$0xff] }
 0x137   : > { %6194 = vmatprep.subr.msk.bf16.mxu1 %vm2334_vm1, %v1180_v59  ;;  %v1183_v3 = vpack.c.bf16 %v7518_v1, %v7523_v63  ;;  %v799_v14 = vsel %vm728_vm2, %v670_v58, %v767_v12  ;;  %v5883_v32 = vpop.f32.mrb[34].mxu0  ;;  %v7534_v16 = vpack.c.bf16 %v797_v0, %v796_v4  ;;  %vm727_vm3 = vcmp.ge.f32.partialorder %v665_v25, 0.0  ;;  %v7656_v1 = vld [vmem:[%s10355_s2 + $0x3] ss:$0 sm:$0xff] }
 0x138   : > { %v766_v19 = vmul.f32 %v7259_v31, %v665_v25  ;;  %vm730_vm4 = vcmp.ge.f32.partialorder %v680_v33, 0.0  ;;  %v1277_v15 = vpop.f32.mrb[35].mxu0  ;;  %v769_v42 = vmul.f32 %v7259_v31, %v680_v33  ;;  %vm729_vm5 = vcmp.ge.f32.partialorder %v675_v46, 0.0 }
 0x139   : > { %10464 = vst [vmem:[#allocation3_spill] sm:$0xff] %v7534_v16  ;;  %v768_v59 = vmul.f32 %v7259_v31, %v675_v46  ;;  %v690_v10 = vadd.f32 %v7474_v62, %v7249_v20  ;;  %v685_v50 = vadd.f32 %v7249_v20, %v7478_v18  ;;  %v700_v28 = vadd.f32 %v5797_v22, %v7249_v20 }
 0x13a   : > { %v798_v23 = vsel %vm727_vm3, %v665_v25, %v766_v19  ;;  %v695_v38 = vadd.f32 %v7249_v20, %v694_v40  ;;  %v801_v43 = vsel %vm730_vm4, %v680_v33, %v769_v42  ;;  %v1273_v24 = vadd.f32 %v5880_v17, %v7550_v57 }
 0x13b   : > { %v7545_v36 = vpack.c.bf16 %v799_v14, %v798_v23  ;;  %v800_v26 = vsel %vm729_vm5, %v675_v46, %v768_v59  ;;  %vm732_vm6 = vcmp.ge.f32.partialorder %v690_v10, 0.0  ;;  %v5886_v41 = vpop.f32.mrb[36].mxu0  ;;  %v771_v58 = vmul.f32 %v7259_v31, %v690_v10 }
 0x13c   : > { %v7552_v62 = vpack.c.bf16 %v801_v43, %v800_v26  ;;  %vm731_vm7 = vcmp.ge.f32.partialorder %v685_v50, 0.0  ;;  %v770_v18 = vmul.f32 %v7259_v31, %v685_v50  ;;  %v1287_v22 = vpop.f32.mrb[37].mxu0  ;;  %vm734_vm8 = vcmp.ge.f32.partialorder %v700_v28, 0.0 }
 0x13d   : > { %10465 = vst [vmem:[#allocation4_spill] sm:$0xff] %v7545_v36  ;;  %v773_v20 = vmul.f32 %v7259_v31, %v700_v28  ;;  %vm733_vm9 = vcmp.ge.f32.partialorder %v695_v38, 0.0  ;;  %v772_v40 = vmul.f32 %v7259_v31, %v695_v38  ;;  %v803_v53 = vsel %vm732_vm6, %v690_v10, %v771_v58 }
 0x13e   : > { %10466 = vst [vmem:[#allocation5_spill] sm:$0xff] %v7552_v62  ;;  %5389 = vmatpush3.bf16.xpose.msra.mxu1 %v7368_v44  ;;  %v802_v61 = vsel %vm731_vm7, %v685_v50, %v770_v18  ;;  %v1268_v12 = vadd.f32 %v7550_v57, %v1267_v29  ;;  %v1283_v33 = vadd.f32 %v5883_v32, %v7550_v57  ;;  %vm1427_vm10 = vcmp.ge.f32.partialorder %v1273_v24, 0.0  ;;  %v7799_v62 = vld [vmem:[%s10356_s3 + $0x4] ss:$0 sm:$0xff] }
 0x13f   : > { %6195 = vmatprep.subr.msk.bf16.mxu1 %vm2334_vm1, %v1181_v60  ;;  %v7570_v0 = vpack.c.bf16 %v803_v53, %v802_v61  ;;  %v805_v31 = vsel %vm734_vm8, %v700_v28, %v773_v20  ;;  %v804_v25 = vsel %vm733_vm9, %v695_v38, %v772_v40  ;;  %v5889_v4 = vpop.f32.mrb[38].mxu0  ;;  %v1467_v44 = vmul.f32 %v7561_v13, %v1273_v24 }
 0x140   : > { %v7573_v14 = vpack.c.bf16 %v805_v31, %v804_v25  ;;  %vm1426_vm11 = vcmp.ge.f32.partialorder %v1268_v12, 0.0  ;;  %v1297_v17 = vpop.f32.mrb[39].mxu0  ;;  %v1466_v29 = vmul.f32 %v7561_v13, %v1268_v12  ;;  %vm1429_vm12 = vcmp.ge.f32.partialorder %v1283_v33, 0.0 }
 0x141   : > { %10467 = vst [vmem:[#allocation6_spill] sm:$0xff] %v7570_v0  ;;  %v1469_v2 = vmul.f32 %v7561_v13, %v1283_v33  ;;  %v1278_v6 = vadd.f32 %v7550_v57, %v1277_v15  ;;  %v7579_v60 = vsel %vm1427_vm10, %v1273_v24, %v1467_v44  ;;  %v1293_v46 = vadd.f32 %v5886_v41, %v7550_v57 }
 0x142   : > { %10468 = vst [vmem:[#allocation7_spill] sm:$0xff] %v7573_v14  ;;  %v1288_v32 = vadd.f32 %v7550_v57, %v1287_v22  ;;  %v1303_v19 = vadd.f32 %v5889_v4, %v7550_v57  ;;  %v7584_v42 = vsel %vm1426_vm11, %v1268_v12, %v1466_v29  ;;  %v1298_v18 = vadd.f32 %v7550_v57, %v1297_v17 }
 0x143   : > { %v7586_v59 = vsel %vm1429_vm12, %v1283_v33, %v1469_v2  ;;  %vm1428_vm13 = vcmp.ge.f32.partialorder %v1278_v6, 0.0  ;;  %v1468_v10 = vmul.f32 %v7561_v13, %v1278_v6  ;;  %v5892_v23 = vpop.f32.mrb[40].mxu0  ;;  %vm1431_vm14 = vcmp.ge.f32.partialorder %v1293_v46, 0.0 }
 0x144   : > { %v1471_v15 = vmul.f32 %v7561_v13, %v1293_v46  ;;  %vm1430_vm15 = vcmp.ge.f32.partialorder %v1288_v32, 0.0  ;;  %v1307_v28 = vpop.f32.mrb[41].mxu0  ;;  %v1470_v43 = vmul.f32 %v7561_v13, %v1288_v32  ;;  %vm1433_vm2 = vcmp.ge.f32.partialorder %v1303_v19, 0.0 }
 0x145   : > { %v7592_v38 = vsel %vm1428_vm13, %v1278_v6, %v1468_v10  ;;  %v1473_v26 = vmul.f32 %v7561_v13, %v1303_v19  ;;  %v1313_v22 = vadd.f32 %v5892_v23, %v7550_v57  ;;  %vm1432_vm3 = vcmp.ge.f32.partialorder %v1298_v18, 0.0 }
 0x146   : > { %5391 = vmatpush3.bf16.xpose.msra.mxu1 %v7452_v45  ;;  %v7599_v58 = vsel %vm1431_vm14, %v1293_v46, %v1471_v15  ;;  %v7607_v20 = vsel %vm1430_vm15, %v1288_v32, %v1470_v43  ;;  %v1308_v45 = vadd.f32 %v7550_v57, %v1307_v28  ;;  %v1472_v24 = vmul.f32 %v7561_v13, %v1298_v18 }
 0x147   : > { %6196 = vmatprep.subr.msk.bf16.mxu1 %vm2334_vm1, %v1182_v7  ;;  %v7609_v40 = vsel %vm1433_vm2, %v1303_v19, %v1473_v26  ;;  %v5895_v53 = vpop.f32.mrb[42].mxu0  ;;  %vm1435_vm4 = vcmp.ge.f32.partialorder %v1313_v22, 0.0  ;;  %v1475_v31 = vmul.f32 %v7561_v13, %v1313_v22  ;;  %v2402_v32 = vsel %vm2334_vm1, %v1174_v39, 0 }
 0x148   : > { %v1317_v12 = vpop.f32.mrb[43].mxu0  ;;  %vm1434_vm5 = vcmp.ge.f32.partialorder %v1308_v45, 0.0  ;;  %v1474_v51 = vmul.f32 %v7561_v13, %v1308_v45  ;;  %v1323_v55 = vadd.f32 %v5895_v53, %v7550_v57  ;;  %v7618_v7 = vsel %vm1432_vm3, %v1298_v18, %v1472_v24 }
 0x149   : > { %v1318_v25 = vadd.f32 %v7550_v57, %v1317_v12  ;;  %v7623_v4 = vsel %vm1435_vm4, %v1313_v22, %v1475_v31  ;;  %v5944_v12 = vpop.f32.mrb[32].mxu1 }
 0x14a   : > { %v7625_v44 = vsel %vm1434_vm5, %v1308_v45, %v1474_v51  ;;  %vm1437_vm6 = vcmp.ge.f32.partialorder %v1323_v55, 0.0  ;;  %v1477_v2 = vmul.f32 %v7561_v13, %v1323_v55 }
 0x14b   : > { %v5898_v17 = vpop.f32.mrb[44].mxu0  ;;  %vm1436_vm7 = vcmp.ge.f32.partialorder %v1318_v25, 0.0  ;;  %v1476_v6 = vmul.f32 %v7561_v13, %v1318_v25 }
 0x14c   : > { %v1327_v46 = vpop.f32.mrb[45].mxu0  ;;  %v1333_v19 = vadd.f32 %v5898_v17, %v7550_v57  ;;  %v7637_v23 = vsel %vm1437_vm6, %v1323_v55, %v1477_v2  ;;  %v1635_v55 = vadd.f32 %v5944_v12, %v7656_v1  ;;  %v1629_v17 = vpop.f32.mrb[33].mxu1  ;;  %v2405_v2 = vsel %vm2334_vm1, %v1175_v30, 0 }
 0x14d   : > { %v1328_v10 = vadd.f32 %v7550_v57, %v1327_v46  ;;  %v7639_v15 = vsel %vm1436_vm7, %v1318_v25, %v1476_v6  ;;  %v7670_v25 = vld [vmem:[%s10356_s3 + $0x3] ss:$0 sm:$0xff]  ;;  %v1630_v46 = vadd.f32 %v7656_v1, %v1629_v17 }
 0x14e   : > { %5393 = vmatpush3.bf16.xpose.msra.mxu1 %v2402_v32  ;;  %vm1439_vm8 = vcmp.ge.f32.partialorder %v1333_v19, 0.0  ;;  %v1479_v27 = vmul.f32 %v7561_v13, %v1333_v19  ;;  %vm1789_vm12 = vcmp.ge.f32.partialorder %v1635_v55, 0.0 }
 0x14f   : > { %6197 = vmatprep.subr.msk.bf16.mxu1 %vm2334_vm1, %v1183_v3  ;;  %vm1438_vm9 = vcmp.ge.f32.partialorder %v1328_v10, 0.0  ;;  %v5901_v35 = vpop.f32.mrb[46].mxu0  ;;  %v1478_v39 = vmul.f32 %v7561_v13, %v1328_v10  ;;  %vm1788_vm13 = vcmp.ge.f32.partialorder %v1630_v46, 0.0 }
 0x150   : > { %v1343_v43 = vadd.f32 %v5901_v35, %v7550_v57  ;;  %v1337_v26 = vpop.f32.mrb[47].mxu0  ;;  %v7650_v18 = vsel %vm1439_vm8, %v1333_v19, %v1479_v27  ;;  %v5947_v27 = vpop.f32.mrb[34].mxu1 }
 0x151   : > { %10469 = vst [vmem:[#allocation8_spill] sm:$0xff] %v7650_v18  ;;  %v1338_v22 = vadd.f32 %v7550_v57, %v1337_v26  ;;  %v7658_v63 = vsel %vm1438_vm9, %v1328_v10, %v1478_v39  ;;  %v1829_v10 = vmul.f32 %v7670_v25, %v1635_v55  ;;  %v1828_v39 = vmul.f32 %v7670_v25, %v1630_v46  ;;  %v1639_v52 = vpop.f32.mrb[35].mxu1 }
 0x152   : > { %10470 = vst [vmem:[#allocation9_spill] sm:$0xff] %v7658_v63  ;;  %vm1441_vm10 = vcmp.ge.f32.partialorder %v1343_v43, 0.0  ;;  %v1481_v3 = vmul.f32 %v7561_v13, %v1343_v43  ;;  %v1645_v48 = vadd.f32 %v5947_v27, %v7656_v1  ;;  %v5950_v27 = vpop.f32.mrb[36].mxu1 }
 0x153   : > { %vm1440_vm11 = vcmp.ge.f32.partialorder %v1338_v22, 0.0  ;;  %v1480_v53 = vmul.f32 %v7561_v13, %v1338_v22  ;;  %v5904_v24 = vpop.f32.mrb[48].mxu0  ;;  %v1861_v30 = vsel %vm1789_vm12, %v1635_v55, %v1829_v10  ;;  %v1860_v26 = vsel %vm1788_vm13, %v1630_v46, %v1828_v39  ;;  %v1649_v10 = vpop.f32.mrb[37].mxu1 }
 0x154   : > { %v7664_v31 = vsel %vm1441_vm10, %v1343_v43, %v1481_v3  ;;  %v1347_v51 = vpop.f32.mrb[49].mxu0  ;;  %v1640_v43 = vadd.f32 %v7656_v1, %v1639_v52  ;;  %vm1791_vm14 = vcmp.ge.f32.partialorder %v1645_v48, 0.0  ;;  %v7685_v3 = vpack.c.bf16 %v1861_v30, %v1860_v26 }
 0x155   : > { %10471 = vst [vmem:[#allocation10_spill] sm:$0xff] %v7664_v31  ;;  %v7676_v6 = vsel %vm1440_vm11, %v1338_v22, %v1480_v53  ;;  %v1831_v53 = vmul.f32 %v7670_v25, %v1645_v48  ;;  %v1655_v46 = vadd.f32 %v5950_v27, %v7656_v1  ;;  %v1650_v30 = vadd.f32 %v7656_v1, %v1649_v10 }
 0x156   : > { %10472 = vst [vmem:[#allocation11_spill] sm:$0xff] %v7676_v6  ;;  %5395 = vmatpush3.bf16.xpose.msra.mxu1 %v2405_v2  ;;  %10473 = vst [vmem:[#allocation12_spill] sm:$0xff] %v7685_v3  ;;  %vm1790_vm15 = vcmp.ge.f32.partialorder %v1640_v43, 0.0  ;;  %v1830_v17 = vmul.f32 %v7670_v25, %v1640_v43 }
 0x157   : > { %v5907_v19 = vpop.f32.mrb[50].mxu0  ;;  %v1863_v2 = vsel %vm1791_vm14, %v1645_v48, %v1831_v53  ;;  %vm1793_vm2 = vcmp.ge.f32.partialorder %v1655_v46, 0.0  ;;  %v1833_v32 = vmul.f32 %v7670_v25, %v1655_v46  ;;  %vm1792_vm3 = vcmp.ge.f32.partialorder %v1650_v30, 0.0 }
 0x158   : > { %v1357_v35 = vpop.f32.mrb[51].mxu0  ;;  %v1862_v55 = vsel %vm1790_vm15, %v1640_v43, %v1830_v17  ;;  %v5953_v17 = vpop.f32.mrb[38].mxu1 }
 0x159   : > { %v7694_v52 = vpack.c.bf16 %v1863_v2, %v1862_v55  ;;  %v1865_v48 = vsel %vm1793_vm2, %v1655_v46, %v1833_v32  ;;  %v1665_v2 = vadd.f32 %v5953_v17, %v7656_v1  ;;  %v1659_v27 = vpop.f32.mrb[39].mxu1  ;;  %v7708_v32 = vadd.f32 %v5904_v24, %v7550_v57 }
 0x15a   : > { %v1660_v10 = vadd.f32 %v7656_v1, %v1659_v27  ;;  %v1348_v46 = vadd.f32 %v7550_v57, %v1347_v51 }
 0x15b   : > { %v5910_v22 = vpop.f32.mrb[52].mxu0  ;;  %10474 = vst [vmem:[#allocation13_spill] sm:$0xff] %v7694_v52  ;;  %vm1795_vm4 = vcmp.ge.f32.partialorder %v1665_v2, 0.0  ;;  %vm1443_vm6 = vcmp.ge.f32.partialorder %v7708_v32, 0.0  ;;  %v1483_v24 = vmul.f32 %v7561_v13, %v7708_v32 }
 0x15c   : > { %v1367_v12 = vpop.f32.mrb[53].mxu0  ;;  %vm1794_vm5 = vcmp.ge.f32.partialorder %v1660_v10, 0.0  ;;  %vm1442_vm7 = vcmp.ge.f32.partialorder %v1348_v46, 0.0 }
 0x15d   : > { %5397 = vmatmul.mubr.msk.bf16.vlgmr.msra.gmra.mrb[64].mxu1 %vm2334_vm1, %v7278_v56  ;;  %v1832_v56 = vmul.f32 %v7670_v25, %v1650_v30  ;;  %v1515_v31 = vsel %vm1443_vm6, %v7708_v32, %v1483_v24 }
 0x15e   : > { %5398 = vmatprep.mubr.msk.bf16.mxu1 %vm2334_vm1, %v7291_v11 }
 0x15f   : > { %v5913_v39 = vpop.f32.mrb[54].mxu0  ;;  %v1864_v45 = vsel %vm1792_vm3, %v1650_v30, %v1832_v56  ;;  %v1835_v30 = vmul.f32 %v7670_v25, %v1665_v2  ;;  %v1834_v56 = vmul.f32 %v7670_v25, %v1660_v10 }
 0x160   : > { %v1377_v26 = vpop.f32.mrb[55].mxu0  ;;  %v7699_v43 = vpack.c.bf16 %v1865_v48, %v1864_v45 }
 0x161   : > { %v1867_v48 = vsel %vm1795_vm4, %v1665_v2, %v1835_v30  ;;  %v1866_v29 = vsel %vm1794_vm5, %v1660_v10, %v1834_v56  ;;  %v1358_v10 = vadd.f32 %v7550_v57, %v1357_v35  ;;  %v5956_v30 = vpop.f32.mrb[40].mxu1  ;;  %v7735_v56 = vadd.f32 %v5910_v22, %v7550_v57 }
 0x162   : > { %10475 = vst [vmem:[#allocation14_spill] sm:$0xff] %v7699_v43  ;;  %v7723_v27 = vpack.c.bf16 %v1867_v48, %v1866_v29  ;;  %v7738_v29 = vadd.f32 %v7550_v57, %v1367_v12  ;;  %v1675_v48 = vadd.f32 %v5956_v30, %v7656_v1  ;;  %v1669_v33 = vpop.f32.mrb[41].mxu1  ;;  %v7745_v61 = vadd.f32 %v7550_v57, %v1377_v26 }
 0x163   : > { %v5916_v53 = vpop.f32.mrb[56].mxu0  ;;  %v1670_v12 = vadd.f32 %v7656_v1, %v1669_v33  ;;  %vm1444_vm10 = vcmp.ge.f32.partialorder %v1358_v10, 0.0  ;;  %vm1447_vm12 = vcmp.ge.f32.partialorder %v7735_v56, 0.0  ;;  %v5959_v18 = vpop.f32.mrb[42].mxu1 }
 0x164   : > { %v1387_v28 = vpop.f32.mrb[57].mxu0  ;;  %10476 = vst [vmem:[#allocation15_spill] sm:$0xff] %v7723_v27  ;;  %v7748_v35 = vadd.f32 %v5916_v53, %v7550_v57  ;;  %vm1797_vm9 = vcmp.ge.f32.partialorder %v1675_v48, 0.0  ;;  %v1837_v26 = vmul.f32 %v7670_v25, %v1675_v48  ;;  %v1484_v53 = vmul.f32 %v7561_v13, %v1358_v10 }
 0x165   : > { %5399 = vmatmul.mubr.msk.bf16.gmra.mrb[68].mxu1 %vm2334_vm1, %v7291_v11  ;;  %v7713_v11 = vadd.f32 %v5907_v19, %v7550_v57  ;;  %v1482_v19 = vmul.f32 %v7561_v13, %v1348_v46  ;;  %v7751_v41 = vadd.f32 %v7550_v57, %v1387_v28  ;;  %v7769_v28 = vld [vmem:[%s10355_s2 + $0x4] ss:$0 sm:$0xff]  ;;  %vm1796_vm11 = vcmp.ge.f32.partialorder %v1670_v12, 0.0 }
 0x166   : > { %5400 = vmatprep.mubr.msk.bf16.mxu1 %vm2334_vm1, %v7316_v47  ;;  %v1836_v33 = vmul.f32 %v7670_v25, %v1670_v12  ;;  %v1869_v43 = vsel %vm1797_vm9, %v1675_v48, %v1837_v26  ;;  %v7786_v52 = vmul.f32 %v7561_v13, %v7745_v61  ;;  %v7790_v3 = vmul.f32 %v7561_v13, %v7748_v35 }
 0x167   : > { %v5919_v55 = vpop.f32.mrb[58].mxu0  ;;  %vm1445_vm8 = vcmp.ge.f32.partialorder %v7713_v11, 0.0  ;;  %v1485_v2 = vmul.f32 %v7561_v13, %v7713_v11  ;;  %v7794_v14 = vmul.f32 %v7561_v13, %v7751_v41  ;;  %vm1446_vm13 = vcmp.ge.f32.partialorder %v7738_v29, 0.0 }
 0x168   : > { %v1397_v45 = vpop.f32.mrb[59].mxu0  ;;  %v7757_v50 = vadd.f32 %v5919_v55, %v7550_v57  ;;  %v7774_v55 = vmul.f32 %v7561_v13, %v7735_v56  ;;  %v1868_v36 = vsel %vm1796_vm11, %v1670_v12, %v1836_v33  ;;  %v1514_v33 = vsel %vm1442_vm7, %v1348_v46, %v1482_v19 }
 0x169   : > { %v7812_v6 = vpack.c.bf16 %v1869_v43, %v1868_v36  ;;  %v1516_v63 = vsel %vm1444_vm10, %v1358_v10, %v1484_v53  ;;  %vm1448_vm15 = vcmp.ge.f32.partialorder %v7745_v61, 0.0  ;;  %v1517_v36 = vsel %vm1445_vm8, %v7713_v11, %v1485_v2 }
 0x16a   : > { %v7805_v48 = vmul.f32 %v7561_v13, %v7757_v50  ;;  %v1539_v46 = vpack.c.bf16 %v1517_v36, %v1516_v63  ;;  %v1685_v24 = vadd.f32 %v5959_v18, %v7656_v1  ;;  %v10477_v63 = vpack.c.bf16 %v7579_v60, %v7584_v42 }
 0x16b   : > { %v7716_v17 = vpop.f32.mrb[60].mxu0  ;;  %vm1450_vm8 = vcmp.ge.f32.partialorder %v7751_v41, 0.0  ;;  %vm1451_vm9 = vcmp.ge.f32.partialorder %v7748_v35, 0.0 }
 0x16c   : > { %v7721_v51 = vpop.f32.mrb[61].mxu0  ;;  %v7834_v19 = vadd.f32 %v7716_v17, %v7550_v57  ;;  %vm1799_vm4 = vcmp.ge.f32.partialorder %v1685_v24, 0.0  ;;  %v1839_v18 = vmul.f32 %v7670_v25, %v1685_v24 }
 0x16d   : > { %5401 = vmatmul.mubr.msk.bf16.gmra.mrb[72].mxu1 %vm2334_vm1, %v7316_v47  ;;  %v7741_v47 = vadd.f32 %v5913_v39, %v7550_v57  ;;  %v7760_v39 = vadd.f32 %v7550_v57, %v1397_v45  ;;  %v7778_v45 = vmul.f32 %v7561_v13, %v7738_v29  ;;  %v7858_v42 = vadd.f32 %v7550_v57, %v7721_v51 }
 0x16e   : > { %5402 = vmatprep.mubr.msk.bf16.mxu1 %vm2334_vm1, %v7330_v5  ;;  %v7854_v60 = vmul.f32 %v7561_v13, %v7834_v19 }
 0x16f   : > { %v7753_v22 = vpop.f32.mrb[62].mxu0  ;;  %v7782_v27 = vmul.f32 %v7561_v13, %v7741_v47  ;;  %v7809_v26 = vmul.f32 %v7561_v13, %v7760_v39  ;;  %vm1449_vm14 = vcmp.ge.f32.partialorder %v7741_v47, 0.0 }
 0x170   : > { %v7762_v30 = vpop.f32.mrb[63].mxu0 }
 0x173   : > { %v6008_v0 = vpop.f32.mrb[64].mxu0 }
 0x174   : > { %v1997_v16 = vadd.f32 %v6008_v0, %v7769_v28  ;;  %v1991_v54 = vpop.f32.mrb[65].mxu0  ;;  %v1679_v0 = vpop.f32.mrb[43].mxu1 }
 0x175   : > { %5403 = vmatmul.mubr.msk.bf16.gmra.mrb[76].mxu1 %vm2334_vm1, %v7330_v5  ;;  %v1992_v12 = vadd.f32 %v7769_v28, %v1991_v54  ;;  %v1538_v54 = vpack.c.bf16 %v1515_v31, %v1514_v33  ;;  %v1680_v11 = vadd.f32 %v7656_v1, %v1679_v0 }
 0x176   : > { %5404 = vmatprep.mubr.msk.bf16.mxu1 %vm2334_vm1, %v7356_v34  ;;  %vm2151_vm2 = vcmp.ge.f32.partialorder %v1997_v16, 0.0  ;;  %v2191_v5 = vmul.f32 %v7799_v62, %v1997_v16 }
 0x177   : > { %vm2150_vm3 = vcmp.ge.f32.partialorder %v1992_v12, 0.0  ;;  %v2190_v43 = vmul.f32 %v7799_v62, %v1992_v12  ;;  %v6011_v32 = vpop.f32.mrb[66].mxu0  ;;  %5428 = vmatprep.subr.bf16.mxu0 %v1538_v54  ;;  %vm1798_vm6 = vcmp.ge.f32.partialorder %v1680_v11, 0.0  ;;  %v1871_v54 = vsel %vm1799_vm4, %v1685_v24, %v1839_v18 }
 0x178   : > { %v7836_v10 = vsel %vm2151_vm2, %v1997_v16, %v2191_v5  ;;  %v2007_v31 = vadd.f32 %v6011_v32, %v7769_v28  ;;  %v2001_v53 = vpop.f32.mrb[67].mxu0  ;;  %5429 = vmatpush3.bf16.msra.mxu0 %v10477_v63  ;;  %v1838_v36 = vmul.f32 %v7670_v25, %v1680_v11  ;;  %vm1453_vm2 = vcmp.ge.f32.partialorder %v7757_v50, 0.0 }
 0x179   : > { %v7840_v2 = vsel %vm2150_vm3, %v1992_v12, %v2190_v43  ;;  %v2002_v33 = vadd.f32 %v7769_v28, %v2001_v53  ;;  %5430 = vmatprep.subr.bf16.mxu0 %v1539_v46  ;;  %v10478_v53 = vpack.c.bf16 %v7586_v59, %v7592_v38 }
 0x17a   : > { %vm2153_vm5 = vcmp.ge.f32.partialorder %v2007_v31, 0.0  ;;  %v2193_v16 = vmul.f32 %v7799_v62, %v2007_v31  ;;  %v2254_v17 = vpack.c.bf16 %v7836_v10, %v7840_v2  ;;  %v1870_v51 = vsel %vm1798_vm6, %v1680_v11, %v1838_v36 }
 0x17b   : > { %vm2152_vm7 = vcmp.ge.f32.partialorder %v2002_v33, 0.0  ;;  %v2192_v12 = vmul.f32 %v7799_v62, %v2002_v33  ;;  %v6014_v5 = vpop.f32.mrb[68].mxu0  ;;  %v1518_v11 = vsel %vm1446_vm13, %v7738_v29, %v7778_v45  ;;  %v1520_v29 = vsel %vm1448_vm15, %v7745_v61, %v7786_v52 }
 0x17c   : > { %v7860_v0 = vsel %vm2153_vm5, %v2007_v31, %v2193_v16  ;;  %v2017_v43 = vadd.f32 %v6014_v5, %v7769_v28  ;;  %v2011_v32 = vpop.f32.mrb[69].mxu0  ;;  %5431 = vmatpush3.bf16.msra.mxu0 %v10478_v53  ;;  %v5962_v31 = vpop.f32.mrb[44].mxu1  ;;  %v1519_v16 = vsel %vm1447_vm12, %v7735_v56, %v7774_v55  ;;  %v1521_v56 = vsel %vm1449_vm14, %v7741_v47, %v7782_v27 }
 0x17d   : > { %5405 = vmatmul.mubr.msk.bf16.gmra.mrb[80].mxu1 %vm2334_vm1, %v7356_v34  ;;  %v7866_v46 = vsel %vm2152_vm7, %v2002_v33, %v2192_v12  ;;  %v2012_v24 = vadd.f32 %v7769_v28, %v2011_v32  ;;  %v7879_v33 = vpack.c.bf16 %v1871_v54, %v1870_v51  ;;  %v1689_v18 = vpop.f32.mrb[45].mxu1  ;;  %v7892_v12 = vmul.f32 %v7561_v13, %v7858_v42 }
 0x17e   : > { %5406 = vmatprep.mubr.msk.bf16.mxu1 %vm2334_vm1, %v7389_v8  ;;  %vm2155_vm10 = vcmp.ge.f32.partialorder %v2017_v43, 0.0  ;;  %v2195_v63 = vmul.f32 %v7799_v62, %v2017_v43  ;;  %v2255_v34 = vpack.c.bf16 %v7860_v0, %v7866_v46  ;;  %v1540_v32 = vpack.c.bf16 %v1519_v16, %v1518_v11 }
 0x17f   : > { %vm2154_vm11 = vcmp.ge.f32.partialorder %v2012_v24, 0.0  ;;  %v2194_v59 = vmul.f32 %v7799_v62, %v2012_v24  ;;  %v6017_v38 = vpop.f32.mrb[70].mxu0  ;;  %v10479_v61 = vpack.c.bf16 %v7599_v58, %v7607_v20  ;;  %v1695_v52 = vadd.f32 %v5962_v31, %v7656_v1 }
 0x180   : > { %v7894_v5 = vsel %vm2155_vm10, %v2017_v43, %v2195_v63  ;;  %v2027_v54 = vadd.f32 %v6017_v38, %v7769_v28  ;;  %v2021_v36 = vpop.f32.mrb[71].mxu0  ;;  %5432 = vmatprep.subr.bf16.mxu0 %v1540_v32  ;;  %v1541_v43 = vpack.c.bf16 %v1521_v56, %v1520_v29  ;;  %v1690_v27 = vadd.f32 %v7656_v1, %v1689_v18 }
 0x181   : > { %v7897_v53 = vsel %vm2154_vm11, %v2012_v24, %v2194_v59  ;;  %v2022_v51 = vadd.f32 %v7769_v28, %v2021_v36  ;;  %5433 = vmatpush3.bf16.msra.mxu0 %v10479_v61  ;;  %v7919_v47 = vadd.f32 %v7753_v22, %v7550_v57  ;;  %v7923_v59 = vadd.f32 %v7550_v57, %v7762_v30  ;;  %v5965_v57 = vpop.f32.mrb[46].mxu1 }
 0x182   : > { %vm2157_vm12 = vcmp.ge.f32.partialorder %v2027_v54, 0.0  ;;  %v2197_v55 = vmul.f32 %v7799_v62, %v2027_v54  ;;  %v2256_v45 = vpack.c.bf16 %v7894_v5, %v7897_v53  ;;  %5434 = vmatprep.subr.bf16.mxu0 %v1541_v43  ;;  %vm1452_vm14 = vcmp.ge.f32.partialorder %v7760_v39, 0.0 }
 0x183   : > { %vm2156_vm13 = vcmp.ge.f32.partialorder %v2022_v51, 0.0  ;;  %v2196_v24 = vmul.f32 %v7799_v62, %v2022_v51  ;;  %v6020_v63 = vpop.f32.mrb[72].mxu0  ;;  %vm1801_vm15 = vcmp.ge.f32.partialorder %v1695_v52, 0.0  ;;  %v1841_v22 = vmul.f32 %v7670_v25, %v1695_v52 }
 0x184   : > { %v7925_v38 = vsel %vm2157_vm12, %v2027_v54, %v2197_v55  ;;  %v2037_v11 = vadd.f32 %v6020_v63, %v7769_v28  ;;  %v2031_v16 = vpop.f32.mrb[73].mxu0  ;;  %vm1800_vm4 = vcmp.ge.f32.partialorder %v1690_v27, 0.0  ;;  %v10480_v32 = vpack.c.bf16 %v7609_v40, %v7618_v7 }
 0x185   : > { %5407 = vmatmul.mubr.msk.bf16.gmra.mrb[84].mxu1 %vm2334_vm1, %v7389_v8  ;;  %v7931_v58 = vsel %vm2156_vm13, %v2022_v51, %v2196_v24  ;;  %v2032_v20 = vadd.f32 %v7769_v28, %v2031_v16  ;;  %v1699_v8 = vpop.f32.mrb[47].mxu1  ;;  %v1873_v36 = vsel %vm1801_vm15, %v1695_v52, %v1841_v22  ;;  %v1840_v51 = vmul.f32 %v7670_v25, %v1690_v27 }
 0x186   : > { %vm2159_vm3 = vcmp.ge.f32.partialorder %v2037_v11, 0.0  ;;  %v2199_v30 = vmul.f32 %v7799_v62, %v2037_v11  ;;  %5408 = vmatprep.mubr.msk.bf16.mxu1 %vm2334_vm1, %v7403_v37  ;;  %v2257_v31 = vpack.c.bf16 %v7925_v38, %v7931_v58  ;;  %5435 = vmatpush3.bf16.msra.mxu0 %v10480_v32  ;;  %v7946_v29 = vpop.f32.mrb[48].mxu1  ;;  %v7950_v56 = vmul.f32 %v7561_v13, %v7919_v47 }
 0x187   : > { %vm2158_vm5 = vcmp.ge.f32.partialorder %v2032_v20, 0.0  ;;  %v2198_v18 = vmul.f32 %v7799_v62, %v2032_v20  ;;  %v6023_v54 = vpop.f32.mrb[74].mxu0  ;;  %v1522_v63 = vsel %vm1450_vm8, %v7751_v41, %v7794_v14  ;;  %v1872_v61 = vsel %vm1800_vm4, %v1690_v27, %v1840_v51  ;;  %v1709_v32 = vpop.f32.mrb[49].mxu1 }
 0x188   : > { %v7952_v55 = vsel %vm2159_vm3, %v2037_v11, %v2199_v30  ;;  %v2047_v43 = vadd.f32 %v6023_v54, %v7769_v28  ;;  %v2041_v24 = vpop.f32.mrb[75].mxu0  ;;  %v1523_v52 = vsel %vm1451_vm9, %v7748_v35, %v7790_v3  ;;  %v7970_v22 = vpack.c.bf16 %v1873_v36, %v1872_v61 }
 0x189   : > { %v7959_v40 = vsel %vm2158_vm5, %v2032_v20, %v2198_v18  ;;  %v2042_v7 = vadd.f32 %v7769_v28, %v2041_v24  ;;  %v1542_v20 = vpack.c.bf16 %v1523_v52, %v1522_v63  ;;  %v1705_v27 = vadd.f32 %v5965_v57, %v7656_v1 }
 0x18a   : > { %vm2161_vm6 = vcmp.ge.f32.partialorder %v2047_v43, 0.0  ;;  %v2201_v11 = vmul.f32 %v7799_v62, %v2047_v43  ;;  %v2258_v16 = vpack.c.bf16 %v7952_v55, %v7959_v40  ;;  %v7976_v30 = vmul.f32 %v7561_v13, %v7923_v59  ;;  %v10493_v55 = vld [vmem:[#allocation6_spill] sm:$0xff] }
 0x18b   : > { %vm2160_vm7 = vcmp.ge.f32.partialorder %v2042_v7, 0.0  ;;  %v2200_v14 = vmul.f32 %v7799_v62, %v2042_v7  ;;  %v6026_v41 = vpop.f32.mrb[76].mxu0  ;;  %v1700_v54 = vadd.f32 %v7656_v1, %v1699_v8  ;;  %vm1454_vm8 = vcmp.ge.f32.partialorder %v7858_v42, 0.0  ;;  %5436 = vmatprep.subr.bf16.mxu0 %v1542_v20 }
 0x18c   : > { %v7978_v3 = vsel %vm2161_vm6, %v2047_v43, %v2201_v11  ;;  %v2057_v35 = vadd.f32 %v6026_v41, %v7769_v28  ;;  %v2051_v18 = vpop.f32.mrb[77].mxu0  ;;  %vm1803_vm9 = vcmp.ge.f32.partialorder %v1705_v27, 0.0  ;;  %v1843_v13 = vmul.f32 %v7670_v25, %v1705_v27  ;;  %v7998_v43 = vpop.f32.mrb[50].mxu1 }
 0x18d   : > { %5409 = vmatmul.mubr.msk.bf16.gmra.mrb[88].mxu1 %vm2334_vm1, %v7403_v37  ;;  %v7985_v36 = vsel %vm2160_vm7, %v2042_v7, %v2200_v14  ;;  %v2052_v57 = vadd.f32 %v7769_v28, %v2051_v18  ;;  %vm1455_vm10 = vcmp.ge.f32.partialorder %v7834_v19, 0.0  ;;  %v10481_v8 = vpack.c.bf16 %v7623_v4, %v7625_v44  ;;  %v8002_v52 = vpop.f32.mrb[51].mxu1 }
 0x18e   : > { %vm2163_vm11 = vcmp.ge.f32.partialorder %v2057_v35, 0.0  ;;  %v2203_v51 = vmul.f32 %v7799_v62, %v2057_v35  ;;  %5410 = vmatprep.mubr.msk.bf16.mxu1 %vm2334_vm1, %v7427_v9  ;;  %v2259_v37 = vpack.c.bf16 %v7978_v3, %v7985_v36  ;;  %vm1802_vm12 = vcmp.ge.f32.partialorder %v1700_v54, 0.0  ;;  %v8017_v20 = vpop.f32.mrb[52].mxu1  ;;  %v10495_v36 = vld [vmem:[#allocation12_spill] sm:$0xff] }
 0x18f   : > { %5437 = vmatpush3.bf16.msra.mxu0 %v10481_v8  ;;  %vm2162_vm13 = vcmp.ge.f32.partialorder %v2052_v57, 0.0  ;;  %v2202_v24 = vmul.f32 %v7799_v62, %v2052_v57  ;;  %v6029_v63 = vpop.f32.mrb[78].mxu0  ;;  %v1875_v7 = vsel %vm1803_vm9, %v1705_v27, %v1843_v13  ;;  %v1842_v61 = vmul.f32 %v7670_v25, %v1700_v54 }
 0x190   : > { %v8004_v11 = vsel %vm2163_vm11, %v2057_v35, %v2203_v51  ;;  %v2067_v14 = vadd.f32 %v6029_v63, %v7769_v28  ;;  %v2061_v41 = vpop.f32.mrb[79].mxu0  ;;  %v8011_v4 = vsel %vm2334_vm1, %v2254_v17, 0  ;;  %v1524_v44 = vsel %vm1452_vm14, %v7760_v39, %v7809_v26 }
 0x191   : > { %vm1456_vm15 = vcmp.ge.f32.partialorder %v7923_v59, 0.0  ;;  %v8020_v27 = vsel %vm2162_vm13, %v2052_v57, %v2202_v24  ;;  %v2062_v35 = vadd.f32 %v7769_v28, %v2061_v41  ;;  %v1874_v18 = vsel %vm1802_vm12, %v1700_v54, %v1842_v61  ;;  %v8053_v61 = vpop.f32.mrb[53].mxu1 }
 0x192   : > { %v1525_v10 = vsel %vm1453_vm2, %v7757_v50, %v7805_v48  ;;  %vm2165_vm3 = vcmp.ge.f32.partialorder %v2067_v14, 0.0  ;;  %v2205_v2 = vmul.f32 %v7799_v62, %v2067_v14  ;;  %v2260_v39 = vpack.c.bf16 %v8004_v11, %v8020_v27  ;;  %v10497_v11 = vld [vmem:[#allocation14_spill] sm:$0xff]  ;;  %v10498_v27 = vld [vmem:[#allocation15_spill] sm:$0xff] }
 0x193   : > { %v8031_v26 = vpack.c.bf16 %v1875_v7, %v1874_v18  ;;  %vm2164_vm14 = vcmp.ge.f32.partialorder %v2062_v35, 0.0  ;;  %v2204_v17 = vmul.f32 %v7799_v62, %v2062_v35  ;;  %v6032_v57 = vpop.f32.mrb[80].mxu0  ;;  %v1543_v13 = vpack.c.bf16 %v1525_v10, %v1524_v44 }
 0x194   : > { %v1715_v54 = vadd.f32 %v7946_v29, %v7656_v1  ;;  %v8036_v51 = vsel %vm2165_vm3, %v2067_v14, %v2205_v2  ;;  %v2077_v50 = vadd.f32 %v6032_v57, %v7769_v28  ;;  %v2071_v48 = vpop.f32.mrb[81].mxu0  ;;  %v8043_v8 = vsel %vm2334_vm1, %v2255_v34, 0 }
 0x195   : > { %v1710_v24 = vadd.f32 %v7656_v1, %v1709_v32  ;;  %vm1457_vm2 = vcmp.ge.f32.partialorder %v7919_v47, 0.0  ;;  %v8047_v63 = vsel %vm2164_vm14, %v2062_v35, %v2204_v17  ;;  %v2072_v7 = vadd.f32 %v7769_v28, %v2071_v48  ;;  %5411 = vmatmul.mubr.msk.bf16.gmra.mrb[92].mxu1 %vm2334_vm1, %v7427_v9  ;;  %5438 = vmatprep.subr.bf16.mxu0 %v1543_v13  ;;  %v8063_v9 = vpop.f32.mrb[54].mxu1 }
 0x196   : > { %vm1805_vm4 = vcmp.ge.f32.partialorder %v1715_v54, 0.0  ;;  %v1845_v29 = vmul.f32 %v7670_v25, %v1715_v54  ;;  %vm2167_vm5 = vcmp.ge.f32.partialorder %v2077_v50, 0.0  ;;  %v2207_v0 = vmul.f32 %v7799_v62, %v2077_v50  ;;  %5412 = vmatprep.mubr.msk.bf16.mxu1 %vm2334_vm1, %v7454_v49  ;;  %v8067_v35 = vpop.f32.mrb[55].mxu1 }
 0x197   : > { %v2261_v46 = vpack.c.bf16 %v8036_v51, %v8047_v63  ;;  %v10482_v34 = vpack.c.bf16 %v7637_v23, %v7639_v15  ;;  %vm1804_vm6 = vcmp.ge.f32.partialorder %v1710_v24, 0.0  ;;  %vm2166_vm7 = vcmp.ge.f32.partialorder %v2072_v7, 0.0  ;;  %v6035_v14 = vpop.f32.mrb[82].mxu0  ;;  %v8080_v17 = vpop.f32.mrb[56].mxu1  ;;  %v2272_v51 = vld [vmem:[%s10360_s7 + $0x10] sm:$0xff]  ;;  %v2273_v63 = vld [vmem:[%s10360_s7 + $0x18] sm:$0xff] }
 0x198   : > { %v2206_v32 = vmul.f32 %v7799_v62, %v2072_v7  ;;  %v1877_v41 = vsel %vm1805_vm4, %v1715_v54, %v1845_v29  ;;  %v1844_v44 = vmul.f32 %v7670_v25, %v1710_v24  ;;  %v2239_v18 = vsel %vm2167_vm5, %v2077_v50, %v2207_v0  ;;  %v2081_v2 = vpop.f32.mrb[83].mxu0 }
 0x199   : > { %5439 = vmatpush3.bf16.msra.mxu0 %v10482_v34  ;;  %v2087_v10 = vadd.f32 %v6035_v14, %v7769_v28  ;;  %v8074_v23 = vsel %vm2334_vm1, %v2256_v45, 0  ;;  %v1526_v15 = vsel %vm1454_vm8, %v7858_v42, %v7892_v12  ;;  %v2082_v13 = vadd.f32 %v7769_v28, %v2081_v2  ;;  %v8106_v14 = vpop.f32.mrb[57].mxu1 }
 0x19a   : > { %v2238_v57 = vsel %vm2166_vm7, %v2072_v7, %v2206_v32  ;;  %v1876_v54 = vsel %vm1804_vm6, %v1710_v24, %v1844_v44  ;;  %v1527_v5 = vsel %vm1455_vm10, %v7834_v19, %v7854_v60  ;;  %v1725_v7 = vadd.f32 %v7998_v43, %v7656_v1  ;;  %v10483_v44 = vld [vmem:[#allocation8_spill] sm:$0xff] }
 0x19b   : > { %v2262_v53 = vpack.c.bf16 %v2239_v18, %v2238_v57  ;;  %vm2169_vm9 = vcmp.ge.f32.partialorder %v2087_v10, 0.0  ;;  %v2209_v45 = vmul.f32 %v7799_v62, %v2087_v10  ;;  %v8089_v50 = vpack.c.bf16 %v1877_v41, %v1876_v54  ;;  %v6038_v12 = vpop.f32.mrb[84].mxu0  ;;  %v10484_v18 = vld [vmem:[#allocation9_spill] sm:$0xff] }
 0x19c   : > { %vm2168_vm11 = vcmp.ge.f32.partialorder %v2082_v13, 0.0  ;;  %v2208_v42 = vmul.f32 %v7799_v62, %v2082_v13  ;;  %v1544_v48 = vpack.c.bf16 %v1527_v5, %v1526_v15  ;;  %v2097_v29 = vadd.f32 %v6038_v12, %v7769_v28  ;;  %v2091_v19 = vpop.f32.mrb[85].mxu0 }
 0x19d   : > { %v2241_v24 = vsel %vm2169_vm9, %v2087_v10, %v2209_v45  ;;  %6198 = vmatprep.subr.msk.bf16.mxu1 %vm2334_vm1, %v2262_v53  ;;  %v1720_v60 = vadd.f32 %v7656_v1, %v8002_v52  ;;  %v1528_v0 = vsel %vm1456_vm15, %v7923_v59, %v7976_v30  ;;  %5413 = vmatmul.mubr.msk.bf16.gmra.mrb[96].mxu1 %vm2334_vm1, %v7454_v49  ;;  %vm1807_vm8 = vcmp.ge.f32.partialorder %v1725_v7, 0.0  ;;  %v8112_v59 = vpop.f32.mrb[58].mxu1 }
 0x19e   : > { %v2240_v34 = vsel %vm2168_vm11, %v2082_v13, %v2208_v42  ;;  %v2092_v43 = vadd.f32 %v7769_v28, %v2091_v19  ;;  %5440 = vmatprep.subr.bf16.mxu0 %v1544_v48  ;;  %v1847_v32 = vmul.f32 %v7670_v25, %v1725_v7  ;;  %5541 = vmatpush3.bf16.xpose.msra.mxu1 %v8011_v4  ;;  %vm2171_vm10 = vcmp.ge.f32.partialorder %v2097_v29, 0.0  ;;  %v8119_v15 = vpop.f32.mrb[59].mxu1 }
 0x19f   : > { %v2263_v41 = vpack.c.bf16 %v2241_v24, %v2240_v34  ;;  %v2211_v52 = vmul.f32 %v7799_v62, %v2097_v29  ;;  %5414 = vmatprep.mubr.msk.bf16.mxu1 %vm2334_vm1, %v7494_v21  ;;  %vm1806_vm12 = vcmp.ge.f32.partialorder %v1720_v60, 0.0  ;;  %v6041_v30 = vpop.f32.mrb[86].mxu0  ;;  %v10485_v10 = vpack.c.bf16 %v10483_v44, %v10484_v18  ;;  %v8129_v45 = vpop.f32.mrb[60].mxu1 }
 0x1a0   : > { %vm2170_vm13 = vcmp.ge.f32.partialorder %v2092_v43, 0.0  ;;  %v2210_v49 = vmul.f32 %v7799_v62, %v2092_v43  ;;  %v1879_v2 = vsel %vm1807_vm8, %v1725_v7, %v1847_v32  ;;  %v1846_v4 = vmul.f32 %v7670_v25, %v1720_v60  ;;  %v2101_v54 = vpop.f32.mrb[87].mxu0 }
 0x1a1   : > { %5441 = vmatpush3.bf16.msra.mxu0 %v10485_v10  ;;  %v2243_v57 = vsel %vm2171_vm10, %v2097_v29, %v2211_v52  ;;  %6199 = vmatprep.subr.msk.bf16.mxu1 %vm2334_vm1, %v2263_v41  ;;  %v2107_v13 = vadd.f32 %v6041_v30, %v7769_v28  ;;  %v1529_v5 = vsel %vm1457_vm2, %v7919_v47, %v7950_v56  ;;  %v3428_v40 = vsel %vm2334_vm1, %v2260_v39, 0 }
 0x1a2   : > { %v1735_v53 = vadd.f32 %v8017_v20, %v7656_v1  ;;  %v2242_v42 = vsel %vm2170_vm13, %v2092_v43, %v2210_v49  ;;  %v2102_v12 = vadd.f32 %v7769_v28, %v2101_v54  ;;  %v1878_v48 = vsel %vm1806_vm12, %v1720_v60, %v1846_v4  ;;  %v10486_v60 = vld [vmem:[#allocation10_spill] sm:$0xff] }
 0x1a3   : > { %v1545_v7 = vpack.c.bf16 %v1529_v5, %v1528_v0  ;;  %v2264_v24 = vpack.c.bf16 %v2243_v57, %v2242_v42  ;;  %vm2173_vm15 = vcmp.ge.f32.partialorder %v2107_v13, 0.0  ;;  %v2213_v29 = vmul.f32 %v7799_v62, %v2107_v13  ;;  %v6044_v56 = vpop.f32.mrb[88].mxu0  ;;  %v10487_v0 = vld [vmem:[#allocation11_spill] sm:$0xff]  ;;  %v10489_v4 = vld [vmem:[#allocation2_spill] sm:$0xff] }
 0x1a4   : > { %v8134_v19 = vpack.c.bf16 %v1879_v2, %v1878_v48  ;;  %vm2172_vm3 = vcmp.ge.f32.partialorder %v2102_v12, 0.0  ;;  %v2212_v47 = vmul.f32 %v7799_v62, %v2102_v12  ;;  %vm1809_vm14 = vcmp.ge.f32.partialorder %v1735_v53, 0.0  ;;  %v2111_v32 = vpop.f32.mrb[89].mxu0  ;;  %v8151_v2 = vpop.f32.mrb[61].mxu1 }
 0x1a5   : > { %5442 = vmatprep.subr.bf16.mxu0 %v1545_v7  ;;  %v1849_v20 = vmul.f32 %v7670_v25, %v1735_v53  ;;  %v2245_v34 = vsel %vm2173_vm15, %v2107_v13, %v2213_v29  ;;  %v2117_v43 = vadd.f32 %v6044_v56, %v7769_v28  ;;  %v10488_v41 = vpack.c.bf16 %v10486_v60, %v10487_v0 }
 0x1a6   : > { %v1730_v52 = vadd.f32 %v7656_v1, %v8053_v61  ;;  %v1745_v49 = vadd.f32 %v8063_v9, %v7656_v1  ;;  %5415 = vmatmul.mubr.msk.bf16.gmra.mrb[100].mxu1 %vm2334_vm1, %v7494_v21  ;;  %v2244_v30 = vsel %vm2172_vm3, %v2102_v12, %v2212_v47  ;;  %v2112_v44 = vadd.f32 %v7769_v28, %v2111_v32  ;;  %v8157_v21 = vpop.f32.mrb[62].mxu1 }
 0x1a7   : > { %5443 = vmatpush3.bf16.msra.mxu0 %v10488_v41  ;;  %v1881_v18 = vsel %vm1809_vm14, %v1735_v53, %v1849_v20  ;;  %v1740_v10 = vadd.f32 %v7656_v1, %v8067_v35  ;;  %5543 = vmatpush3.bf16.xpose.msra.mxu1 %v8043_v8  ;;  %v2265_v61 = vpack.c.bf16 %v2245_v34, %v2244_v30  ;;  %vm2175_vm2 = vcmp.ge.f32.partialorder %v2117_v43, 0.0  ;;  %v6047_v35 = vpop.f32.mrb[90].mxu0  ;;  %v8162_v8 = vpop.f32.mrb[63].mxu1 }
 0x1a8   : > { %5416 = vmatprep.mubr.msk.bf16.mxu1 %vm2334_vm1, %v10489_v4  ;;  %v2215_v9 = vmul.f32 %v7799_v62, %v2117_v43  ;;  %vm1808_vm4 = vcmp.ge.f32.partialorder %v1730_v52, 0.0  ;;  %6200 = vmatprep.subr.msk.bf16.mxu1 %vm2334_vm1, %v2264_v24  ;;  %vm2174_vm5 = vcmp.ge.f32.partialorder %v2112_v44, 0.0  ;;  %v2214_v57 = vmul.f32 %v7799_v62, %v2112_v44  ;;  %v2121_v53 = vpop.f32.mrb[91].mxu0 }
 0x1a9   : > { %v1848_v13 = vmul.f32 %v7670_v25, %v1730_v52  ;;  %vm1811_vm6 = vcmp.ge.f32.partialorder %v1745_v49, 0.0  ;;  %v2127_v5 = vadd.f32 %v6047_v35, %v7769_v28  ;;  %v1851_v42 = vmul.f32 %v7670_v25, %v1745_v49 }
 0x1aa   : > { %v8164_v54 = vsel %vm2175_vm2, %v2117_v43, %v2215_v9  ;;  %vm1810_vm7 = vcmp.ge.f32.partialorder %v1740_v10, 0.0  ;;  %v8168_v12 = vsel %vm2174_vm5, %v2112_v44, %v2214_v57  ;;  %v2122_v48 = vadd.f32 %v7769_v28, %v2121_v53  ;;  %v10490_v9 = vld [vmem:[#allocation3_spill] sm:$0xff] }
 0x1ab   : > { %v1880_v7 = vsel %vm1808_vm4, %v1730_v52, %v1848_v13  ;;  %v1850_v24 = vmul.f32 %v7670_v25, %v1740_v10  ;;  %v2266_v29 = vpack.c.bf16 %v8164_v54, %v8168_v12  ;;  %vm2177_vm9 = vcmp.ge.f32.partialorder %v2127_v5, 0.0  ;;  %v6050_v34 = vpop.f32.mrb[92].mxu0 }
 0x1ac   : > { %v2217_v47 = vmul.f32 %v7799_v62, %v2127_v5  ;;  %v8176_v56 = vpack.c.bf16 %v1881_v18, %v1880_v7  ;;  %vm2176_vm11 = vcmp.ge.f32.partialorder %v2122_v48, 0.0  ;;  %v2216_v20 = vmul.f32 %v7799_v62, %v2122_v48  ;;  %v2131_v41 = vpop.f32.mrb[93].mxu0 }
 0x1ad   : > { %v1883_v43 = vsel %vm1811_vm6, %v1745_v49, %v1851_v42  ;;  %v1882_v32 = vsel %vm1810_vm7, %v1740_v10, %v1850_v24  ;;  %v2137_v0 = vadd.f32 %v6050_v34, %v7769_v28  ;;  %v1755_v30 = vadd.f32 %v8080_v17, %v7656_v1 }
 0x1ae   : > { %v8180_v60 = vsel %vm2177_vm9, %v2127_v5, %v2217_v47  ;;  %v8183_v52 = vpack.c.bf16 %v1883_v43, %v1882_v32  ;;  %5417 = vmatmul.mubr.msk.bf16.gmra.mrb[104].mxu1 %vm2334_vm1, %v10489_v4  ;;  %v8189_v44 = vsel %vm2176_vm11, %v2122_v48, %v2216_v20  ;;  %v2132_v18 = vadd.f32 %v7769_v28, %v2131_v41 }
 0x1af   : > { %v1750_v49 = vadd.f32 %v7656_v1, %v8106_v14  ;;  %v1765_v10 = vadd.f32 %v8112_v59, %v7656_v1  ;;  %5545 = vmatpush3.bf16.xpose.msra.mxu1 %v8074_v23  ;;  %5418 = vmatprep.mubr.msk.bf16.mxu1 %vm2334_vm1, %v10490_v9  ;;  %v2267_v17 = vpack.c.bf16 %v8180_v60, %v8189_v44  ;;  %vm2179_vm8 = vcmp.ge.f32.partialorder %v2137_v0, 0.0  ;;  %v6053_v57 = vpop.f32.mrb[94].mxu0 }
 0x1b0   : > { %v2219_v4 = vmul.f32 %v7799_v62, %v2137_v0  ;;  %vm1813_vm10 = vcmp.ge.f32.partialorder %v1755_v30, 0.0  ;;  %6201 = vmatprep.subr.msk.bf16.mxu1 %vm2334_vm1, %v2265_v61  ;;  %vm2178_vm12 = vcmp.ge.f32.partialorder %v2132_v18, 0.0  ;;  %v2218_v14 = vmul.f32 %v7799_v62, %v2132_v18  ;;  %v2141_v13 = vpop.f32.mrb[95].mxu0 }
 0x1b1   : > { %v1853_v59 = vmul.f32 %v7670_v25, %v1755_v30  ;;  %vm1812_vm13 = vcmp.ge.f32.partialorder %v1750_v49, 0.0  ;;  %v2147_v35 = vadd.f32 %v6053_v57, %v7769_v28  ;;  %v1852_v5 = vmul.f32 %v7670_v25, %v1750_v49  ;;  %v2274_v57 = vld [vmem:[%s10360_s7 + $0x20] sm:$0xff] }
 0x1b2   : > { %v2251_v23 = vsel %vm2179_vm8, %v2137_v0, %v2219_v4  ;;  %vm1815_vm15 = vcmp.ge.f32.partialorder %v1765_v10, 0.0  ;;  %v2250_v53 = vsel %vm2178_vm12, %v2132_v18, %v2218_v14  ;;  %v2142_v42 = vadd.f32 %v7769_v28, %v2141_v13 }
 0x1b3   : > { %v1885_v48 = vsel %vm1813_vm10, %v1755_v30, %v1853_v59  ;;  %v1855_v61 = vmul.f32 %v7670_v25, %v1765_v10  ;;  %v2268_v7 = vpack.c.bf16 %v2251_v23, %v2250_v53  ;;  %vm2181_vm3 = vcmp.ge.f32.partialorder %v2147_v35, 0.0  ;;  %v2275_v59 = vld [vmem:[%s10360_s7 + $0x28] sm:$0xff]  ;;  %v2277_v53 = vld [vmem:[%s10360_s7 + $0x38] sm:$0xff] }
 0x1b4   : > { %v2221_v24 = vmul.f32 %v7799_v62, %v2147_v35  ;;  %v1884_v47 = vsel %vm1812_vm13, %v1750_v49, %v1852_v5  ;;  %v3419_v20 = vsel %vm2334_vm1, %v2257_v31, 0  ;;  %vm2180_vm14 = vcmp.ge.f32.partialorder %v2142_v42, 0.0 }
 0x1b5   : > { %v2220_v34 = vmul.f32 %v7799_v62, %v2142_v42  ;;  %v8215_v43 = vpack.c.bf16 %v1885_v48, %v1884_v47  ;;  %v1760_v28 = vadd.f32 %v7656_v1, %v8119_v15  ;;  %v1775_v60 = vadd.f32 %v8129_v45, %v7656_v1  ;;  %v10491_v15 = vld [vmem:[#allocation4_spill] sm:$0xff] }
 0x1b6   : > { %v2253_v32 = vsel %vm2181_vm3, %v2147_v35, %v2221_v24  ;;  %v1770_v0 = vadd.f32 %v7656_v1, %v8151_v2  ;;  %5419 = vmatmul.mubr.msk.bf16.gmra.mrb[108].mxu1 %vm2334_vm1, %v10490_v9  ;;  %v1887_v58 = vsel %vm1815_vm15, %v1765_v10, %v1855_v61  ;;  %v1785_v62 = vadd.f32 %v8157_v21, %v7656_v1 }
 0x1b7   : > { %v2252_v38 = vsel %vm2180_vm14, %v2142_v42, %v2220_v34  ;;  %v1780_v31 = vadd.f32 %v7656_v1, %v8162_v8  ;;  %5547 = vmatpush3.bf16.xpose.msra.mxu1 %v3419_v20  ;;  %5420 = vmatprep.mubr.msk.bf16.mxu1 %vm2334_vm1, %v10491_v15  ;;  %vm1814_vm2 = vcmp.ge.f32.partialorder %v1760_v28, 0.0  ;;  %v1854_v2 = vmul.f32 %v7670_v25, %v1760_v28  ;;  %v2278_v20 = vld [vmem:[%s10360_s7 + $0x40] sm:$0xff]  ;;  %v2279_v34 = vld [vmem:[%s10360_s7 + $0x48] sm:$0xff] }
 0x1b8   : > { %v2269_v45 = vpack.c.bf16 %v2253_v32, %v2252_v38  ;;  %vm1817_vm4 = vcmp.ge.f32.partialorder %v1775_v60, 0.0  ;;  %6202 = vmatprep.subr.msk.bf16.mxu1 %vm2334_vm1, %v2266_v29  ;;  %v1857_v41 = vmul.f32 %v7670_v25, %v1775_v60  ;;  %vm1816_vm5 = vcmp.ge.f32.partialorder %v1770_v0, 0.0  ;;  %v2281_v38 = vld [vmem:[%s10360_s7 + $0x58] sm:$0xff] }
 0x1b9   : > { %v1856_v21 = vmul.f32 %v7670_v25, %v1770_v0  ;;  %vm1819_vm6 = vcmp.ge.f32.partialorder %v1785_v62, 0.0  ;;  %v1886_v1 = vsel %vm1814_vm2, %v1760_v28, %v1854_v2  ;;  %v1859_v8 = vmul.f32 %v7670_v25, %v1785_v62  ;;  %v2280_v28 = vld [vmem:[%s10360_s7 + $0x50] sm:$0xff] }
 0x1ba   : > { %vm1818_vm7 = vcmp.ge.f32.partialorder %v1780_v31, 0.0  ;;  %v1858_v30 = vmul.f32 %v7670_v25, %v1780_v31  ;;  %v8241_v44 = vpack.c.bf16 %v1887_v58, %v1886_v1  ;;  %v1889_v18 = vsel %vm1817_vm4, %v1775_v60, %v1857_v41  ;;  %v10492_v25 = vld [vmem:[#allocation5_spill] sm:$0xff]  ;;  %v2282_v41 = vld [vmem:[%s10360_s7 + $0x60] sm:$0xff]  ;;  %v2283_v1 = vld [vmem:[%s10360_s7 + $0x68] sm:$0xff] }
 0x1bb   : > { %v1888_v49 = vsel %vm1816_vm5, %v1770_v0, %v1856_v21  ;;  %v1891_v54 = vsel %vm1819_vm6, %v1785_v62, %v1859_v8  ;;  %v3422_v29 = vsel %vm2334_vm1, %v2258_v16, 0  ;;  %v3425_v4 = vsel %vm2334_vm1, %v2259_v37, 0  ;;  %v10494_v16 = vld [vmem:[#allocation7_spill] sm:$0xff]  ;;  %v10496_v37 = vld [vmem:[#allocation13_spill] sm:$0xff] }
 0x1bc   : > { %v8243_v10 = vpack.c.bf16 %v1889_v18, %v1888_v49  ;;  %v1890_v12 = vsel %vm1818_vm7, %v1780_v31, %v1858_v30  ;;  %v3431_v3 = vsel %vm2334_vm1, %v2261_v46, 0  ;;  %v2284_v30 = vld [vmem:[%s10360_s7 + $0x70] sm:$0xff]  ;;  %v2285_v49 = vld [vmem:[%s10360_s7 + $0x78] sm:$0xff] }
 0x1bd   : > { %v8249_v9 = vpack.c.bf16 %v1891_v54, %v1890_v12 }
 0x1be   : > { %5421 = vmatmul.mubr.msk.bf16.gmra.mrb[112].mxu1 %vm2334_vm1, %v10491_v15 }
 0x1bf   : > { %5549 = vmatpush3.bf16.xpose.msra.mxu1 %v3422_v29  ;;  %5422 = vmatprep.mubr.msk.bf16.mxu1 %vm2334_vm1, %v10492_v25 }
 0x1c0   : > { %6203 = vmatprep.subr.msk.bf16.mxu1 %vm2334_vm1, %v2267_v17 }
 0x1c6   : > { %5423 = vmatmul.mubr.msk.bf16.gmra.mrb[116].mxu1 %vm2334_vm1, %v10492_v25 }
 0x1c7   : > { %5551 = vmatpush3.bf16.xpose.msra.mxu1 %v3425_v4  ;;  %5424 = vmatprep.mubr.msk.bf16.mxu1 %vm2334_vm1, %v10493_v55 }
 0x1c8   : > { %6204 = vmatprep.subr.msk.bf16.mxu1 %vm2334_vm1, %v2268_v7 }
 0x1ce   : > { %5425 = vmatmul.mubr.msk.bf16.gmra.mrb[120].mxu1 %vm2334_vm1, %v10493_v55 }
 0x1cf   : > { %5553 = vmatpush3.bf16.xpose.msra.mxu1 %v3428_v40  ;;  %5426 = vmatprep.mubr.msk.bf16.mxu1 %vm2334_vm1, %v10494_v16  ;;  %v2286_v40 = vld [vmem:[%s10360_s7 + $0x80] sm:$0xff] }
 0x1d0   : > { %6205 = vmatprep.subr.msk.bf16.mxu1 %vm2334_vm1, %v2269_v45 }
 0x1d6   : > { %5427 = vmatmul.mubr.msk.bf16.gmra.mrb[124].mxu1 %vm2334_vm1, %v10494_v16 }
 0x1d7   : > { %5555 = vmatpush3.bf16.xpose.msra.mxu1 %v3431_v3  ;;  %5556 = vmatprep.mubr.msk.bf16.mxu1 %vm2334_vm1, %v10495_v36  ;;  %v2287_v3 = vld [vmem:[%s10360_s7 + $0x88] sm:$0xff] }
 0x1de   : > { %5557 = vmatmul.mubr.msk.bf16.vlgmr.msra.gmra.mrb[128].mxu1 %vm2334_vm1, %v10495_v36 }
 0x1df   : > { %5558 = vmatprep.mubr.msk.bf16.mxu1 %vm2334_vm1, %v10496_v37 }
 0x1e6   : > { %5559 = vmatmul.mubr.msk.bf16.gmra.mrb[132].mxu1 %vm2334_vm1, %v10496_v37 }
 0x1e7   : > { %5560 = vmatprep.mubr.msk.bf16.mxu1 %vm2334_vm1, %v10497_v11 }
 0x1ee   : > { %5561 = vmatmul.mubr.msk.bf16.gmra.mrb[136].mxu1 %vm2334_vm1, %v10497_v11 }
 0x1ef   : > { %5562 = vmatprep.mubr.msk.bf16.mxu1 %vm2334_vm1, %v10498_v27 }
 0x1f6   : > { %5563 = vmatmul.mubr.msk.bf16.gmra.mrb[140].mxu1 %vm2334_vm1, %v10498_v27  ;;  %v2289_v27 = vld [vmem:[%s10360_s7 + $0x98] sm:$0xff] }
 0x1f7   : > { %5564 = vmatprep.mubr.msk.bf16.mxu1 %vm2334_vm1, %v7812_v6 }
 0x1fe   : > { %5565 = vmatmul.mubr.msk.bf16.gmra.mrb[144].mxu1 %vm2334_vm1, %v7812_v6  ;;  %v2270_v6 = vld [vmem:[%s10360_s7] sm:$0xff] }
 0x1ff   : > { %5566 = vmatprep.mubr.msk.bf16.mxu1 %vm2334_vm1, %v7879_v33 }
 0x206   : > { %5567 = vmatmul.mubr.msk.bf16.gmra.mrb[148].mxu1 %vm2334_vm1, %v7879_v33  ;;  %v2271_v33 = vld [vmem:[%s10360_s7 + $0x8] sm:$0xff] }
 0x207   : > { %5568 = vmatprep.mubr.msk.bf16.mxu1 %vm2334_vm1, %v7970_v22 }
 0x20e   : > { %5569 = vmatmul.mubr.msk.bf16.gmra.mrb[152].mxu1 %vm2334_vm1, %v7970_v22 }
 0x20f   : > { %5570 = vmatprep.mubr.msk.bf16.mxu1 %vm2334_vm1, %v8031_v26 }
 0x216   : > { %5571 = vmatmul.mubr.msk.bf16.gmra.mrb[156].mxu1 %vm2334_vm1, %v8031_v26 }
 0x217   : > { %5572 = vmatprep.mubr.msk.bf16.mxu1 %vm2334_vm1, %v8089_v50 }
 0x21e   : > { %5573 = vmatmul.mubr.msk.bf16.gmra.mrb[160].mxu1 %vm2334_vm1, %v8089_v50 }
 0x21f   : > { %5574 = vmatprep.mubr.msk.bf16.mxu1 %vm2334_vm1, %v8134_v19 }
 0x226   : > { %5575 = vmatmul.mubr.msk.bf16.gmra.mrb[164].mxu1 %vm2334_vm1, %v8134_v19 }
 0x227   : > { %5576 = vmatprep.mubr.msk.bf16.mxu1 %vm2334_vm1, %v8176_v56 }
 0x22e   : > { %5577 = vmatmul.mubr.msk.bf16.gmra.mrb[168].mxu1 %vm2334_vm1, %v8176_v56 }
 0x22f   : > { %5578 = vmatprep.mubr.msk.bf16.mxu1 %vm2334_vm1, %v8183_v52 }
 0x230   : > { %v2465_v22 = vpop.f32.mrb[64].mxu1 }
 0x231   : > { %v8332_v39 = vadd.f32 %v2465_v22, %v2270_v6  ;;  %v2467_v26 = vpop.f32.mrb[65].mxu1 }
 0x232   : > { %v8340_v46 = vadd.f32 %v2467_v26, %v2271_v33  ;;  %v2469_v50 = vpop.f32.mrb[66].mxu1 }
 0x233   : > { %v2471_v19 = vpop.f32.mrb[67].mxu1  ;;  %v8342_v56 = vadd.f32 %v2469_v50, %v2272_v51  ;;  %v2290_v50 = vld [vmem:[%s10360_s7 + $0xa0] sm:$0xff] }
 0x234   : > { %v8344_v17 = vadd.f32 %v2471_v19, %v2273_v63  ;;  %v2624_v14 = vmax.f32 %v8332_v39, %v8340_v46 }
 0x236   : > { %5579 = vmatmul.mubr.msk.bf16.gmra.mrb[172].mxu1 %vm2334_vm1, %v8183_v52  ;;  %2625 = vmax.xlane.f32.xlu0 %v2624_v14  ;;  %v2627_v35 = vmax.f32 %v8342_v56, %v8344_v17  ;;  %v2276_v52 = vld [vmem:[%s10360_s7 + $0x30] sm:$0xff]  ;;  %v2291_v14 = vld [vmem:[%s10360_s7 + $0xa8] sm:$0xff] }
 0x237   : > { %5580 = vmatprep.mubr.msk.bf16.mxu1 %vm2334_vm1, %v8215_v43 }
 0x238   : > { %v2475_v23 = vpop.f32.mrb[68].mxu1 }
 0x239   : > { %v8360_v13 = vadd.f32 %v2475_v23, %v2274_v57  ;;  %v2477_v5 = vpop.f32.mrb[69].mxu1 }
 0x23a   : > { %v8368_v42 = vadd.f32 %v2477_v5, %v2275_v59  ;;  %2628 = vmax.xlane.f32.xlu0 %v2627_v35  ;;  %v2479_v48 = vpop.f32.mrb[70].mxu1  ;;  %v2292_v59 = vld [vmem:[%s10360_s7 + $0xb0] sm:$0xff]  ;;  %v2293_v35 = vld [vmem:[%s10360_s7 + $0xb8] sm:$0xff] }
 0x23b   : > { %v2481_v61 = vpop.f32.mrb[71].mxu1  ;;  %v8370_v7 = vadd.f32 %v2479_v48, %v2276_v52 }
 0x23c   : > { %v8372_v24 = vadd.f32 %v2481_v61, %v2277_v53  ;;  %v2630_v47 = vmax.f32 %v8360_v13, %v8368_v42 }
 0x23e   : > { %5581 = vmatmul.mubr.msk.bf16.gmra.mrb[176].mxu1 %vm2334_vm1, %v8215_v43  ;;  %2631 = vmax.xlane.f32.xlu1 %v2630_v47  ;;  %v2633_v43 = vmax.f32 %v8370_v7, %v8372_v24 }
 0x23f   : > { %5582 = vmatprep.mubr.msk.bf16.mxu1 %vm2334_vm1, %v8241_v44 }
 0x240   : > { %v2485_v32 = vpop.f32.mrb[72].mxu1 }
 0x241   : > { %v8391_v60 = vadd.f32 %v2485_v32, %v2278_v20  ;;  %v2487_v0 = vpop.f32.mrb[73].mxu1  ;;  %v2294_v20 = vld [vmem:[%s10360_s7 + $0xc0] sm:$0xff]  ;;  %v2295_v32 = vld [vmem:[%s10360_s7 + $0xc8] sm:$0xff] }
 0x242   : > { %v8396_v58 = vadd.f32 %v2487_v0, %v2279_v34  ;;  %v2489_v62 = vpop.f32.mrb[74].mxu1  ;;  %2634 = vmax.xlane.f32.xlu1 %v2633_v43  ;;  %v2296_v43 = vld [vmem:[%s10360_s7 + $0xd0] sm:$0xff] }
 0x243   : > { %v8398_v31 = vadd.f32 %v2489_v62, %v2280_v28  ;;  %v2491_v15 = vpop.f32.mrb[75].mxu1  ;;  %v2297_v62 = vld [vmem:[%s10360_s7 + $0xd8] sm:$0xff] }
 0x244   : > { %v8400_v45 = vadd.f32 %v2491_v15, %v2281_v38  ;;  %v2636_v2 = vmax.f32 %v8391_v60, %v8396_v58 }
 0x246   : > { %5583 = vmatmul.mubr.msk.bf16.gmra.mrb[180].mxu1 %vm2334_vm1, %v8241_v44  ;;  %2637 = vmax.xlane.f32.xlu0 %v2636_v2  ;;  %v2639_v21 = vmax.f32 %v8398_v31, %v8400_v45 }
 0x247   : > { %5584 = vmatprep.mubr.msk.bf16.mxu1 %vm2334_vm1, %v8243_v10 }
 0x248   : > { %v2495_v8 = vpop.f32.mrb[76].mxu1  ;;  %2640 = vmax.xlane.f32.xlu1 %v2639_v21 }
 0x249   : > { %v8419_v44 = vadd.f32 %v2495_v8, %v2282_v41  ;;  %v2497_v18 = vpop.f32.mrb[77].mxu1 }
 0x24a   : > { %v8424_v54 = vadd.f32 %v2497_v18, %v2283_v1  ;;  %v2499_v12 = vpop.f32.mrb[78].mxu1 }
 0x24b   : > { %v8426_v29 = vadd.f32 %v2499_v12, %v2284_v30  ;;  %v2501_v25 = vpop.f32.mrb[79].mxu1  ;;  %v2298_v30 = vld [vmem:[%s10360_s7 + $0xe0] sm:$0xff] }
 0x24c   : > { %v8428_v4 = vadd.f32 %v2501_v25, %v2285_v49  ;;  %v2642_v55 = vmax.f32 %v8419_v44, %v8424_v54  ;;  %v2299_v49 = vld [vmem:[%s10360_s7 + $0xe8] sm:$0xff]  ;;  %v2300_v25 = vld [vmem:[%s10360_s7 + $0xf0] sm:$0xff] }
 0x24e   : > { %5585 = vmatmul.mubr.msk.bf16.gmra.mrb[184].mxu1 %vm2334_vm1, %v8243_v10  ;;  %2643 = vmax.xlane.f32.xlu0 %v2642_v55  ;;  %v2645_v16 = vmax.f32 %v8426_v29, %v8428_v4  ;;  %v2288_v10 = vld [vmem:[%s10360_s7 + $0x90] sm:$0xff] }
 0x24f   : > { %5586 = vmatprep.mubr.msk.bf16.mxu1 %vm2334_vm1, %v8249_v9 }
 0x250   : > { %v2505_v36 = vpop.f32.mrb[80].mxu1  ;;  %2646 = vmax.xlane.f32.xlu1 %v2645_v16  ;;  %v2301_v16 = vld [vmem:[%s10360_s7 + $0xf8] sm:$0xff] }
 0x251   : > { %v8447_v37 = vadd.f32 %v2505_v36, %v2286_v40  ;;  %v2507_v11 = vpop.f32.mrb[81].mxu1 }
 0x252   : > { %v8452_v6 = vadd.f32 %v2507_v11, %v2287_v3  ;;  %v2509_v33 = vpop.f32.mrb[82].mxu1 }
 0x253   : > { %v8454_v22 = vadd.f32 %v2509_v33, %v2288_v10  ;;  %v2511_v26 = vpop.f32.mrb[83].mxu1 }
 0x254   : > { %v8456_v51 = vadd.f32 %v2511_v26, %v2289_v27  ;;  %v2648_v63 = vmax.f32 %v8447_v37, %v8452_v6  ;;  %v2302_v26 = vld [vmem:[%s10360_s7 + $0x100] sm:$0xff] }
 0x256   : > { %5587 = vmatmul.mubr.msk.bf16.gmra.mrb[188].mxu1 %vm2334_vm1, %v8249_v9  ;;  %2649 = vmax.xlane.f32.xlu0 %v2648_v63  ;;  %v2651_v19 = vmax.f32 %v8454_v22, %v8456_v51 }
 0x258   : > { %v2515_v57 = vpop.f32.mrb[84].mxu1  ;;  %2652 = vmax.xlane.f32.xlu1 %v2651_v19 }
 0x259   : > { %v8473_v23 = vadd.f32 %v2515_v57, %v2290_v50  ;;  %v2517_v9 = vpop.f32.mrb[85].mxu1  ;;  %v2303_v50 = vld [vmem:[%s10360_s7 + $0x108] sm:$0xff] }
 0x25a   : > { %v8478_v5 = vadd.f32 %v2517_v9, %v2291_v14  ;;  %v2519_v52 = vpop.f32.mrb[86].mxu1  ;;  %v2304_v14 = vld [vmem:[%s10360_s7 + $0x110] sm:$0xff]  ;;  %v2305_v9 = vld [vmem:[%s10360_s7 + $0x118] sm:$0xff] }
 0x25b   : > { %v8480_v53 = vadd.f32 %v2519_v52, %v2292_v59  ;;  %v2521_v48 = vpop.f32.mrb[87].mxu1 }
 0x25c   : > { %v8482_v61 = vadd.f32 %v2521_v48, %v2293_v35  ;;  %v2654_v47 = vmax.f32 %v8473_v23, %v8478_v5 }
 0x25e   : > { %2655 = vmax.xlane.f32.xlu0 %v2654_v47  ;;  %v2657_v34 = vmax.f32 %v8480_v53, %v8482_v61 }
 0x260   : > { %v2525_v28 = vpop.f32.mrb[88].mxu1  ;;  %2658 = vmax.xlane.f32.xlu1 %v2657_v34 }
 0x261   : > { %v8497_v0 = vadd.f32 %v2525_v28, %v2294_v20  ;;  %v2527_v38 = vpop.f32.mrb[89].mxu1 }
 0x262   : > { %v8502_v15 = vadd.f32 %v2527_v38, %v2295_v32  ;;  %v2529_v2 = vpop.f32.mrb[90].mxu1  ;;  %v2306_v32 = vld [vmem:[%s10360_s7 + $0x120] sm:$0xff] }
 0x263   : > { %v8504_v41 = vadd.f32 %v2529_v2, %v2296_v43  ;;  %v2531_v21 = vpop.f32.mrb[91].mxu1  ;;  %v2307_v43 = vld [vmem:[%s10360_s7 + $0x128] sm:$0xff] }
 0x264   : > { %v8506_v1 = vadd.f32 %v2531_v21, %v2297_v62  ;;  %v2660_v8 = vmax.f32 %v8497_v0, %v8502_v15  ;;  %v2308_v62 = vld [vmem:[%s10360_s7 + $0x130] sm:$0xff] }
 0x266   : > { %2661 = vmax.xlane.f32.xlu0 %v2660_v8  ;;  %v2663_v18 = vmax.f32 %v8504_v41, %v8506_v1  ;;  %v2309_v8 = vld [vmem:[%s10360_s7 + $0x138] sm:$0xff] }
 0x268   : > { %v2535_v12 = vpop.f32.mrb[92].mxu1  ;;  %2664 = vmax.xlane.f32.xlu1 %v2663_v18 }
 0x269   : > { %v8521_v55 = vadd.f32 %v2535_v12, %v2298_v30  ;;  %v2537_v40 = vpop.f32.mrb[93].mxu1 }
 0x26a   : > { %v8526_v3 = vadd.f32 %v2537_v40, %v2299_v49  ;;  %v2539_v36 = vpop.f32.mrb[94].mxu1 }
 0x26b   : > { %v8528_v10 = vadd.f32 %v2539_v36, %v2300_v25  ;;  %v2541_v11 = vpop.f32.mrb[95].mxu1 }
 0x26c   : > { %v8530_v27 = vadd.f32 %v2541_v11, %v2301_v16  ;;  %v2666_v33 = vmax.f32 %v8521_v55, %v8526_v3  ;;  %v2310_v16 = vld [vmem:[%s10360_s7 + $0x140] sm:$0xff]  ;;  %v2311_v11 = vld [vmem:[%s10360_s7 + $0x148] sm:$0xff] }
 0x26e   : > { %2667 = vmax.xlane.f32.xlu0 %v2666_v33  ;;  %v2669_v63 = vmax.f32 %v8528_v10, %v8530_v27 }
 0x270   : > { %v2545_v19 = vpop.f32.mrb[96].mxu1  ;;  %2670 = vmax.xlane.f32.xlu1 %v2669_v63 }
 0x271   : > { %v8545_v57 = vadd.f32 %v2545_v19, %v2302_v26  ;;  %v2547_v59 = vpop.f32.mrb[97].mxu1  ;;  %v2312_v26 = vld [vmem:[%s10360_s7 + $0x150] sm:$0xff]  ;;  %v2313_v19 = vld [vmem:[%s10360_s7 + $0x158] sm:$0xff] }
 0x272   : > { %v8550_v35 = vadd.f32 %v2547_v59, %v2303_v50  ;;  %v2549_v52 = vpop.f32.mrb[98].mxu1 }
 0x273   : > { %v8552_v48 = vadd.f32 %v2549_v52, %v2304_v14  ;;  %v2551_v47 = vpop.f32.mrb[99].mxu1 }
 0x274   : > { %v8554_v20 = vadd.f32 %v2551_v47, %v2305_v9  ;;  %v2672_v34 = vmax.f32 %v8545_v57, %v8550_v35 }
 0x275   : > { %10499 = vst [vmem:[#allocation8_spill] sm:$0xff] %v8552_v48 }
 0x276   : > { %10500 = vst [vmem:[#allocation9_spill] sm:$0xff] %v8554_v20  ;;  %2673 = vmax.xlane.f32.xlu0 %v2672_v34  ;;  %v2675_v28 = vmax.f32 %v8552_v48, %v8554_v20 }
 0x278   : > { %2676 = vmax.xlane.f32.xlu1 %v2675_v28 }
 0x279   : > { %v2555_v38 = vpop.f32.mrb[100].mxu1 }
 0x27a   : > { %v8569_v2 = vadd.f32 %v2555_v38, %v2306_v32  ;;  %v2557_v21 = vpop.f32.mrb[101].mxu1  ;;  %v2314_v32 = vld [vmem:[%s10360_s7 + $0x160] sm:$0xff] }
 0x27b   : > { %v8574_v30 = vadd.f32 %v2557_v21, %v2307_v43  ;;  %v2559_v18 = vpop.f32.mrb[102].mxu1  ;;  %v2315_v43 = vld [vmem:[%s10360_s7 + $0x168] sm:$0xff] }
 0x27c   : > { %10501 = vst [vmem:[#allocation10_spill] sm:$0xff] %v8569_v2  ;;  %v8576_v49 = vadd.f32 %v2559_v18, %v2308_v62  ;;  %v2561_v12 = vpop.f32.mrb[103].mxu1  ;;  %v2316_v62 = vld [vmem:[%s10360_s7 + $0x170] sm:$0xff]  ;;  %v2317_v18 = vld [vmem:[%s10360_s7 + $0x178] sm:$0xff] }
 0x27d   : > { %10502 = vst [vmem:[#allocation11_spill] sm:$0xff] %v8574_v30  ;;  %v8578_v25 = vadd.f32 %v2561_v12, %v2309_v8  ;;  %v2678_v40 = vmax.f32 %v8569_v2, %v8574_v30 }
 0x27e   : > { %10503 = vst [vmem:[#allocation2_spill] sm:$0xff] %v8576_v49 }
 0x27f   : > { %10504 = vst [vmem:[#allocation3_spill] sm:$0xff] %v8578_v25  ;;  %2679 = vmax.xlane.f32.xlu0 %v2678_v40  ;;  %v2681_v36 = vmax.f32 %v8576_v49, %v8578_v25 }
 0x281   : > { %v2565_v33 = vpop.f32.mrb[104].mxu1  ;;  %2682 = vmax.xlane.f32.xlu1 %v2681_v36 }
 0x282   : > { %v8593_v63 = vadd.f32 %v2565_v33, %v2310_v16  ;;  %v2567_v50 = vpop.f32.mrb[105].mxu1 }
 0x283   : > { %v8598_v14 = vadd.f32 %v2567_v50, %v2311_v11  ;;  %v2569_v59 = vpop.f32.mrb[106].mxu1 }
 0x284   : > { %10505 = vst [vmem:[#allocation4_spill] sm:$0xff] %v8593_v63  ;;  %v8600_v9 = vadd.f32 %v2569_v59, %v2312_v26  ;;  %v2571_v52 = vpop.f32.mrb[107].mxu1 }
 0x285   : > { %10506 = vst [vmem:[#allocation5_spill] sm:$0xff] %v8598_v14  ;;  %v8602_v47 = vadd.f32 %v2571_v52, %v2313_v19  ;;  %v2684_v34 = vmax.f32 %v8593_v63, %v8598_v14 }
 0x286   : > { %10507 = vst [vmem:[#allocation6_spill] sm:$0xff] %v8600_v9 }
 0x287   : > { %10508 = vst [vmem:[#allocation7_spill] sm:$0xff] %v8602_v47  ;;  %2685 = vmax.xlane.f32.xlu0 %v2684_v34  ;;  %v2687_v28 = vmax.f32 %v8600_v9, %v8602_v47 }
 0x289   : > { %v2575_v38 = vpop.f32.mrb[108].mxu1  ;;  %2688 = vmax.xlane.f32.xlu1 %v2687_v28 }
 0x28a   : > { %v8617_v21 = vadd.f32 %v2575_v38, %v2314_v32  ;;  %v2577_v8 = vpop.f32.mrb[109].mxu1 }
 0x28b   : > { %v8622_v12 = vadd.f32 %v2577_v8, %v2315_v43  ;;  %v2579_v40 = vpop.f32.mrb[110].mxu1 }
 0x28c   : > { %10509 = vst [vmem:[#allocation12_spill] sm:$0xff] %v8617_v21  ;;  %v8624_v16 = vadd.f32 %v2579_v40, %v2316_v62  ;;  %v2581_v36 = vpop.f32.mrb[111].mxu1 }
 0x28d   : > { %10510 = vst [vmem:[#allocation13_spill] sm:$0xff] %v8622_v12  ;;  %v8626_v11 = vadd.f32 %v2581_v36, %v2317_v18  ;;  %v2690_v33 = vmax.f32 %v8617_v21, %v8622_v12 }
 0x28e   : > { %10511 = vst [vmem:[#allocation14_spill] sm:$0xff] %v8624_v16 }
 0x28f   : > { %10512 = vst [vmem:[#allocation15_spill] sm:$0xff] %v8626_v11  ;;  %2691 = vmax.xlane.f32.xlu0 %v2690_v33  ;;  %v2693_v26 = vmax.f32 %v8624_v16, %v8626_v11 }
 0x291   : > { %2694 = vmax.xlane.f32.xlu1 %v2693_v26  ;;  %v8632_v50 = vpop.f32.mrb[112].mxu1 }
 0x292   : > { %v8634_v19 = vpop.f32.mrb[113].mxu1 }
 0x293   : > { %v8636_v59 = vpop.f32.mrb[114].mxu1 }
 0x294   : > { %v8638_v52 = vpop.f32.mrb[115].mxu1 }
 0x299   : > { %v8640_v34 = vpop.f32.mrb[116].mxu1 }
 0x29a   : > { %v8642_v32 = vpop.f32.mrb[117].mxu1 }
 0x29b   : > { %v8644_v28 = vpop.f32.mrb[118].mxu1 }
 0x29c   : > { %v8646_v43 = vpop.f32.mrb[119].mxu1 }
 0x2a1   : > { %v8648_v38 = vpop.f32.mrb[120].mxu1 }
 0x2a2   : > { %v8650_v62 = vpop.f32.mrb[121].mxu1 }
 0x2a3   : > { %v8652_v8 = vpop.f32.mrb[122].mxu1 }
 0x2a4   : > { %v8654_v18 = vpop.f32.mrb[123].mxu1 }
 0x2a9   : > { %v8656_v40 = vpop.f32.mrb[124].mxu1 }
 0x2aa   : > { %v8658_v36 = vpop.f32.mrb[125].mxu1 }
 0x2ab   : > { %v8660_v33 = vpop.f32.mrb[126].mxu1 }
 0x2ac   : > { %v8662_v26 = vpop.f32.mrb[127].mxu1 }
 0x2b1   : > { %v8664_v11 = vpop.f32.mrb[128].mxu1 }
 0x2b2   : > { %10513 = vst [vmem:[#allocation16_spill] sm:$0xff] %v8664_v11  ;;  %v8666_v16 = vpop.f32.mrb[129].mxu1 }
 0x2b3   : > { %10514 = vst [vmem:[#allocation17_spill] sm:$0xff] %v8666_v16  ;;  %v8668_v12 = vpop.f32.mrb[130].mxu1 }
 0x2b4   : > { %10515 = vst [vmem:[#allocation18_spill] sm:$0xff] %v8668_v12  ;;  %v8670_v21 = vpop.f32.mrb[131].mxu1 }
 0x2b5   : > { %10516 = vst [vmem:[#allocation19_spill] sm:$0xff] %v8670_v21 }
 0x2b9   : > { %v8672_v47 = vpop.f32.mrb[132].mxu1 }
 0x2ba   : > { %10517 = vst [vmem:[#allocation20_spill] sm:$0xff] %v8672_v47  ;;  %v8674_v9 = vpop.f32.mrb[133].mxu1 }
 0x2bb   : > { %10518 = vst [vmem:[#allocation21_spill] sm:$0xff] %v8674_v9  ;;  %v8676_v14 = vpop.f32.mrb[134].mxu1 }
 0x2bc   : > { %10519 = vst [vmem:[#allocation22_spill] sm:$0xff] %v8676_v14  ;;  %v8678_v63 = vpop.f32.mrb[135].mxu1 }
 0x2bd   : > { %10520 = vst [vmem:[#allocation23_spill] sm:$0xff] %v8678_v63 }
 0x2c1   : > { %v8680_v25 = vpop.f32.mrb[136].mxu1 }
 0x2c2   : > { %10521 = vst [vmem:[#allocation24_spill] sm:$0xff] %v8680_v25  ;;  %v8682_v49 = vpop.f32.mrb[137].mxu1 }
 0x2c3   : > { %10522 = vst [vmem:[#allocation25_spill] sm:$0xff] %v8682_v49  ;;  %v8684_v30 = vpop.f32.mrb[138].mxu1  ;;  %v2626_v11 = vpop.xlane.xlu0 %2625 }
 0x2c4   : > { %10523 = vst [vmem:[#allocation26_spill] sm:$0xff] %v8684_v30  ;;  %v8686_v16 = vpop.f32.mrb[139].mxu1  ;;  %v2720_v12 = vsub.f32 %v8332_v39, %v2626_v11  ;;  %v2721_v21 = vsub.f32 %v8340_v46, %v2626_v11 }
 0x2c5   : > { %10524 = vst [vmem:[#allocation27_spill] sm:$0xff] %v8686_v16 }
 0x2c6   : > { %v2784_v47 = vmul.f32 1.442695, %v2720_v12  ;;  %v2786_v2 = vmul.f32 1.442695, %v2721_v21 }
 0x2c7   : > { %v2629_v9 = vpop.xlane.xlu0 %2628 }
 0x2c8   : > { %6214 = vpow2.f32 %v2784_v47  ;;  %v2722_v14 = vsub.f32 %v8342_v56, %v2629_v9  ;;  %v2723_v63 = vsub.f32 %v8344_v17, %v2629_v9 }
 0x2c9   : > { %v8692_v25 = vpop.f32.mrb[140].mxu1  ;;  %6216 = vpow2.f32 %v2786_v2  ;;  %v2318_v2 = vld [vmem:[%s10360_s7 + $0x180] sm:$0xff] }
 0x2ca   : > { %v8694_v49 = vpop.f32.mrb[141].mxu1  ;;  %v2788_v30 = vmul.f32 1.442695, %v2722_v14  ;;  %v2790_v20 = vmul.f32 1.442695, %v2723_v63  ;;  %v2319_v63 = vld [vmem:[%s10360_s7 + $0x188] sm:$0xff] }
 0x2cb   : > { %v8696_v16 = vpop.f32.mrb[142].mxu1  ;;  %v2632_v39 = vpop.xlane.xlu1 %2631 }
 0x2cc   : > { %v8698_v48 = vpop.f32.mrb[143].mxu1  ;;  %6218 = vpow2.f32 %v2788_v30  ;;  %v2724_v46 = vsub.f32 %v8360_v13, %v2632_v39  ;;  %v2725_v47 = vsub.f32 %v8368_v42, %v2632_v39 }
 0x2cd   : > { %6220 = vpow2.f32 %v2790_v20 }
 0x2ce   : > { %v2792_v56 = vmul.f32 1.442695, %v2724_v46  ;;  %v2794_v17 = vmul.f32 1.442695, %v2725_v47  ;;  %v8721_v46 = vadd.f32 %v8632_v50, %v2318_v2 }
 0x2cf   : > { %v2635_v9 = vpop.xlane.xlu1 %2634 }
 0x2d0   : > { %6222 = vpow2.f32 %v2792_v56  ;;  %v2726_v14 = vsub.f32 %v8370_v7, %v2635_v9  ;;  %v2727_v30 = vsub.f32 %v8372_v24, %v2635_v9  ;;  %v8724_v7 = vadd.f32 %v8634_v19, %v2319_v63  ;;  %v2320_v56 = vld [vmem:[%s10360_s7 + $0x190] sm:$0xff] }
 0x2d1   : > { %v8710_v13 = vpop.f32.mrb[144].mxu1  ;;  %6224 = vpow2.f32 %v2794_v17  ;;  %v2321_v17 = vld [vmem:[%s10360_s7 + $0x198] sm:$0xff] }
 0x2d2   : > { %10525 = vst [vmem:[#allocation28_spill] sm:$0xff] %v8710_v13  ;;  %v8712_v42 = vpop.f32.mrb[145].mxu1  ;;  %v8714_v20 = vpop.eup %6214  ;;  %v2796_v21 = vmul.f32 1.442695, %v2726_v14  ;;  %v2798_v12 = vmul.f32 1.442695, %v2727_v30 }
 0x2d3   : > { %10526 = vst [vmem:[#allocation29_spill] sm:$0xff] %v8712_v42  ;;  %v8716_v11 = vpop.f32.mrb[146].mxu1  ;;  %v8718_v39 = vpop.eup %6216 }
 0x2d4   : > { %10527 = vst [vmem:[#allocation30_spill] sm:$0xff] %v8716_v11  ;;  %v2638_v24 = vpop.xlane.xlu0 %2637  ;;  %v8726_v47 = vpop.f32.mrb[147].mxu1  ;;  %6226 = vpow2.f32 %v2796_v21  ;;  %v2912_v19 = vadd.f32 %v8718_v39, %v8714_v20  ;;  %v2322_v21 = vld [vmem:[%s10360_s7 + $0x1a0] sm:$0xff] }
 0x2d5   : > { %10528 = vst [vmem:[#allocation31_spill] sm:$0xff] %v8726_v47  ;;  %v2728_v9 = vsub.f32 %v8391_v60, %v2638_v24  ;;  %v2729_v50 = vsub.f32 %v8396_v58, %v2638_v24  ;;  %6228 = vpow2.f32 %v2798_v12  ;;  %v2641_v2 = vpop.xlane.xlu1 %2640  ;;  %v8745_v60 = vadd.f32 %v8636_v59, %v2320_v56 }
 0x2d6   : > { %v8738_v63 = vpop.eup %6218  ;;  %v2730_v47 = vsub.f32 %v8398_v31, %v2641_v2  ;;  %v2731_v11 = vsub.f32 %v8400_v45, %v2641_v2  ;;  %2913 = vadd.xlane.f32.xlu0 %v2912_v19  ;;  %v8748_v58 = vadd.f32 %v8638_v52, %v2321_v17  ;;  %v2696_v12 = vmax.f32 %v8721_v46, %v8724_v7  ;;  %v2323_v31 = vld [vmem:[%s10360_s7 + $0x1a8] sm:$0xff] }
 0x2d7   : > { %v2800_v14 = vmul.f32 1.442695, %v2728_v9  ;;  %v2802_v30 = vmul.f32 1.442695, %v2729_v50  ;;  %v8742_v42 = vpop.eup %6220 }
 0x2d8   : > { %v2804_v45 = vmul.f32 1.442695, %v2730_v47  ;;  %v2806_v24 = vmul.f32 1.442695, %v2731_v11  ;;  %v2915_v59 = vadd.f32 %v8742_v42, %v8738_v63  ;;  %v8771_v47 = vadd.f32 %v8640_v34, %v2322_v21 }
 0x2d9   : > { %6230 = vpow2.f32 %v2800_v14  ;;  %v8760_v56 = vpop.f32.mrb[148].mxu1  ;;  %v8774_v11 = vadd.f32 %v8642_v32, %v2323_v31  ;;  %v2324_v14 = vld [vmem:[%s10360_s7 + $0x1b0] sm:$0xff]  ;;  %v2699_v21 = vmax.f32 %v8745_v60, %v8748_v58 }
 0x2da   : > { %10529 = vst [vmem:[#allocation32_spill] sm:$0xff] %v8760_v56  ;;  %6232 = vpow2.f32 %v2802_v30  ;;  %v8762_v52 = vpop.f32.mrb[149].mxu1  ;;  %v8764_v17 = vpop.eup %6222  ;;  %2697 = vmax.xlane.f32.xlu0 %v2696_v12  ;;  %2916 = vadd.xlane.f32.xlu1 %v2915_v59  ;;  %v2325_v30 = vld [vmem:[%s10360_s7 + $0x1b8] sm:$0xff] }
 0x2db   : > { %10530 = vst [vmem:[#allocation33_spill] sm:$0xff] %v8762_v52  ;;  %6234 = vpow2.f32 %v2804_v45  ;;  %v8766_v9 = vpop.f32.mrb[150].mxu1  ;;  %v8768_v50 = vpop.eup %6224  ;;  %v2326_v52 = vld [vmem:[%s10360_s7 + $0x1c0] sm:$0xff] }
 0x2dc   : > { %10531 = vst [vmem:[#allocation34_spill] sm:$0xff] %v8766_v9  ;;  %6236 = vpow2.f32 %v2806_v24  ;;  %v2644_v19 = vpop.xlane.xlu0 %2643  ;;  %v8776_v2 = vpop.f32.mrb[151].mxu1  ;;  %v2918_v32 = vadd.f32 %v8768_v50, %v8764_v17 }
 0x2dd   : > { %10532 = vst [vmem:[#allocation35_spill] sm:$0xff] %v8776_v2  ;;  %v2732_v12 = vsub.f32 %v8419_v44, %v2644_v19  ;;  %v2733_v34 = vsub.f32 %v8424_v54, %v2644_v19  ;;  %v2647_v31 = vpop.xlane.xlu1 %2646  ;;  %v8797_v54 = vadd.f32 %v8644_v28, %v2324_v14  ;;  %v8800_v19 = vadd.f32 %v8646_v43, %v2325_v30 }
 0x2de   : > { %v8790_v45 = vpop.eup %6226  ;;  %v2734_v2 = vsub.f32 %v8426_v29, %v2647_v31  ;;  %v2735_v9 = vsub.f32 %v8428_v4, %v2647_v31  ;;  %2919 = vadd.xlane.f32.xlu0 %v2918_v32  ;;  %2700 = vmax.xlane.f32.xlu1 %v2699_v21  ;;  %v2327_v29 = vld [vmem:[%s10360_s7 + $0x1c8] sm:$0xff] }
 0x2df   : > { %v2808_v24 = vmul.f32 1.442695, %v2732_v12  ;;  %v2810_v59 = vmul.f32 1.442695, %v2733_v34  ;;  %v8794_v44 = vpop.eup %6228  ;;  %v2702_v12 = vmax.f32 %v8771_v47, %v8774_v11 }
 0x2e0   : > { %v2812_v4 = vmul.f32 1.442695, %v2734_v2  ;;  %v2814_v34 = vmul.f32 1.442695, %v2735_v9  ;;  %v2921_v28 = vadd.f32 %v8794_v44, %v8790_v45  ;;  %v8823_v2 = vadd.f32 %v8648_v38, %v2326_v52 }
 0x2e1   : > { %6238 = vpow2.f32 %v2808_v24  ;;  %v8810_v32 = vpop.f32.mrb[152].mxu1  ;;  %v8826_v9 = vadd.f32 %v8650_v62, %v2327_v29  ;;  %v2705_v62 = vmax.f32 %v8797_v54, %v8800_v19 }
 0x2e2   : > { %10533 = vst [vmem:[#allocation36_spill] sm:$0xff] %v8810_v32  ;;  %6240 = vpow2.f32 %v2810_v59  ;;  %v8814_v43 = vpop.f32.mrb[153].mxu1  ;;  %2703 = vmax.xlane.f32.xlu0 %v2702_v12  ;;  %2922 = vadd.xlane.f32.xlu1 %v2921_v28  ;;  %v2328_v12 = vld [vmem:[%s10360_s7 + $0x1d0] sm:$0xff] }
 0x2e3   : > { %10534 = vst [vmem:[#allocation37_spill] sm:$0xff] %v8814_v43  ;;  %v8816_v14 = vpop.eup %6230  ;;  %6242 = vpow2.f32 %v2812_v4  ;;  %v8818_v30 = vpop.f32.mrb[154].mxu1  ;;  %v2329_v4 = vld [vmem:[%s10360_s7 + $0x1d8] sm:$0xff] }
 0x2e4   : > { %10535 = vst [vmem:[#allocation38_spill] sm:$0xff] %v8818_v30  ;;  %v8820_v21 = vpop.eup %6232  ;;  %6244 = vpow2.f32 %v2814_v34  ;;  %v8828_v31 = vpop.f32.mrb[155].mxu1 }
 0x2e5   : > { %10536 = vst [vmem:[#allocation39_spill] sm:$0xff] %v8828_v31  ;;  %v2650_v24 = vpop.xlane.xlu0 %2649  ;;  %v8830_v59 = vpop.eup %6234  ;;  %v2924_v29 = vadd.f32 %v8820_v21, %v8816_v14 }
 0x2e6   : > { %v2736_v38 = vsub.f32 %v8447_v37, %v2650_v24  ;;  %v2737_v52 = vsub.f32 %v8452_v6, %v2650_v24  ;;  %v8844_v34 = vpop.eup %6236  ;;  %v2653_v28 = vpop.xlane.xlu1 %2652  ;;  %2706 = vmax.xlane.f32.xlu1 %v2705_v62  ;;  %v8849_v37 = vadd.f32 %v8652_v8, %v2328_v12  ;;  %v8852_v6 = vadd.f32 %v8654_v18, %v2329_v4  ;;  %v2330_v24 = vld [vmem:[%s10360_s7 + $0x1e0] sm:$0xff] }
 0x2e7   : > { %v2738_v43 = vsub.f32 %v8454_v22, %v2653_v28  ;;  %v2739_v32 = vsub.f32 %v8456_v51, %v2653_v28  ;;  %2925 = vadd.xlane.f32.xlu0 %v2924_v29  ;;  %v2331_v22 = vld [vmem:[%s10360_s7 + $0x1e8] sm:$0xff]  ;;  %v2927_v8 = vadd.f32 %v8844_v34, %v8830_v59 }
 0x2e8   : > { %v2816_v31 = vmul.f32 1.442695, %v2736_v38  ;;  %v2818_v30 = vmul.f32 1.442695, %v2737_v52  ;;  %v2708_v38 = vmax.f32 %v8823_v2, %v8826_v9 }
 0x2e9   : > { %v2820_v51 = vmul.f32 1.442695, %v2738_v43  ;;  %v2822_v52 = vmul.f32 1.442695, %v2739_v32  ;;  %v8862_v62 = vpop.f32.mrb[156].mxu1  ;;  %v8875_v43 = vadd.f32 %v8656_v40, %v2330_v24  ;;  %v8878_v32 = vadd.f32 %v8658_v36, %v2331_v22 }
 0x2ea   : > { %6246 = vpow2.f32 %v2816_v31  ;;  %10537 = vst [vmem:[#allocation40_spill] sm:$0xff] %v8862_v62  ;;  %v8866_v18 = vpop.f32.mrb[157].mxu1  ;;  %2928 = vadd.xlane.f32.xlu1 %v2927_v8  ;;  %v2711_v36 = vmax.f32 %v8849_v37, %v8852_v6 }
 0x2eb   : > { %6248 = vpow2.f32 %v2818_v30  ;;  %10538 = vst [vmem:[#allocation41_spill] sm:$0xff] %v8866_v18  ;;  %v8868_v12 = vpop.eup %6238  ;;  %2709 = vmax.xlane.f32.xlu0 %v2708_v38  ;;  %v8870_v4 = vpop.f32.mrb[158].mxu1  ;;  %v2332_v38 = vld [vmem:[%s10360_s7 + $0x1f0] sm:$0xff] }
 0x2ec   : > { %6250 = vpow2.f32 %v2820_v51  ;;  %10539 = vst [vmem:[#allocation42_spill] sm:$0xff] %v8870_v4  ;;  %v8872_v29 = vpop.eup %6240  ;;  %v8880_v31 = vpop.f32.mrb[159].mxu1  ;;  %v2333_v51 = vld [vmem:[%s10360_s7 + $0x1f8] sm:$0xff] }
 0x2ed   : > { %6252 = vpow2.f32 %v2822_v52  ;;  %10540 = vst [vmem:[#allocation43_spill] sm:$0xff] %v8880_v31  ;;  %v2656_v30 = vpop.xlane.xlu0 %2655  ;;  %v8882_v28 = vpop.eup %6242  ;;  %v2930_v22 = vadd.f32 %v8872_v29, %v8868_v12 }
 0x2ee   : > { %v2740_v40 = vsub.f32 %v8473_v23, %v2656_v30  ;;  %v2741_v24 = vsub.f32 %v8478_v5, %v2656_v30  ;;  %v8896_v52 = vpop.eup %6244  ;;  %v2659_v8 = vpop.xlane.xlu1 %2658  ;;  %2712 = vmax.xlane.f32.xlu1 %v2711_v36  ;;  %v8901_v23 = vadd.f32 %v8660_v33, %v2332_v38  ;;  %v8904_v5 = vadd.f32 %v8662_v26, %v2333_v51 }
 0x2ef   : > { %v2742_v18 = vsub.f32 %v8480_v53, %v2659_v8  ;;  %v2743_v62 = vsub.f32 %v8482_v61, %v2659_v8  ;;  %2931 = vadd.xlane.f32.xlu0 %v2930_v22  ;;  %v2714_v30 = vmax.f32 %v8875_v43, %v8878_v32  ;;  %v2933_v53 = vadd.f32 %v8896_v52, %v8882_v28 }
 0x2f0   : > { %v2824_v31 = vmul.f32 1.442695, %v2740_v40  ;;  %v2826_v4 = vmul.f32 1.442695, %v2741_v24  ;;  %v2717_v51 = vmax.f32 %v8901_v23, %v8904_v5 }
 0x2f1   : > { %v2828_v56 = vmul.f32 1.442695, %v2742_v18  ;;  %v2830_v13 = vmul.f32 1.442695, %v2743_v62  ;;  %v8908_v40 = vpop.f32.mrb[160].mxu1 }
 0x2f2   : > { %6254 = vpow2.f32 %v2824_v31  ;;  %10541 = vst [vmem:[#allocation44_spill] sm:$0xff] %v8908_v40  ;;  %v8912_v61 = vpop.f32.mrb[161].mxu1  ;;  %2934 = vadd.xlane.f32.xlu1 %v2933_v53 }
 0x2f3   : > { %6256 = vpow2.f32 %v2826_v4  ;;  %10542 = vst [vmem:[#allocation45_spill] sm:$0xff] %v8912_v61  ;;  %2715 = vmax.xlane.f32.xlu0 %v2714_v30  ;;  %v8916_v33 = vpop.f32.mrb[162].mxu1  ;;  %v2662_v62 = vpop.xlane.xlu0 %2661 }
 0x2f4   : > { %v8914_v24 = vpop.eup %6246  ;;  %6258 = vpow2.f32 %v2828_v56  ;;  %10543 = vst [vmem:[#allocation46_spill] sm:$0xff] %v8916_v33  ;;  %v8920_v18 = vpop.f32.mrb[163].mxu1  ;;  %v2744_v38 = vsub.f32 %v8497_v0, %v2662_v62  ;;  %v2745_v4 = vsub.f32 %v8502_v15, %v2662_v62 }
 0x2f5   : > { %v8918_v26 = vpop.eup %6248  ;;  %6260 = vpow2.f32 %v2830_v13  ;;  %10544 = vst [vmem:[#allocation47_spill] sm:$0xff] %v8920_v18  ;;  %v2665_v22 = vpop.xlane.xlu1 %2664 }
 0x2f6   : > { %v8922_v31 = vpop.eup %6250  ;;  %v2936_v56 = vadd.f32 %v8918_v26, %v8914_v24  ;;  %v2832_v8 = vmul.f32 1.442695, %v2744_v38  ;;  %v2834_v13 = vmul.f32 1.442695, %v2745_v4  ;;  %v2746_v30 = vsub.f32 %v8504_v41, %v2665_v22  ;;  %2718 = vmax.xlane.f32.xlu1 %v2717_v51 }
 0x2f7   : > { %v8930_v36 = vpop.eup %6252  ;;  %v2747_v53 = vsub.f32 %v8506_v1, %v2665_v22 }
 0x2f8   : > { %2937 = vadd.xlane.f32.xlu0 %v2936_v56  ;;  %6262 = vpow2.f32 %v2832_v8  ;;  %v2836_v0 = vmul.f32 1.442695, %v2746_v30  ;;  %v2939_v18 = vadd.f32 %v8930_v36, %v8922_v31 }
 0x2f9   : > { %v2838_v15 = vmul.f32 1.442695, %v2747_v53  ;;  %v8934_v62 = vpop.f32.mrb[164].mxu1  ;;  %6264 = vpow2.f32 %v2834_v13 }
 0x2fa   : > { %10545 = vst [vmem:[#allocation48_spill] sm:$0xff] %v8934_v62  ;;  %v8938_v33 = vpop.f32.mrb[165].mxu1  ;;  %6266 = vpow2.f32 %v2836_v0  ;;  %2940 = vadd.xlane.f32.xlu1 %v2939_v18 }
 0x2fb   : > { %10546 = vst [vmem:[#allocation49_spill] sm:$0xff] %v8938_v33  ;;  %v8942_v41 = vpop.f32.mrb[166].mxu1  ;;  %6268 = vpow2.f32 %v2838_v15  ;;  %v2668_v4 = vpop.xlane.xlu0 %2667 }
 0x2fc   : > { %v8940_v61 = vpop.eup %6254  ;;  %10547 = vst [vmem:[#allocation50_spill] sm:$0xff] %v8942_v41  ;;  %v8946_v38 = vpop.f32.mrb[167].mxu1  ;;  %v2748_v56 = vsub.f32 %v8521_v55, %v2668_v4  ;;  %v2749_v22 = vsub.f32 %v8526_v3, %v2668_v4 }
 0x2fd   : > { %v8944_v1 = vpop.eup %6256  ;;  %10548 = vst [vmem:[#allocation51_spill] sm:$0xff] %v8946_v38  ;;  %v2671_v18 = vpop.xlane.xlu1 %2670 }
 0x2fe   : > { %v8948_v51 = vpop.eup %6258  ;;  %v2942_v8 = vadd.f32 %v8944_v1, %v8940_v61  ;;  %v2840_v30 = vmul.f32 1.442695, %v2748_v56  ;;  %v2842_v53 = vmul.f32 1.442695, %v2749_v22  ;;  %v2750_v0 = vsub.f32 %v8528_v10, %v2671_v18 }
 0x2ff   : > { %v8954_v13 = vpop.eup %6260  ;;  %v2751_v15 = vsub.f32 %v8530_v27, %v2671_v18 }
 0x300   : > { %2943 = vadd.xlane.f32.xlu0 %v2942_v8  ;;  %v2945_v38 = vadd.f32 %v8954_v13, %v8948_v51  ;;  %6270 = vpow2.f32 %v2840_v30  ;;  %v2844_v55 = vmul.f32 1.442695, %v2750_v0 }
 0x301   : > { %v2846_v41 = vmul.f32 1.442695, %v2751_v15  ;;  %v8960_v3 = vpop.f32.mrb[168].mxu1  ;;  %6272 = vpow2.f32 %v2842_v53 }
 0x302   : > { %10549 = vst [vmem:[#allocation52_spill] sm:$0xff] %v8960_v3  ;;  %2946 = vadd.xlane.f32.xlu1 %v2945_v38  ;;  %v8962_v4 = vpop.f32.mrb[169].mxu1  ;;  %v8964_v33 = vpop.eup %6262  ;;  %6274 = vpow2.f32 %v2844_v55 }
 0x303   : > { %10550 = vst [vmem:[#allocation53_spill] sm:$0xff] %v8962_v4  ;;  %10551 = vst [vmem:[#allocation54_spill] sm:$0xff] %v8964_v33  ;;  %v8966_v56 = vpop.f32.mrb[170].mxu1  ;;  %v8968_v10 = vpop.eup %6264  ;;  %6276 = vpow2.f32 %v2846_v41  ;;  %v10557_v41 = vld [vmem:[#allocation9_spill] sm:$0xff] }
 0x304   : > { %10552 = vst [vmem:[#allocation55_spill] sm:$0xff] %v8966_v56  ;;  %v8970_v27 = vpop.f32.mrb[171].mxu1  ;;  %v2674_v22 = vpop.xlane.xlu0 %2673  ;;  %v2948_v38 = vadd.f32 %v8968_v10, %v8964_v33  ;;  %v10556_v56 = vld [vmem:[#allocation8_spill] sm:$0xff] }
 0x305   : > { %10553 = vst [vmem:[#allocation56_spill] sm:$0xff] %v8970_v27  ;;  %v8972_v8 = vpop.eup %6266  ;;  %v2752_v18 = vsub.f32 %v8545_v57, %v2674_v22  ;;  %v2753_v30 = vsub.f32 %v8550_v35, %v2674_v22  ;;  %v2677_v0 = vpop.xlane.xlu1 %2676 }
 0x306   : > { %10554 = vst [vmem:[#allocation57_spill] sm:$0xff] %v8972_v8  ;;  %v8978_v53 = vpop.eup %6268  ;;  %v2754_v4 = vsub.f32 %v10556_v56, %v2677_v0  ;;  %v2755_v3 = vsub.f32 %v10557_v41, %v2677_v0  ;;  %2949 = vadd.xlane.f32.xlu0 %v2948_v38 }
 0x307   : > { %10555 = vst [vmem:[#allocation58_spill] sm:$0xff] %v8978_v53  ;;  %v2848_v15 = vmul.f32 1.442695, %v2752_v18  ;;  %v2850_v55 = vmul.f32 1.442695, %v2753_v30  ;;  %v2951_v27 = vadd.f32 %v8978_v53, %v8972_v8 }
 0x308   : > { %v2852_v57 = vmul.f32 1.442695, %v2754_v4  ;;  %v2854_v62 = vmul.f32 1.442695, %v2755_v3  ;;  %v10565_v3 = vld [vmem:[#allocation10_spill] sm:$0xff] }
 0x309   : > { %6278 = vpow2.f32 %v2848_v15  ;;  %v8984_v35 = vpop.f32.mrb[172].mxu1  ;;  %2952 = vadd.xlane.f32.xlu1 %v2951_v27  ;;  %v10566_v15 = vld [vmem:[#allocation11_spill] sm:$0xff] }
 0x30a   : > { %10558 = vst [vmem:[#allocation8_spill] sm:$0xff] %v8984_v35  ;;  %6280 = vpow2.f32 %v2850_v55  ;;  %v8986_v22 = vpop.f32.mrb[173].mxu1  ;;  %v8988_v40 = vpop.eup %6270  ;;  %v10568_v35 = vld [vmem:[#allocation2_spill] sm:$0xff] }
 0x30b   : > { %10559 = vst [vmem:[#allocation9_spill] sm:$0xff] %v8986_v22  ;;  %10560 = vst [vmem:[#allocation59_spill] sm:$0xff] %v8988_v40  ;;  %6282 = vpow2.f32 %v2852_v57  ;;  %v8990_v18 = vpop.f32.mrb[174].mxu1  ;;  %v8992_v56 = vpop.eup %6272 }
 0x30c   : > { %10561 = vst [vmem:[#allocation60_spill] sm:$0xff] %v8990_v18  ;;  %10562 = vst [vmem:[#allocation61_spill] sm:$0xff] %v8992_v56  ;;  %6284 = vpow2.f32 %v2854_v62  ;;  %v8994_v30 = vpop.f32.mrb[175].mxu1  ;;  %v2680_v38 = vpop.xlane.xlu0 %2679  ;;  %v2954_v27 = vadd.f32 %v8992_v56, %v8988_v40  ;;  %v10569_v62 = vld [vmem:[#allocation3_spill] sm:$0xff] }
 0x30d   : > { %10563 = vst [vmem:[#allocation62_spill] sm:$0xff] %v8994_v30  ;;  %v8996_v0 = vpop.eup %6274  ;;  %v2756_v4 = vsub.f32 %v10565_v3, %v2680_v38  ;;  %v2757_v55 = vsub.f32 %v10566_v15, %v2680_v38 }
 0x30e   : > { %10564 = vst [vmem:[#allocation63_spill] sm:$0xff] %v8996_v0  ;;  %v9002_v41 = vpop.eup %6276  ;;  %v2683_v57 = vpop.xlane.xlu1 %2682  ;;  %2955 = vadd.xlane.f32.xlu0 %v2954_v27 }
 0x30f   : > { %10567 = vst [vmem:[#allocation10_spill] sm:$0xff] %v9002_v41  ;;  %v2856_v22 = vmul.f32 1.442695, %v2756_v4  ;;  %v2858_v18 = vmul.f32 1.442695, %v2757_v55  ;;  %v2758_v33 = vsub.f32 %v10568_v35, %v2683_v57  ;;  %v2759_v8 = vsub.f32 %v10569_v62, %v2683_v57  ;;  %v10578_v57 = vld [vmem:[#allocation5_spill] sm:$0xff] }
 0x310   : > { %v2957_v30 = vadd.f32 %v9002_v41, %v8996_v0 }
 0x311   : > { %6286 = vpow2.f32 %v2856_v22  ;;  %v2860_v3 = vmul.f32 1.442695, %v2758_v33  ;;  %v2862_v53 = vmul.f32 1.442695, %v2759_v8  ;;  %v9008_v38 = vpop.f32.mrb[176].mxu1  ;;  %v10577_v33 = vld [vmem:[#allocation4_spill] sm:$0xff] }
 0x312   : > { %10570 = vst [vmem:[#allocation11_spill] sm:$0xff] %v9008_v38  ;;  %6288 = vpow2.f32 %v2858_v18  ;;  %2958 = vadd.xlane.f32.xlu1 %v2957_v30  ;;  %v9010_v15 = vpop.f32.mrb[177].mxu1  ;;  %v10580_v38 = vld [vmem:[#allocation6_spill] sm:$0xff] }
 0x313   : > { %10571 = vst [vmem:[#allocation2_spill] sm:$0xff] %v9010_v15  ;;  %v9012_v40 = vpop.eup %6278  ;;  %6290 = vpow2.f32 %v2860_v3  ;;  %v9014_v4 = vpop.f32.mrb[178].mxu1 }
 0x314   : > { %10572 = vst [vmem:[#allocation3_spill] sm:$0xff] %v9012_v40  ;;  %10573 = vst [vmem:[#allocation64_spill] sm:$0xff] %v9014_v4  ;;  %v9016_v35 = vpop.eup %6280  ;;  %6292 = vpow2.f32 %v2862_v53  ;;  %v9018_v55 = vpop.f32.mrb[179].mxu1  ;;  %v10581_v53 = vld [vmem:[#allocation7_spill] sm:$0xff] }
 0x315   : > { %10574 = vst [vmem:[#allocation65_spill] sm:$0xff] %v9016_v35  ;;  %10575 = vst [vmem:[#allocation66_spill] sm:$0xff] %v9018_v55  ;;  %v2686_v27 = vpop.xlane.xlu0 %2685  ;;  %v9020_v22 = vpop.eup %6282  ;;  %v2960_v30 = vadd.f32 %v9016_v35, %v9012_v40 }
 0x316   : > { %10576 = vst [vmem:[#allocation67_spill] sm:$0xff] %v9020_v22  ;;  %v2760_v8 = vsub.f32 %v10577_v33, %v2686_v27  ;;  %v2761_v18 = vsub.f32 %v10578_v57, %v2686_v27  ;;  %v9026_v62 = vpop.eup %6284  ;;  %v2689_v3 = vpop.xlane.xlu1 %2688 }
 0x317   : > { %10579 = vst [vmem:[#allocation4_spill] sm:$0xff] %v9026_v62  ;;  %v2762_v0 = vsub.f32 %v10580_v38, %v2689_v3  ;;  %v2763_v41 = vsub.f32 %v10581_v53, %v2689_v3  ;;  %2961 = vadd.xlane.f32.xlu0 %v2960_v30  ;;  %v2963_v55 = vadd.f32 %v9026_v62, %v9020_v22  ;;  %v10588_v3 = vld [vmem:[#allocation13_spill] sm:$0xff] }
 0x318   : > { %v2864_v15 = vmul.f32 1.442695, %v2760_v8  ;;  %v2866_v4 = vmul.f32 1.442695, %v2761_v18 }
 0x319   : > { %v2868_v33 = vmul.f32 1.442695, %v2762_v0  ;;  %v2870_v56 = vmul.f32 1.442695, %v2763_v41  ;;  %v9032_v27 = vpop.f32.mrb[180].mxu1  ;;  %2964 = vadd.xlane.f32.xlu1 %v2963_v55  ;;  %v10587_v0 = vld [vmem:[#allocation12_spill] sm:$0xff] }
 0x31a   : > { %6294 = vpow2.f32 %v2864_v15  ;;  %10582 = vst [vmem:[#allocation5_spill] sm:$0xff] %v9032_v27  ;;  %v9034_v57 = vpop.f32.mrb[181].mxu1  ;;  %v10589_v27 = vld [vmem:[#allocation14_spill] sm:$0xff] }
 0x31b   : > { %6296 = vpow2.f32 %v2866_v4  ;;  %10583 = vst [vmem:[#allocation6_spill] sm:$0xff] %v9034_v57  ;;  %v9036_v40 = vpop.eup %6286  ;;  %v9038_v8 = vpop.f32.mrb[182].mxu1 }
 0x31c   : > { %10584 = vst [vmem:[#allocation7_spill] sm:$0xff] %v9036_v40  ;;  %6298 = vpow2.f32 %v2868_v33  ;;  %10585 = vst [vmem:[#allocation68_spill] sm:$0xff] %v9038_v8  ;;  %v9040_v38 = vpop.eup %6288  ;;  %v9042_v18 = vpop.f32.mrb[183].mxu1 }
 0x31d   : > { %6300 = vpow2.f32 %v2870_v56  ;;  %10586 = vst [vmem:[#allocation69_spill] sm:$0xff] %v9042_v18  ;;  %v2692_v30 = vpop.xlane.xlu0 %2691  ;;  %v9044_v15 = vpop.eup %6290  ;;  %v2966_v55 = vadd.f32 %v9040_v38, %v9036_v40  ;;  %v10590_v56 = vld [vmem:[#allocation15_spill] sm:$0xff] }
 0x31e   : > { %v2764_v41 = vsub.f32 %v10587_v0, %v2692_v30  ;;  %v2765_v4 = vsub.f32 %v10588_v3, %v2692_v30  ;;  %v9050_v53 = vpop.eup %6292  ;;  %v2695_v33 = vpop.xlane.xlu1 %2694 }
 0x31f   : > { %v2766_v22 = vsub.f32 %v10589_v27, %v2695_v33  ;;  %v2767_v62 = vsub.f32 %v10590_v56, %v2695_v33  ;;  %2967 = vadd.xlane.f32.xlu0 %v2966_v55  ;;  %v2969_v18 = vadd.f32 %v9050_v53, %v9044_v15 }
 0x320   : > { %v2872_v57 = vmul.f32 1.442695, %v2764_v41  ;;  %v2874_v8 = vmul.f32 1.442695, %v2765_v4 }
 0x321   : > { %v2876_v0 = vmul.f32 1.442695, %v2766_v22  ;;  %v2878_v35 = vmul.f32 1.442695, %v2767_v62  ;;  %v9056_v30 = vpop.f32.mrb[184].mxu1  ;;  %2970 = vadd.xlane.f32.xlu1 %v2969_v18 }
 0x322   : > { %6302 = vpow2.f32 %v2872_v57  ;;  %10591 = vst [vmem:[#allocation12_spill] sm:$0xff] %v9056_v30  ;;  %v9058_v3 = vpop.f32.mrb[185].mxu1 }
 0x323   : > { %6304 = vpow2.f32 %v2874_v8  ;;  %10592 = vst [vmem:[#allocation13_spill] sm:$0xff] %v9058_v3  ;;  %v9062_v41 = vpop.f32.mrb[186].mxu1 }
 0x324   : > { %v9060_v40 = vpop.eup %6294  ;;  %6306 = vpow2.f32 %v2876_v0  ;;  %10594 = vst [vmem:[#allocation15_spill] sm:$0xff] %v9062_v41  ;;  %v9066_v4 = vpop.f32.mrb[187].mxu1 }
 0x325   : > { %10593 = vst [vmem:[#allocation14_spill] sm:$0xff] %v9060_v40  ;;  %v9064_v27 = vpop.eup %6296  ;;  %6308 = vpow2.f32 %v2878_v35  ;;  %10595 = vst [vmem:[#allocation70_spill] sm:$0xff] %v9066_v4 }
 0x326   : > { %v9068_v55 = vpop.eup %6298  ;;  %v2972_v22 = vadd.f32 %v9064_v27, %v9060_v40 }
 0x327   : > { %10596 = vst [vmem:[#allocation71_spill] sm:$0xff] %v9068_v55  ;;  %v9072_v62 = vpop.eup %6300 }
 0x328   : > { %2973 = vadd.xlane.f32.xlu0 %v2972_v22  ;;  %v2975_v57 = vadd.f32 %v9072_v62, %v9068_v55 }
 0x329   : > { %v9076_v8 = vpop.f32.mrb[188].mxu1 }
 0x32a   : > { %2976 = vadd.xlane.f32.xlu1 %v2975_v57  ;;  %10597 = vst [vmem:[#allocation72_spill] sm:$0xff] %v9076_v8  ;;  %v9078_v18 = vpop.f32.mrb[189].mxu1 }
 0x32b   : > { %10598 = vst [vmem:[#allocation73_spill] sm:$0xff] %v9078_v18  ;;  %v9082_v35 = vpop.f32.mrb[190].mxu1 }
 0x32c   : > { %v9080_v33 = vpop.eup %6302  ;;  %10600 = vst [vmem:[#allocation75_spill] sm:$0xff] %v9082_v35  ;;  %v9086_v0 = vpop.f32.mrb[191].mxu1 }
 0x32d   : > { %10599 = vst [vmem:[#allocation74_spill] sm:$0xff] %v9080_v33  ;;  %v9084_v56 = vpop.eup %6304  ;;  %10602 = vst [vmem:[#allocation77_spill] sm:$0xff] %v9086_v0 }
 0x32e   : > { %10601 = vst [vmem:[#allocation76_spill] sm:$0xff] %v9084_v56  ;;  %v9088_v4 = vpop.eup %6306  ;;  %v2978_v22 = vadd.f32 %v9084_v56, %v9080_v33 }
 0x32f   : > { %10603 = vst [vmem:[#allocation78_spill] sm:$0xff] %v9088_v4  ;;  %v9092_v41 = vpop.eup %6308 }
 0x330   : > { %10604 = vst [vmem:[#allocation79_spill] sm:$0xff] %v9092_v41  ;;  %2979 = vadd.xlane.f32.xlu0 %v2978_v22  ;;  %v2981_v57 = vadd.f32 %v9092_v41, %v9088_v4 }
 0x332   : > { %2982 = vadd.xlane.f32.xlu1 %v2981_v57 }
 0x363   : > { %v2914_v18 = vpop.xlane.xlu0 %2913 }
 0x364   : > { %6310 = vrcp.f32 %v2914_v18 }
 0x367   : > { %v2917_v8 = vpop.xlane.xlu1 %2916  ;;  %v2698_v35 = vpop.xlane.xlu0 %2697 }
 0x368   : > { %6312 = vrcp.f32 %v2917_v8  ;;  %v2768_v3 = vsub.f32 %v8721_v46, %v2698_v35  ;;  %v2769_v0 = vsub.f32 %v8724_v7, %v2698_v35 }
 0x36a   : > { %v2880_v30 = vmul.f32 1.442695, %v2768_v3  ;;  %v2882_v40 = vmul.f32 1.442695, %v2769_v0 }
 0x36b   : > { %v2701_v55 = vpop.xlane.xlu1 %2700  ;;  %v2920_v33 = vpop.xlane.xlu0 %2919 }
 0x36c   : > { %6314 = vpow2.f32 %v2880_v30  ;;  %v2770_v22 = vsub.f32 %v8745_v60, %v2701_v55  ;;  %v2771_v56 = vsub.f32 %v8748_v58, %v2701_v55 }
 0x36d   : > { %6316 = vpow2.f32 %v2882_v40 }
 0x36e   : > { %v2884_v57 = vmul.f32 1.442695, %v2770_v22  ;;  %v2886_v4 = vmul.f32 1.442695, %v2771_v56  ;;  %6318 = vrcp.f32 %v2920_v33  ;;  %v6311_v8 = vpop.eup %6310 }
 0x36f   : > { %v2923_v18 = vpop.xlane.xlu1 %2922  ;;  %v2704_v41 = vpop.xlane.xlu0 %2703  ;;  %v3040_v60 = vmul.f32 %v6311_v8, %v8714_v20  ;;  %v3041_v33 = vmul.f32 %v6311_v8, %v8718_v39 }
 0x370   : > { %6320 = vpow2.f32 %v2884_v57  ;;  %v2772_v46 = vsub.f32 %v8771_v47, %v2704_v41  ;;  %v2773_v7 = vsub.f32 %v8774_v11, %v2704_v41 }
 0x371   : > { %6322 = vpow2.f32 %v2886_v4 }
 0x372   : > { %v6313_v3 = vpop.eup %6312  ;;  %6324 = vrcp.f32 %v2923_v18  ;;  %v2888_v30 = vmul.f32 1.442695, %v2772_v46  ;;  %v2890_v35 = vmul.f32 1.442695, %v2773_v7 }
 0x373   : > { %v3042_v58 = vmul.f32 %v6313_v3, %v8738_v63  ;;  %v2707_v40 = vpop.xlane.xlu1 %2706  ;;  %v3043_v56 = vmul.f32 %v6313_v3, %v8742_v42 }
 0x374   : > { %v2926_v55 = vpop.xlane.xlu0 %2925  ;;  %6326 = vpow2.f32 %v2888_v30  ;;  %v2774_v47 = vsub.f32 %v8797_v54, %v2707_v40  ;;  %v2775_v11 = vsub.f32 %v8800_v19, %v2707_v40 }
 0x375   : > { %6328 = vpow2.f32 %v2890_v35  ;;  %v3105_v41 = vpack.c.bf16 %v3043_v56, %v3041_v33  ;;  %v3104_v4 = vpack.c.bf16 %v3042_v58, %v3040_v60 }
 0x376   : > { %v9108_v0 = vpop.eup %6314  ;;  %v2892_v22 = vmul.f32 1.442695, %v2774_v47  ;;  %v2894_v20 = vmul.f32 1.442695, %v2775_v11  ;;  %6330 = vrcp.f32 %v2926_v55 }
 0x377   : > { %v9110_v63 = vpop.eup %6316  ;;  %v2929_v57 = vpop.xlane.xlu1 %2928  ;;  %3168 = vmatprep.mubr.bf16.mxu0 %v3105_v41 }
 0x378   : > { %v2710_v39 = vpop.xlane.xlu0 %2709  ;;  %v6319_v18 = vpop.eup %6318  ;;  %6332 = vpow2.f32 %v2892_v22  ;;  %3169 = vmatmul.mubr.bf16.vlgmr.msra.gmra.mrb[96].mxu0 %v3104_v4  ;;  %v2984_v19 = vadd.f32 %v9110_v63, %v9108_v0 }
 0x379   : > { %v2776_v42 = vsub.f32 %v8823_v2, %v2710_v39  ;;  %v2777_v54 = vsub.f32 %v8826_v9, %v2710_v39  ;;  %6334 = vpow2.f32 %v2894_v20  ;;  %v3045_v60 = vmul.f32 %v6319_v18, %v8768_v50 }
 0x37a   : > { %v9116_v8 = vpop.eup %6320  ;;  %6336 = vrcp.f32 %v2929_v57  ;;  %2985 = vadd.xlane.f32.xlu0 %v2984_v19  ;;  %v3044_v33 = vmul.f32 %v6319_v18, %v8764_v17 }
 0x37b   : > { %v2896_v46 = vmul.f32 1.442695, %v2776_v42  ;;  %v2898_v7 = vmul.f32 1.442695, %v2777_v54  ;;  %v9118_v3 = vpop.eup %6322  ;;  %v2713_v30 = vpop.xlane.xlu1 %2712 }
 0x37c   : > { %v2932_v35 = vpop.xlane.xlu0 %2931  ;;  %v6325_v2 = vpop.eup %6324  ;;  %v2778_v9 = vsub.f32 %v8849_v37, %v2713_v30  ;;  %v2779_v58 = vsub.f32 %v8852_v6, %v2713_v30  ;;  %v2987_v40 = vadd.f32 %v9118_v3, %v9116_v8 }
 0x37d   : > { %6338 = vpow2.f32 %v2896_v46  ;;  %v3047_v55 = vmul.f32 %v6325_v2, %v8794_v44  ;;  %v3046_v56 = vmul.f32 %v6325_v2, %v8790_v45 }
 0x37e   : > { %6340 = vpow2.f32 %v2898_v7  ;;  %v9128_v47 = vpop.eup %6326  ;;  %v2900_v11 = vmul.f32 1.442695, %v2778_v9  ;;  %v2902_v50 = vmul.f32 1.442695, %v2779_v58  ;;  %2988 = vadd.xlane.f32.xlu1 %v2987_v40 }
 0x37f   : > { %v9130_v41 = vpop.eup %6328  ;;  %6342 = vrcp.f32 %v2932_v35  ;;  %v2935_v37 = vpop.xlane.xlu1 %2934  ;;  %v3107_v6 = vpack.c.bf16 %v3047_v55, %v3045_v60  ;;  %v3106_v22 = vpack.c.bf16 %v3046_v56, %v3044_v33  ;;  %v3297_v56 = vld [vmem:[%s10361_s8] sm:$0xff] }
 0x380   : > { %v2716_v4 = vpop.xlane.xlu0 %2715  ;;  %v6331_v20 = vpop.eup %6330  ;;  %6344 = vpow2.f32 %v2900_v11  ;;  %v2990_v45 = vadd.f32 %v9130_v41, %v9128_v47 }
 0x381   : > { %v2780_v44 = vsub.f32 %v8875_v43, %v2716_v4  ;;  %v2781_v17 = vsub.f32 %v8878_v32, %v2716_v4  ;;  %6346 = vpow2.f32 %v2902_v50  ;;  %3176 = vmatprep.mubr.bf16.mxu0 %v3107_v6  ;;  %v3049_v19 = vmul.f32 %v6331_v20, %v8820_v21 }
 0x382   : > { %v9136_v57 = vpop.eup %6332  ;;  %6348 = vrcp.f32 %v2935_v37  ;;  %3177 = vmatmul.mubr.bf16.gmra.mrb[100].mxu0 %v3106_v22  ;;  %2991 = vadd.xlane.f32.xlu0 %v2990_v45  ;;  %v3048_v60 = vmul.f32 %v6331_v20, %v8816_v14  ;;  %v3298_v37 = vld [vmem:[%s10361_s8 + $0x8] sm:$0xff]  ;;  %v10605_v45 = vld [vmem:[#allocation16_spill] sm:$0xff] }
 0x383   : > { %v2904_v39 = vmul.f32 1.442695, %v2780_v44  ;;  %v2906_v18 = vmul.f32 1.442695, %v2781_v17  ;;  %v9138_v42 = vpop.eup %6334  ;;  %v2719_v54 = vpop.xlane.xlu1 %2718 }
 0x384   : > { %v6337_v43 = vpop.eup %6336  ;;  %v2782_v32 = vsub.f32 %v8901_v23, %v2719_v54  ;;  %v2783_v46 = vsub.f32 %v8904_v5, %v2719_v54  ;;  %v2993_v30 = vadd.f32 %v9138_v42, %v9136_v57 }
 0x385   : > { %6350 = vpow2.f32 %v2904_v39  ;;  %v2938_v7 = vpop.xlane.xlu0 %2937  ;;  %v3051_v35 = vmul.f32 %v6337_v43, %v8844_v34  ;;  %v3050_v2 = vmul.f32 %v6337_v43, %v8830_v59  ;;  %v9173_v39 = vadd.f32 %v10605_v45, %v3297_v56  ;;  %v10609_v56 = vld [vmem:[#allocation20_spill] sm:$0xff] }
 0x386   : > { %6352 = vpow2.f32 %v2906_v18  ;;  %v2908_v21 = vmul.f32 1.442695, %v2782_v32  ;;  %v2910_v58 = vmul.f32 1.442695, %v2783_v46  ;;  %2994 = vadd.xlane.f32.xlu1 %v2993_v30  ;;  %v3302_v30 = vld [vmem:[%s10361_s8 + $0x28] sm:$0xff] }
 0x387   : > { %v9148_v9 = vpop.eup %6338  ;;  %6354 = vrcp.f32 %v2938_v7  ;;  %v2941_v23 = vpop.xlane.xlu1 %2940  ;;  %v3109_v5 = vpack.c.bf16 %v3051_v35, %v3049_v19  ;;  %v3108_v55 = vpack.c.bf16 %v3050_v2, %v3048_v60  ;;  %v10606_v19 = vld [vmem:[#allocation17_spill] sm:$0xff]  ;;  %v3301_v7 = vld [vmem:[%s10361_s8 + $0x20] sm:$0xff] }
 0x388   : > { %v9150_v40 = vpop.eup %6340  ;;  %6356 = vpow2.f32 %v2908_v21  ;;  %v9178_v43 = vadd.f32 %v10606_v19, %v3298_v37  ;;  %v10607_v2 = vld [vmem:[#allocation18_spill] sm:$0xff] }
 0x389   : > { %v2996_v33 = vadd.f32 %v9150_v40, %v9148_v9  ;;  %v6343_v34 = vpop.eup %6342  ;;  %6358 = vpow2.f32 %v2910_v58  ;;  %3184 = vmatprep.mubr.bf16.mxu0 %v3109_v5  ;;  %v10608_v58 = vld [vmem:[#allocation19_spill] sm:$0xff]  ;;  %v3303_v5 = vld [vmem:[%s10361_s8 + $0x30] sm:$0xff] }
 0x38a   : > { %v9154_v14 = vpop.eup %6344  ;;  %6360 = vrcp.f32 %v2941_v23  ;;  %3185 = vmatmul.mubr.bf16.gmra.mrb[104].mxu0 %v3108_v55  ;;  %v3053_v4 = vmul.f32 %v6343_v34, %v8872_v29  ;;  %v3052_v20 = vmul.f32 %v6343_v34, %v8868_v12  ;;  %v3299_v12 = vld [vmem:[%s10361_s8 + $0x10] sm:$0xff] }
 0x38b   : > { %2997 = vadd.xlane.f32.xlu0 %v2996_v33  ;;  %v9156_v59 = vpop.eup %6346  ;;  %v9199_v21 = vadd.f32 %v10607_v2, %v3299_v12  ;;  %v3650_v33 = vmax.f32 %v9173_v39, %v9178_v43  ;;  %v10614_v2 = vld [vmem:[#allocation25_spill] sm:$0xff] }
 0x38c   : > { %v6349_v50 = vpop.eup %6348  ;;  %v2999_v6 = vadd.f32 %v9156_v59, %v9154_v14 }
 0x38d   : > { %v2944_v11 = vpop.xlane.xlu0 %2943  ;;  %v3055_v22 = vmul.f32 %v6349_v50, %v8896_v52  ;;  %v3054_v44 = vmul.f32 %v6349_v50, %v8882_v28  ;;  %v3300_v28 = vld [vmem:[%s10361_s8 + $0x18] sm:$0xff] }
 0x38e   : > { %6362 = vrcp.f32 %v2944_v11  ;;  %3000 = vadd.xlane.f32.xlu1 %v2999_v6  ;;  %v9202_v23 = vadd.f32 %v10608_v58, %v3300_v28  ;;  %v9210_v11 = vadd.f32 %v10609_v56, %v3301_v7  ;;  %v10610_v50 = vld [vmem:[#allocation21_spill] sm:$0xff]  ;;  %v10613_v7 = vld [vmem:[#allocation24_spill] sm:$0xff]  ;;  %v3310_v56 = vld [vmem:[%s10361_s8 + $0x68] sm:$0xff] }
 0x38f   : > { %v9170_v17 = vpop.eup %6350  ;;  %v2947_v18 = vpop.xlane.xlu1 %2946  ;;  %v3111_v29 = vpack.c.bf16 %v3055_v22, %v3053_v4  ;;  %v3110_v32 = vpack.c.bf16 %v3054_v44, %v3052_v20  ;;  %v9213_v37 = vadd.f32 %v10610_v50, %v3302_v30  ;;  %v3304_v6 = vld [vmem:[%s10361_s8 + $0x38] sm:$0xff] }
 0x390   : > { %v9175_v54 = vpop.eup %6352  ;;  %6364 = vrcp.f32 %v2947_v18  ;;  %v10611_v18 = vld [vmem:[#allocation22_spill] sm:$0xff] }
 0x391   : > { %v3002_v52 = vadd.f32 %v9175_v54, %v9170_v17  ;;  %v6355_v46 = vpop.eup %6354  ;;  %3192 = vmatprep.mubr.bf16.mxu0 %v3111_v29  ;;  %v9225_v19 = vadd.f32 %v10611_v18, %v3303_v5  ;;  %v3305_v29 = vld [vmem:[%s10361_s8 + $0x40] sm:$0xff]  ;;  %v3307_v5 = vld [vmem:[%s10361_s8 + $0x50] sm:$0xff] }
 0x392   : > { %v9194_v35 = vpop.eup %6356  ;;  %3193 = vmatmul.mubr.bf16.gmra.mrb[108].mxu0 %v3110_v32  ;;  %v3057_v22 = vmul.f32 %v6355_v46, %v8918_v26  ;;  %v3056_v44 = vmul.f32 %v6355_v46, %v8914_v24  ;;  %v3306_v32 = vld [vmem:[%s10361_s8 + $0x48] sm:$0xff]  ;;  %v9239_v30 = vadd.f32 %v10613_v7, %v3305_v29  ;;  %v3311_v29 = vld [vmem:[%s10361_s8 + $0x70] sm:$0xff] }
 0x393   : > { %3003 = vadd.xlane.f32.xlu0 %v3002_v52  ;;  %v9196_v60 = vpop.eup %6358  ;;  %v2950_v55 = vpop.xlane.xlu0 %2949  ;;  %v3653_v52 = vmax.f32 %v9199_v21, %v9202_v23  ;;  %v9242_v58 = vadd.f32 %v10614_v2, %v3306_v32 }
 0x394   : > { %v6361_v34 = vpop.eup %6360  ;;  %v3005_v4 = vadd.f32 %v9196_v60, %v9194_v35  ;;  %6366 = vrcp.f32 %v2950_v55  ;;  %v3308_v55 = vld [vmem:[%s10361_s8 + $0x58] sm:$0xff] }
 0x395   : > { %v3059_v20 = vmul.f32 %v6361_v34, %v8930_v36  ;;  %v3058_v45 = vmul.f32 %v6361_v34, %v8922_v31  ;;  %v10612_v36 = vld [vmem:[#allocation23_spill] sm:$0xff]  ;;  %v3309_v34 = vld [vmem:[%s10361_s8 + $0x60] sm:$0xff] }
 0x396   : > { %3006 = vadd.xlane.f32.xlu1 %v3005_v4  ;;  %v2953_v26 = vpop.xlane.xlu1 %2952  ;;  %v9234_v28 = vadd.f32 %v10612_v36, %v3304_v6  ;;  %v9279_v36 = vadd.f32 %v8694_v49, %v3310_v56  ;;  %v9291_v49 = vadd.f32 %v8696_v16, %v3311_v29  ;;  %v10618_v56 = vld [vmem:[#allocation29_spill] sm:$0xff]  ;;  %v3315_v16 = vld [vmem:[%s10361_s8 + $0x90] sm:$0xff] }
 0x397   : > { %3651 = vmax.xlane.f32.xlu0 %v3650_v33  ;;  %6368 = vrcp.f32 %v2953_v26  ;;  %v3113_v24 = vpack.c.bf16 %v3059_v20, %v3057_v22  ;;  %v3112_v31 = vpack.c.bf16 %v3058_v45, %v3056_v44  ;;  %v3656_v33 = vmax.f32 %v9210_v11, %v9213_v37  ;;  %v10615_v20 = vld [vmem:[#allocation26_spill] sm:$0xff]  ;;  %v10616_v45 = vld [vmem:[#allocation27_spill] sm:$0xff] }
 0x398   : > { %v6363_v12 = vpop.eup %6362  ;;  %v3659_v22 = vmax.f32 %v9225_v19, %v9234_v28  ;;  %v9263_v44 = vadd.f32 %v10615_v20, %v3307_v5  ;;  %v9266_v18 = vadd.f32 %v10616_v45, %v3308_v55  ;;  %v9276_v26 = vadd.f32 %v8692_v25, %v3309_v34 }
 0x399   : > { %3200 = vmatprep.mubr.bf16.mxu0 %v3113_v24  ;;  %v3061_v50 = vmul.f32 %v6363_v12, %v8944_v1  ;;  %v3312_v1 = vld [vmem:[%s10361_s8 + $0x78] sm:$0xff]  ;;  %v3662_v24 = vmax.f32 %v9239_v30, %v9242_v58  ;;  %v3060_v25 = vmul.f32 %v6363_v12, %v8940_v61  ;;  %v3317_v12 = vld [vmem:[%s10361_s8 + $0xa0] sm:$0xff] }
 0x39a   : > { %v6365_v46 = vpop.eup %6364  ;;  %3201 = vmatmul.mubr.bf16.gmra.mrb[112].mxu0 %v3112_v31  ;;  %3654 = vmax.xlane.f32.xlu1 %v3653_v52  ;;  %v3313_v31 = vld [vmem:[%s10361_s8 + $0x80] sm:$0xff]  ;;  %v3314_v52 = vld [vmem:[%s10361_s8 + $0x88] sm:$0xff]  ;;  %v9294_v7 = vadd.f32 %v8698_v48, %v3312_v1  ;;  %v3665_v5 = vmax.f32 %v9263_v44, %v9266_v18  ;;  %v3316_v48 = vld [vmem:[%s10361_s8 + $0x98] sm:$0xff]  ;;  %v3668_v61 = vmax.f32 %v9276_v26, %v9279_v36 }
 0x39b   : > { %v3063_v6 = vmul.f32 %v6365_v46, %v8954_v13  ;;  %3657 = vmax.xlane.f32.xlu0 %v3656_v33  ;;  %v2956_v4 = vpop.xlane.xlu0 %2955  ;;  %v3062_v32 = vmul.f32 %v6365_v46, %v8948_v51  ;;  %v10617_v33 = vld [vmem:[#allocation28_spill] sm:$0xff]  ;;  %v10621_v1 = vld [vmem:[#allocation30_spill] sm:$0xff] }
 0x39c   : > { %6370 = vrcp.f32 %v2956_v4  ;;  %v9299_v34 = vadd.f32 %v10617_v33, %v3313_v31  ;;  %v3671_v29 = vmax.f32 %v9291_v49, %v9294_v7  ;;  %v3319_v31 = vld [vmem:[%s10361_s8 + $0xb0] sm:$0xff]  ;;  %v10627_v33 = vld [vmem:[#allocation33_spill] sm:$0xff] }
 0x39d   : > { %v3115_v13 = vpack.c.bf16 %v3063_v6, %v3061_v50  ;;  %v3114_v2 = vpack.c.bf16 %v3062_v32, %v3060_v25  ;;  %v9302_v50 = vadd.f32 %v10618_v56, %v3314_v52  ;;  %v3318_v6 = vld [vmem:[%s10361_s8 + $0xa8] sm:$0xff] }
 0x39e   : > { %3660 = vmax.xlane.f32.xlu1 %v3659_v22  ;;  %v6367_v46 = vpop.eup %6366  ;;  %v10620_v22 = vld [vmem:[#allocation58_spill] sm:$0xff]  ;;  %v10622_v32 = vld [vmem:[#allocation31_spill] sm:$0xff]  ;;  %v9339_v56 = vadd.f32 %v10627_v33, %v3318_v6  ;;  %v10633_v33 = vld [vmem:[#allocation36_spill] sm:$0xff] }
 0x39f   : > { %v2959_v51 = vpop.xlane.xlu1 %2958  ;;  %3208 = vmatprep.mubr.bf16.mxu0 %v3115_v13  ;;  %3663 = vmax.xlane.f32.xlu0 %v3662_v24  ;;  %10619 = vst [vmem:[#allocation16_spill] sm:$0xff] %v9302_v50  ;;  %v3065_v4 = vmul.f32 %v6367_v46, %v8968_v10  ;;  %v9323_v13 = vadd.f32 %v10621_v1, %v3315_v16  ;;  %v3320_v10 = vld [vmem:[%s10361_s8 + $0xb8] sm:$0xff]  ;;  %v10630_v6 = vld [vmem:[#allocation34_spill] sm:$0xff] }
 0x3a0   : > { %6372 = vrcp.f32 %v2959_v51  ;;  %v9326_v24 = vadd.f32 %v10622_v32, %v3316_v48  ;;  %v10624_v51 = vld [vmem:[#allocation57_spill] sm:$0xff]  ;;  %10628 = vst [vmem:[#allocation19_spill] sm:$0xff] %v9339_v56  ;;  %v3674_v16 = vmax.f32 %v9299_v34, %v9302_v50  ;;  %v3321_v48 = vld [vmem:[%s10361_s8 + $0xc0] sm:$0xff] }
 0x3a1   : > { %v6369_v55 = vpop.eup %6368 }
 0x3a2   : > { %3209 = vmatmul.mubr.bf16.gmra.mrb[116].mxu0 %v3114_v2  ;;  %3666 = vmax.xlane.f32.xlu1 %v3665_v5  ;;  %v3067_v20 = vmul.f32 %v6369_v55, %v10620_v22  ;;  %10623 = vst [vmem:[#allocation17_spill] sm:$0xff] %v9326_v24  ;;  %v3066_v25 = vmul.f32 %v6369_v55, %v10624_v51  ;;  %v10625_v2 = vld [vmem:[#allocation32_spill] sm:$0xff] }
 0x3a3   : > { %3669 = vmax.xlane.f32.xlu0 %v3668_v61  ;;  %v9336_v5 = vadd.f32 %v10625_v2, %v3317_v12  ;;  %v3322_v61 = vld [vmem:[%s10361_s8 + $0xc8] sm:$0xff]  ;;  %v10629_v12 = vld [vmem:[#allocation54_spill] sm:$0xff]  ;;  %v3677_v51 = vmax.f32 %v9323_v13, %v9326_v24 }
 0x3a4   : > { %v2962_v45 = vpop.xlane.xlu0 %2961  ;;  %v3117_v52 = vpack.c.bf16 %v3067_v20, %v3065_v4  ;;  %v3064_v4 = vmul.f32 %v6367_v46, %v10629_v12  ;;  %v9351_v20 = vadd.f32 %v10630_v6, %v3319_v31  ;;  %v3323_v46 = vld [vmem:[%s10361_s8 + $0xd0] sm:$0xff]  ;;  %v3324_v31 = vld [vmem:[%s10361_s8 + $0xd8] sm:$0xff] }
 0x3a5   : > { %10626 = vst [vmem:[#allocation18_spill] sm:$0xff] %v9336_v5  ;;  %6374 = vrcp.f32 %v2962_v45  ;;  %v10631_v45 = vld [vmem:[#allocation35_spill] sm:$0xff] }
 0x3a6   : > { %3672 = vmax.xlane.f32.xlu1 %v3671_v29  ;;  %v2965_v55 = vpop.xlane.xlu1 %2964  ;;  %3216 = vmatprep.mubr.bf16.mxu0 %v3117_v52  ;;  %v6371_v22 = vpop.eup %6370  ;;  %v9354_v1 = vadd.f32 %v10631_v45, %v3320_v10  ;;  %v3116_v32 = vpack.c.bf16 %v3066_v25, %v3064_v4  ;;  %v9359_v29 = vadd.f32 %v10633_v33, %v3321_v48  ;;  %v10635_v52 = vld [vmem:[#allocation37_spill] sm:$0xff]  ;;  %v3325_v25 = vld [vmem:[%s10361_s8 + $0xe0] sm:$0xff] }
 0x3a7   : > { %6376 = vrcp.f32 %v2965_v55  ;;  %3675 = vmax.xlane.f32.xlu0 %v3674_v16  ;;  %v9362_v50 = vadd.f32 %v10635_v52, %v3322_v61  ;;  %v3680_v10 = vmax.f32 %v9336_v5, %v9339_v56  ;;  %v3326_v16 = vld [vmem:[%s10361_s8 + $0xe8] sm:$0xff]  ;;  %v10637_v48 = vld [vmem:[#allocation61_spill] sm:$0xff]  ;;  %v10638_v55 = vld [vmem:[#allocation10_spill] sm:$0xff] }
 0x3a8   : > { %10632 = vst [vmem:[#allocation20_spill] sm:$0xff] %v9354_v1  ;;  %10634 = vst [vmem:[#allocation21_spill] sm:$0xff] %v9359_v29  ;;  %v3069_v61 = vmul.f32 %v6371_v22, %v10637_v48  ;;  %v3683_v6 = vmax.f32 %v9351_v20, %v9354_v1  ;;  %v10639_v45 = vld [vmem:[#allocation38_spill] sm:$0xff]  ;;  %v10641_v52 = vld [vmem:[#allocation39_spill] sm:$0xff] }
 0x3a9   : > { %10636 = vst [vmem:[#allocation22_spill] sm:$0xff] %v9362_v50  ;;  %v9383_v33 = vadd.f32 %v10639_v45, %v3323_v46  ;;  %v9386_v56 = vadd.f32 %v10641_v52, %v3324_v31  ;;  %v10644_v5 = vld [vmem:[#allocation40_spill] sm:$0xff]  ;;  %v10646_v1 = vld [vmem:[#allocation41_spill] sm:$0xff]  ;;  %v3686_v31 = vmax.f32 %v9359_v29, %v9362_v50  ;;  %v3329_v45 = vld [vmem:[%s10361_s8 + $0x100] sm:$0xff] }
 0x3aa   : > { %v6373_v2 = vpop.eup %6372  ;;  %3217 = vmatmul.mubr.bf16.gmra.mrb[120].mxu0 %v3116_v32  ;;  %3678 = vmax.xlane.f32.xlu1 %v3677_v51  ;;  %v3327_v32 = vld [vmem:[%s10361_s8 + $0xf0] sm:$0xff]  ;;  %v3328_v51 = vld [vmem:[%s10361_s8 + $0xf8] sm:$0xff]  ;;  %v9396_v24 = vadd.f32 %v10644_v5, %v3325_v25  ;;  %v9399_v46 = vadd.f32 %v10646_v1, %v3326_v16  ;;  %v10648_v5 = vld [vmem:[#allocation59_spill] sm:$0xff] }
 0x3ab   : > { %v3071_v12 = vmul.f32 %v6373_v2, %v10638_v55  ;;  %3681 = vmax.xlane.f32.xlu0 %v3680_v10  ;;  %10640 = vst [vmem:[#allocation23_spill] sm:$0xff] %v9383_v33  ;;  %10642 = vst [vmem:[#allocation24_spill] sm:$0xff] %v9386_v56  ;;  %v10643_v10 = vld [vmem:[#allocation63_spill] sm:$0xff]  ;;  %v3068_v25 = vmul.f32 %v6371_v22, %v10648_v5  ;;  %v10649_v1 = vld [vmem:[#allocation42_spill] sm:$0xff] }
 0x3ac   : > { %v2968_v4 = vpop.xlane.xlu0 %2967  ;;  %v3070_v55 = vmul.f32 %v6373_v2, %v10643_v10  ;;  %10645 = vst [vmem:[#allocation25_spill] sm:$0xff] %v9396_v24  ;;  %10647 = vst [vmem:[#allocation26_spill] sm:$0xff] %v9399_v46  ;;  %v9411_v16 = vadd.f32 %v10649_v1, %v3327_v32  ;;  %v3331_v10 = vld [vmem:[%s10361_s8 + $0x110] sm:$0xff]  ;;  %v10655_v5 = vld [vmem:[#allocation45_spill] sm:$0xff] }
 0x3ad   : > { %v3119_v48 = vpack.c.bf16 %v3071_v12, %v3069_v61  ;;  %6378 = vrcp.f32 %v2968_v4  ;;  %v3330_v61 = vld [vmem:[%s10361_s8 + $0x108] sm:$0xff]  ;;  %v10653_v29 = vld [vmem:[#allocation44_spill] sm:$0xff]  ;;  %v10659_v1 = vld [vmem:[#allocation46_spill] sm:$0xff] }
 0x3ae   : > { %3684 = vmax.xlane.f32.xlu1 %v3683_v6  ;;  %v2971_v2 = vpop.xlane.xlu1 %2970  ;;  %10650 = vst [vmem:[#allocation27_spill] sm:$0xff] %v9411_v16  ;;  %v10651_v4 = vld [vmem:[#allocation43_spill] sm:$0xff]  ;;  %v3118_v50 = vpack.c.bf16 %v3070_v55, %v3068_v25  ;;  %v3689_v6 = vmax.f32 %v9383_v33, %v9386_v56  ;;  %v9422_v22 = vadd.f32 %v10653_v29, %v3329_v45  ;;  %v3333_v55 = vld [vmem:[%s10361_s8 + $0x120] sm:$0xff]  ;;  %v10657_v29 = vld [vmem:[#allocation65_spill] sm:$0xff] }
 0x3af   : > { %3224 = vmatprep.mubr.bf16.mxu0 %v3119_v48  ;;  %v6375_v12 = vpop.eup %6374  ;;  %v9414_v52 = vadd.f32 %v10651_v4, %v3328_v51  ;;  %6380 = vrcp.f32 %v2971_v2  ;;  %3687 = vmax.xlane.f32.xlu0 %v3686_v31  ;;  %v9425_v32 = vadd.f32 %v10655_v5, %v3330_v61  ;;  %v3332_v51 = vld [vmem:[%s10361_s8 + $0x118] sm:$0xff]  ;;  %v3692_v31 = vmax.f32 %v9396_v24, %v9399_v46  ;;  %v3334_v2 = vld [vmem:[%s10361_s8 + $0x128] sm:$0xff]  ;;  %v10658_v61 = vld [vmem:[#allocation4_spill] sm:$0xff] }
 0x3b0   : > { %10654 = vst [vmem:[#allocation29_spill] sm:$0xff] %v9422_v22  ;;  %v3073_v45 = vmul.f32 %v6375_v12, %v10657_v29  ;;  %v9441_v4 = vadd.f32 %v10659_v1, %v3331_v10  ;;  %v10660_v24 = vld [vmem:[#allocation47_spill] sm:$0xff]  ;;  %v10665_v33 = vld [vmem:[#allocation49_spill] sm:$0xff] }
 0x3b1   : > { %10652 = vst [vmem:[#allocation28_spill] sm:$0xff] %v9414_v52  ;;  %v6377_v48 = vpop.eup %6376  ;;  %10656 = vst [vmem:[#allocation58_spill] sm:$0xff] %v9425_v32  ;;  %v3695_v46 = vmax.f32 %v9411_v16, %v9414_v52  ;;  %v9446_v56 = vadd.f32 %v10660_v24, %v3332_v51  ;;  %v10662_v10 = vld [vmem:[#allocation67_spill] sm:$0xff]  ;;  %v9459_v52 = vadd.f32 %v10665_v33, %v3334_v2  ;;  %v3337_v16 = vld [vmem:[%s10361_s8 + $0x140] sm:$0xff] }
 0x3b2   : > { %3225 = vmatmul.mubr.bf16.gmra.mrb[124].mxu0 %v3118_v50  ;;  %3690 = vmax.xlane.f32.xlu1 %v3689_v6  ;;  %v3075_v25 = vmul.f32 %v6377_v48, %v10658_v61  ;;  %v3335_v50 = vld [vmem:[%s10361_s8 + $0x130] sm:$0xff]  ;;  %v3336_v6 = vld [vmem:[%s10361_s8 + $0x138] sm:$0xff]  ;;  %v3074_v61 = vmul.f32 %v6377_v48, %v10662_v10  ;;  %v3698_v51 = vmax.f32 %v9422_v22, %v9425_v32  ;;  %v10667_v48 = vld [vmem:[#allocation3_spill] sm:$0xff] }
 0x3b3   : > { %3693 = vmax.xlane.f32.xlu0 %v3692_v31  ;;  %10661 = vst [vmem:[#allocation30_spill] sm:$0xff] %v9446_v56  ;;  %v10663_v31 = vld [vmem:[#allocation48_spill] sm:$0xff]  ;;  %10666 = vst [vmem:[#allocation57_spill] sm:$0xff] %v9459_v52  ;;  %v10668_v33 = vld [vmem:[#allocation50_spill] sm:$0xff] }
 0x3b4   : > { %v3121_v29 = vpack.c.bf16 %v3075_v25, %v3073_v45  ;;  %v9456_v1 = vadd.f32 %v10663_v31, %v3333_v55  ;;  %v3338_v45 = vld [vmem:[%s10361_s8 + $0x148] sm:$0xff]  ;;  %v3072_v55 = vmul.f32 %v6375_v12, %v10667_v48  ;;  %v9471_v2 = vadd.f32 %v10668_v33, %v3335_v50  ;;  %v3339_v31 = vld [vmem:[%s10361_s8 + $0x150] sm:$0xff]  ;;  %v10671_v12 = vld [vmem:[#allocation53_spill] sm:$0xff] }
 0x3b5   : > { %v2974_v5 = vpop.xlane.xlu0 %2973  ;;  %v9485_v48 = vadd.f32 %v10671_v12, %v3338_v45  ;;  %v3340_v50 = vld [vmem:[%s10361_s8 + $0x158] sm:$0xff]  ;;  %v10674_v12 = vld [vmem:[#allocation56_spill] sm:$0xff] }
 0x3b6   : > { %6382 = vrcp.f32 %v2974_v5  ;;  %10664 = vst [vmem:[#allocation31_spill] sm:$0xff] %v9456_v1  ;;  %3696 = vmax.xlane.f32.xlu1 %v3695_v46  ;;  %3232 = vmatprep.mubr.bf16.mxu0 %v3121_v29  ;;  %v10669_v5 = vld [vmem:[#allocation51_spill] sm:$0xff]  ;;  %v3120_v32 = vpack.c.bf16 %v3074_v61, %v3072_v55  ;;  %v3701_v46 = vmax.f32 %v9441_v4, %v9446_v56  ;;  %v10670_v29 = vld [vmem:[#allocation52_spill] sm:$0xff]  ;;  %v3341_v61 = vld [vmem:[%s10361_s8 + $0x160] sm:$0xff] }
 0x3b7   : > { %v2977_v24 = vpop.xlane.xlu1 %2976  ;;  %v6379_v25 = vpop.eup %6378  ;;  %v9474_v10 = vadd.f32 %v10669_v5, %v3336_v6  ;;  %3699 = vmax.xlane.f32.xlu0 %v3698_v51  ;;  %v9482_v22 = vadd.f32 %v10670_v29, %v3337_v16  ;;  %10672 = vst [vmem:[#allocation32_spill] sm:$0xff] %v9485_v48  ;;  %v3704_v6 = vmax.f32 %v9456_v1, %v9459_v52  ;;  %v3342_v51 = vld [vmem:[%s10361_s8 + $0x168] sm:$0xff] }
 0x3b8   : > { %6384 = vrcp.f32 %v2977_v24  ;;  %v3077_v16 = vmul.f32 %v6379_v25, %v9040_v38  ;;  %v10673_v55 = vld [vmem:[#allocation55_spill] sm:$0xff]  ;;  %v9506_v52 = vadd.f32 %v10674_v12, %v3340_v50  ;;  %v10676_v38 = vld [vmem:[#allocation9_spill] sm:$0xff] }
 0x3b9   : > { %v6381_v24 = vpop.eup %6380  ;;  %v9501_v33 = vadd.f32 %v10673_v55, %v3339_v31  ;;  %v3707_v29 = vmax.f32 %v9471_v2, %v9474_v10  ;;  %v3343_v31 = vld [vmem:[%s10361_s8 + $0x170] sm:$0xff] }
 0x3ba   : > { %3233 = vmatmul.mubr.bf16.gmra.mrb[128].mxu0 %v3120_v32  ;;  %3702 = vmax.xlane.f32.xlu1 %v3701_v46  ;;  %v3079_v45 = vmul.f32 %v6381_v24, %v9050_v53  ;;  %v3078_v32 = vmul.f32 %v6381_v24, %v9044_v15  ;;  %v10675_v46 = vld [vmem:[#allocation8_spill] sm:$0xff]  ;;  %v9513_v53 = vadd.f32 %v10676_v38, %v3342_v51  ;;  %v10678_v15 = vld [vmem:[#allocation7_spill] sm:$0xff] }
 0x3bb   : > { %3705 = vmax.xlane.f32.xlu0 %v3704_v6  ;;  %v9510_v56 = vadd.f32 %v10675_v46, %v3341_v61  ;;  %v3344_v6 = vld [vmem:[%s10361_s8 + $0x178] sm:$0xff]  ;;  %v3076_v24 = vmul.f32 %v6379_v25, %v10678_v15  ;;  %v10679_v51 = vld [vmem:[#allocation60_spill] sm:$0xff]  ;;  %v3713_v38 = vmax.f32 %v9501_v33, %v9506_v52 }
 0x3bc   : > { %v3123_v1 = vpack.c.bf16 %v3079_v45, %v3077_v16  ;;  %10677 = vst [vmem:[#allocation33_spill] sm:$0xff] %v9513_v53  ;;  %v3710_v16 = vmax.f32 %v9482_v22, %v9485_v48  ;;  %v9525_v55 = vadd.f32 %v10679_v51, %v3343_v31 }
 0x3bd   : > { %v2980_v5 = vpop.xlane.xlu0 %2979  ;;  %v3122_v46 = vpack.c.bf16 %v3078_v32, %v3076_v24  ;;  %v3716_v48 = vmax.f32 %v9510_v56, %v9513_v53  ;;  %v10685_v53 = vld [vmem:[#allocation79_spill] sm:$0xff] }
 0x3be   : > { %6386 = vrcp.f32 %v2980_v5  ;;  %3708 = vmax.xlane.f32.xlu1 %v3707_v29  ;;  %3240 = vmatprep.mubr.bf16.mxu0 %v3123_v1  ;;  %v10680_v5 = vld [vmem:[#allocation62_spill] sm:$0xff] }
 0x3bf   : > { %v2983_v50 = vpop.xlane.xlu1 %2982  ;;  %3711 = vmax.xlane.f32.xlu0 %v3710_v16  ;;  %v9528_v12 = vadd.f32 %v10680_v5, %v3344_v6  ;;  %v10682_v6 = vld [vmem:[#allocation71_spill] sm:$0xff]  ;;  %v10683_v16 = vld [vmem:[#allocation14_spill] sm:$0xff]  ;;  %v10684_v5 = vld [vmem:[#allocation76_spill] sm:$0xff] }
 0x3c0   : > { %v6383_v45 = vpop.eup %6382  ;;  %6388 = vrcp.f32 %v2983_v50 }
 0x3c1   : > { %10681 = vst [vmem:[#allocation54_spill] sm:$0xff] %v9528_v12  ;;  %v3081_v29 = vmul.f32 %v6383_v45, %v9064_v27  ;;  %v3719_v31 = vmax.f32 %v9525_v55, %v9528_v12  ;;  %v3080_v15 = vmul.f32 %v6383_v45, %v10683_v16 }
 0x3c2   : > { %v6385_v61 = vpop.eup %6384  ;;  %3241 = vmatmul.mubr.bf16.gmra.mrb[132].mxu0 %v3122_v46  ;;  %3714 = vmax.xlane.f32.xlu1 %v3713_v38 }
 0x3c3   : > { %v3083_v1 = vmul.f32 %v6385_v61, %v9072_v62  ;;  %3717 = vmax.xlane.f32.xlu0 %v3716_v48  ;;  %v3082_v50 = vmul.f32 %v6385_v61, %v10682_v6  ;;  %v10686_v48 = vld [vmem:[#allocation78_spill] sm:$0xff] }
 0x3c5   : > { %v3125_v25 = vpack.c.bf16 %v3083_v1, %v3081_v29  ;;  %v3124_v51 = vpack.c.bf16 %v3082_v50, %v3080_v15  ;;  %v10687_v29 = vld [vmem:[#allocation74_spill] sm:$0xff] }
 0x3c6   : > { %3720 = vmax.xlane.f32.xlu1 %v3719_v31 }
 0x3c7   : > { %3248 = vmatprep.mubr.bf16.mxu0 %v3125_v25 }
 0x3c8   : > { %v6387_v32 = vpop.eup %6386 }
 0x3c9   : > { %v3085_v27 = vmul.f32 %v6387_v32, %v10684_v5  ;;  %v3084_v1 = vmul.f32 %v6387_v32, %v10687_v29 }
 0x3ca   : > { %v6389_v24 = vpop.eup %6388  ;;  %3249 = vmatmul.mubr.bf16.gmra.mrb[136].mxu0 %v3124_v51 }
 0x3cb   : > { %v3087_v62 = vmul.f32 %v6389_v24, %v10685_v53  ;;  %v3086_v38 = vmul.f32 %v6389_v24, %v10686_v48 }
 0x3cd   : > { %v3127_v46 = vpack.c.bf16 %v3087_v62, %v3085_v27  ;;  %v3126_v12 = vpack.c.bf16 %v3086_v38, %v3084_v1 }
 0x3cf   : > { %3256 = vmatprep.mubr.bf16.mxu0 %v3127_v46 }
 0x3d2   : > { %3257 = vmatmul.mubr.bf16.gmra.mrb[140].mxu0 %v3126_v12 }
 0x407   : > { %v2986_v61 = vpop.xlane.xlu0 %2985 }
 0x408   : > { %6390 = vrcp.f32 %v2986_v61 }
 0x40b   : > { %v2989_v25 = vpop.xlane.xlu1 %2988 }
 0x40c   : > { %6392 = vrcp.f32 %v2989_v25 }
 0x40f   : > { %v2992_v45 = vpop.xlane.xlu0 %2991 }
 0x410   : > { %6394 = vrcp.f32 %v2992_v45 }
 0x412   : > { %v6391_v6 = vpop.eup %6390 }
 0x413   : > { %v2995_v31 = vpop.xlane.xlu1 %2994  ;;  %v3089_v16 = vmul.f32 %v6391_v6, %v9110_v63  ;;  %v3088_v24 = vmul.f32 %v6391_v6, %v9108_v0 }
 0x414   : > { %6396 = vrcp.f32 %v2995_v31 }
 0x416   : > { %v6393_v50 = vpop.eup %6392 }
 0x417   : > { %v3091_v15 = vmul.f32 %v6393_v50, %v9118_v3  ;;  %v3090_v32 = vmul.f32 %v6393_v50, %v9116_v8 }
 0x418   : > { %v2998_v53 = vpop.xlane.xlu0 %2997 }
 0x419   : > { %v3129_v12 = vpack.c.bf16 %v3091_v15, %v3089_v16  ;;  %v3128_v51 = vpack.c.bf16 %v3090_v32, %v3088_v24  ;;  %6398 = vrcp.f32 %v2998_v53 }
 0x41a   : > { %v6395_v27 = vpop.eup %6394 }
 0x41b   : > { %v3001_v5 = vpop.xlane.xlu1 %3000  ;;  %3264 = vmatprep.mubr.bf16.mxu0 %v3129_v12  ;;  %v3093_v48 = vmul.f32 %v6395_v27, %v9130_v41  ;;  %v3092_v3 = vmul.f32 %v6395_v27, %v9128_v47 }
 0x41c   : > { %6400 = vrcp.f32 %v3001_v5  ;;  %3265 = vmatmul.mubr.bf16.gmra.mrb[144].mxu0 %v3128_v51 }
 0x41e   : > { %v6397_v62 = vpop.eup %6396 }
 0x41f   : > { %v3095_v63 = vmul.f32 %v6397_v62, %v9138_v42  ;;  %v3094_v0 = vmul.f32 %v6397_v62, %v9136_v57 }
 0x420   : > { %v3004_v46 = vpop.xlane.xlu0 %3003 }
 0x421   : > { %6402 = vrcp.f32 %v3004_v46  ;;  %v3131_v8 = vpack.c.bf16 %v3095_v63, %v3093_v48  ;;  %v3130_v38 = vpack.c.bf16 %v3094_v0, %v3092_v3 }
 0x423   : > { %v3007_v29 = vpop.xlane.xlu1 %3006  ;;  %3272 = vmatprep.mubr.bf16.mxu0 %v3131_v8  ;;  %v6399_v61 = vpop.eup %6398 }
 0x424   : > { %v3652_v1 = vpop.xlane.xlu0 %3651  ;;  %6404 = vrcp.f32 %v3007_v29  ;;  %3273 = vmatmul.mubr.bf16.gmra.mrb[148].mxu0 %v3130_v38  ;;  %v3097_v47 = vmul.f32 %v6399_v61, %v9150_v40  ;;  %v3345_v38 = vld [vmem:[%s10361_s8 + $0x180] sm:$0xff] }
 0x425   : > { %v3746_v25 = vsub.f32 %v9173_v39, %v3652_v1  ;;  %v3747_v45 = vsub.f32 %v9178_v43, %v3652_v1  ;;  %v3096_v39 = vmul.f32 %v6399_v61, %v9148_v9 }
 0x426   : > { %v6401_v41 = vpop.eup %6400 }
 0x427   : > { %v3810_v31 = vmul.f32 1.442695, %v3746_v25  ;;  %v3812_v42 = vmul.f32 1.442695, %v3747_v45  ;;  %v3655_v6 = vpop.xlane.xlu1 %3654  ;;  %v3099_v57 = vmul.f32 %v6401_v41, %v9156_v59  ;;  %v3098_v50 = vmul.f32 %v6401_v41, %v9154_v14  ;;  %v10688_v45 = vld [vmem:[#allocation11_spill] sm:$0xff] }
 0x428   : > { %v3748_v53 = vsub.f32 %v9199_v21, %v3655_v6  ;;  %v3749_v16 = vsub.f32 %v9202_v23, %v3655_v6  ;;  %v3658_v15 = vpop.xlane.xlu0 %3657  ;;  %v9583_v41 = vadd.f32 %v10688_v45, %v3345_v38  ;;  %v10694_v38 = vld [vmem:[#allocation68_spill] sm:$0xff] }
 0x429   : > { %6406 = vpow2.f32 %v3810_v31  ;;  %v3750_v43 = vsub.f32 %v9210_v11, %v3658_v15  ;;  %v3751_v24 = vsub.f32 %v9213_v37, %v3658_v15  ;;  %v3133_v32 = vpack.c.bf16 %v3099_v57, %v3097_v47  ;;  %v10689_v31 = vld [vmem:[#allocation2_spill] sm:$0xff]  ;;  %v3347_v47 = vld [vmem:[%s10361_s8 + $0x190] sm:$0xff] }
 0x42a   : > { %6408 = vpow2.f32 %v3812_v42  ;;  %v3814_v12 = vmul.f32 1.442695, %v3748_v53  ;;  %v3816_v40 = vmul.f32 1.442695, %v3749_v16  ;;  %v3132_v51 = vpack.c.bf16 %v3098_v50, %v3096_v39  ;;  %v10696_v45 = vld [vmem:[#allocation16_spill] sm:$0xff] }
 0x42b   : > { %v6403_v59 = vpop.eup %6402  ;;  %v3818_v5 = vmul.f32 1.442695, %v3750_v43  ;;  %v3820_v14 = vmul.f32 1.442695, %v3751_v24  ;;  %v3661_v27 = vpop.xlane.xlu1 %3660  ;;  %3280 = vmatprep.mubr.bf16.mxu0 %v3133_v32  ;;  %v10690_v32 = vld [vmem:[#allocation64_spill] sm:$0xff] }
 0x42c   : > { %6410 = vpow2.f32 %v3814_v12  ;;  %v3752_v21 = vsub.f32 %v9225_v19, %v3661_v27  ;;  %v3753_v23 = vsub.f32 %v9234_v28, %v3661_v27  ;;  %v3664_v9 = vpop.xlane.xlu0 %3663  ;;  %3281 = vmatmul.mubr.bf16.gmra.mrb[152].mxu0 %v3132_v51  ;;  %v3101_v46 = vmul.f32 %v6403_v59, %v9175_v54  ;;  %v3346_v54 = vld [vmem:[%s10361_s8 + $0x188] sm:$0xff] }
 0x42d   : > { %6412 = vpow2.f32 %v3816_v40  ;;  %v3754_v62 = vsub.f32 %v9239_v30, %v3664_v9  ;;  %v3755_v63 = vsub.f32 %v9242_v58, %v3664_v9  ;;  %v3100_v28 = vmul.f32 %v6403_v59, %v9170_v17  ;;  %v10691_v40 = vld [vmem:[#allocation66_spill] sm:$0xff]  ;;  %v3350_v27 = vld [vmem:[%s10361_s8 + $0x1a8] sm:$0xff]  ;;  %v3351_v9 = vld [vmem:[%s10361_s8 + $0x1b0] sm:$0xff] }
 0x42e   : > { %v6405_v11 = vpop.eup %6404  ;;  %6414 = vpow2.f32 %v3818_v5  ;;  %v3822_v37 = vmul.f32 1.442695, %v3752_v21  ;;  %v3824_v48 = vmul.f32 1.442695, %v3753_v23  ;;  %v9586_v42 = vadd.f32 %v10689_v31, %v3346_v54 }
 0x42f   : > { %6416 = vpow2.f32 %v3820_v14  ;;  %v3667_v3 = vpop.xlane.xlu1 %3666  ;;  %v3103_v0 = vmul.f32 %v6405_v11, %v9196_v60  ;;  %v3102_v8 = vmul.f32 %v6405_v11, %v9194_v35  ;;  %v3826_v58 = vmul.f32 1.442695, %v3754_v62 }
 0x430   : > { %v3670_v19 = vpop.xlane.xlu0 %3669  ;;  %6418 = vpow2.f32 %v3822_v37  ;;  %v3756_v60 = vsub.f32 %v9263_v44, %v3667_v3  ;;  %v3828_v17 = vmul.f32 1.442695, %v3755_v63  ;;  %v3757_v35 = vsub.f32 %v9266_v18, %v3667_v3  ;;  %v3348_v18 = vld [vmem:[%s10361_s8 + $0x198] sm:$0xff]  ;;  %v10693_v3 = vld [vmem:[#allocation6_spill] sm:$0xff] }
 0x431   : > { %v3135_v30 = vpack.c.bf16 %v3103_v0, %v3101_v46  ;;  %v3134_v1 = vpack.c.bf16 %v3102_v8, %v3100_v28  ;;  %6420 = vpow2.f32 %v3824_v48  ;;  %v3758_v53 = vsub.f32 %v9276_v26, %v3670_v19  ;;  %v10692_v48 = vld [vmem:[#allocation5_spill] sm:$0xff] }
 0x432   : > { %6422 = vpow2.f32 %v3826_v58  ;;  %v3830_v50 = vmul.f32 1.442695, %v3756_v60  ;;  %v3832_v15 = vmul.f32 1.442695, %v3757_v35  ;;  %v3759_v39 = vsub.f32 %v9279_v36, %v3670_v19  ;;  %v3349_v36 = vld [vmem:[%s10361_s8 + $0x1a0] sm:$0xff]  ;;  %v3354_v58 = vld [vmem:[%s10361_s8 + $0x1c8] sm:$0xff] }
 0x433   : > { %v9576_v29 = vpop.eup %6406  ;;  %v3673_v25 = vpop.xlane.xlu1 %3672  ;;  %3288 = vmatprep.mubr.bf16.mxu0 %v3135_v30  ;;  %6424 = vpow2.f32 %v3828_v17  ;;  %v9609_v12 = vadd.f32 %v10690_v32, %v3347_v47  ;;  %v9612_v51 = vadd.f32 %v10691_v40, %v3348_v18  ;;  %v3722_v5 = vmax.f32 %v9583_v41, %v9586_v42  ;;  %v3353_v30 = vld [vmem:[%s10361_s8 + $0x1c0] sm:$0xff]  ;;  %v10695_v17 = vld [vmem:[#allocation69_spill] sm:$0xff] }
 0x434   : > { %v9579_v61 = vpop.eup %6408  ;;  %v9588_v6 = vpop.xlane.xlu0 %3675  ;;  %3289 = vmatmul.mubr.bf16.gmra.mrb[156].mxu0 %v3134_v1  ;;  %6426 = vpow2.f32 %v3830_v50  ;;  %v3834_v21 = vmul.f32 1.442695, %v3758_v53  ;;  %v3760_v23 = vsub.f32 %v9291_v49, %v3673_v25  ;;  %v3836_v11 = vmul.f32 1.442695, %v3759_v39  ;;  %v3352_v49 = vld [vmem:[%s10361_s8 + $0x1b8] sm:$0xff]  ;;  %v10699_v39 = vld [vmem:[#allocation12_spill] sm:$0xff] }
 0x435   : > { %v3938_v44 = vadd.f32 %v9579_v61, %v9576_v29  ;;  %6428 = vpow2.f32 %v3832_v15  ;;  %v3761_v37 = vsub.f32 %v9294_v7, %v3673_v25  ;;  %v9638_v63 = vadd.f32 %v10692_v48, %v3349_v36  ;;  %v3356_v36 = vld [vmem:[%s10361_s8 + $0x1d8] sm:$0xff] }
 0x436   : > { %v9598_v57 = vpop.eup %6410  ;;  %v9641_v0 = vadd.f32 %v10693_v3, %v3350_v27  ;;  %v3725_v28 = vmax.f32 %v9609_v12, %v9612_v51  ;;  %v9655_v54 = vadd.f32 %v10694_v38, %v3351_v9  ;;  %6430 = vpow2.f32 %v3834_v21  ;;  %v10702_v21 = vld [vmem:[#allocation18_spill] sm:$0xff]  ;;  %v3358_v38 = vld [vmem:[%s10361_s8 + $0x1e8] sm:$0xff] }
 0x437   : > { %3939 = vadd.xlane.f32.xlu0 %v3938_v44  ;;  %v9601_v16 = vpop.eup %6412  ;;  %v9604_v43 = vpop.xlane.xlu1 %3678  ;;  %v3838_v60 = vmul.f32 1.442695, %v3760_v23  ;;  %v3762_v1 = vsub.f32 %v9299_v34, %v9588_v6  ;;  %v9666_v35 = vadd.f32 %v10695_v17, %v3352_v49  ;;  %6432 = vpow2.f32 %v3836_v11  ;;  %v3357_v9 = vld [vmem:[%s10361_s8 + $0x1e0] sm:$0xff] }
 0x438   : > { %v9606_v24 = vpop.eup %6414  ;;  %v9614_v59 = vpop.xlane.xlu0 %3681  ;;  %v3941_v26 = vadd.f32 %v9601_v16, %v9598_v57  ;;  %v3840_v25 = vmul.f32 1.442695, %v3761_v37  ;;  %v3763_v31 = vsub.f32 %v10696_v45, %v9588_v6  ;;  %v3764_v18 = vsub.f32 %v9323_v13, %v9604_v43  ;;  %v10700_v6 = vld [vmem:[#allocation13_spill] sm:$0xff]  ;;  %v3355_v13 = vld [vmem:[%s10361_s8 + $0x1d0] sm:$0xff]  ;;  %v10703_v37 = vld [vmem:[#allocation19_spill] sm:$0xff] }
 0x439   : > { %v9620_v14 = vpop.eup %6416  ;;  %v3728_v53 = vmax.f32 %v9638_v63, %v9641_v0  ;;  %v9685_v32 = vadd.f32 %v10699_v39, %v3353_v30  ;;  %v9688_v40 = vadd.f32 %v10700_v6, %v3354_v58  ;;  %6434 = vpow2.f32 %v3838_v60  ;;  %v10706_v17 = vld [vmem:[#allocation70_spill] sm:$0xff]  ;;  %v10709_v6 = vld [vmem:[#allocation21_spill] sm:$0xff] }
 0x43a   : > { %3942 = vadd.xlane.f32.xlu1 %v3941_v26  ;;  %v9635_v46 = vpop.eup %6418  ;;  %v3944_v7 = vadd.f32 %v9620_v14, %v9606_v24  ;;  %v10701_v26 = vld [vmem:[#allocation17_spill] sm:$0xff]  ;;  %v3842_v27 = vmul.f32 1.442695, %v3762_v1  ;;  %v3766_v23 = vsub.f32 %v10702_v21, %v9614_v59  ;;  %6436 = vpow2.f32 %v3840_v25 }
 0x43b   : > { %3723 = vmax.xlane.f32.xlu0 %v3722_v5  ;;  %v9633_v62 = vpop.xlane.xlu1 %3684  ;;  %v9652_v8 = vpop.eup %6420  ;;  %v3765_v5 = vsub.f32 %v10701_v26, %v9604_v43  ;;  %v3844_v11 = vmul.f32 1.442695, %v3763_v31  ;;  %v3767_v43 = vsub.f32 %v10703_v37, %v9614_v59  ;;  %v3731_v3 = vmax.f32 %v9655_v54, %v9666_v35  ;;  %v10707_v31 = vld [vmem:[#allocation20_spill] sm:$0xff]  ;;  %v10710_v26 = vld [vmem:[#allocation73_spill] sm:$0xff] }
 0x43c   : > { %v9646_v19 = vpop.xlane.xlu0 %3687  ;;  %v9672_v47 = vpop.eup %6422  ;;  %v3947_v34 = vadd.f32 %v9652_v8, %v9635_v46  ;;  %v3846_v30 = vmul.f32 1.442695, %v3764_v18  ;;  %v3768_v58 = vsub.f32 %v9351_v20, %v9633_v62  ;;  %v3734_v1 = vmax.f32 %v9685_v32, %v9688_v40  ;;  %v10708_v18 = vld [vmem:[#allocation72_spill] sm:$0xff] }
 0x43d   : > { %10697 = vst [vmem:[#allocation34_spill] sm:$0xff] %v9672_v47  ;;  %v9682_v15 = vpop.eup %6424  ;;  %v9726_v25 = vadd.f32 %v10706_v17, %v3356_v36  ;;  %v3848_v45 = vmul.f32 1.442695, %v3765_v5  ;;  %v9733_v39 = vadd.f32 %v10708_v18, %v3357_v9  ;;  %6438 = vpow2.f32 %v3842_v27  ;;  %v3359_v5 = vld [vmem:[%s10361_s8 + $0x1f0] sm:$0xff]  ;;  %v10711_v36 = vld [vmem:[#allocation22_spill] sm:$0xff]  ;;  %v10717_v18 = vld [vmem:[#allocation25_spill] sm:$0xff] }
 0x43e   : > { %3726 = vmax.xlane.f32.xlu1 %v3725_v28  ;;  %10698 = vst [vmem:[#allocation35_spill] sm:$0xff] %v9682_v15  ;;  %v9709_v49 = vpop.eup %6426  ;;  %v10705_v28 = vld [vmem:[#allocation15_spill] sm:$0xff]  ;;  %v3950_v59 = vadd.f32 %v9682_v15, %v9672_v47  ;;  %v3850_v20 = vmul.f32 1.442695, %v3766_v23  ;;  %v9738_v21 = vadd.f32 %v10710_v26, %v3358_v38  ;;  %6440 = vpow2.f32 %v3844_v11 }
 0x43f   : > { %3945 = vadd.xlane.f32.xlu0 %v3944_v7  ;;  %v9670_v44 = vpop.xlane.xlu1 %3690  ;;  %10704 = vst [vmem:[#allocation36_spill] sm:$0xff] %v9709_v49  ;;  %v9712_v7 = vadd.f32 %v10705_v28, %v3355_v13  ;;  %v9721_v60 = vpop.eup %6428  ;;  %v3770_v13 = vsub.f32 %v10709_v6, %v9646_v19  ;;  %v3771_v9 = vsub.f32 %v10711_v36, %v9646_v19  ;;  %6442 = vpow2.f32 %v3846_v30  ;;  %v10713_v23 = vld [vmem:[#allocation23_spill] sm:$0xff] }
 0x440   : > { %v9676_v50 = vpop.xlane.xlu0 %3693  ;;  %v9745_v37 = vpop.eup %6430  ;;  %v3854_v27 = vmul.f32 1.442695, %v3768_v58  ;;  %v3953_v28 = vadd.f32 %v9721_v60, %v9709_v49  ;;  %6444 = vpow2.f32 %v3848_v45  ;;  %v10716_v30 = vld [vmem:[#allocation75_spill] sm:$0xff]  ;;  %v3740_v26 = vmax.f32 %v9733_v39, %v9738_v21  ;;  %v3360_v45 = vld [vmem:[%s10361_s8 + $0x1f8] sm:$0xff] }
 0x441   : > { %10712 = vst [vmem:[#allocation37_spill] sm:$0xff] %v9745_v37  ;;  %v9751_v38 = vpop.eup %6432  ;;  %v9760_v58 = vadd.f32 %v10716_v30, %v3359_v5  ;;  %6446 = vpow2.f32 %v3850_v20  ;;  %v3774_v6 = vsub.f32 %v10717_v18, %v9676_v50  ;;  %v10721_v49 = vld [vmem:[#allocation77_spill] sm:$0xff] }
 0x442   : > { %3948 = vadd.xlane.f32.xlu1 %v3947_v34  ;;  %v3769_v34 = vsub.f32 %v10707_v31, %v9633_v62  ;;  %v3852_v62 = vmul.f32 1.442695, %v3767_v43  ;;  %10714 = vst [vmem:[#allocation61_spill] sm:$0xff] %v9751_v38  ;;  %v10715_v43 = vld [vmem:[#allocation24_spill] sm:$0xff]  ;;  %v3858_v31 = vmul.f32 1.442695, %v3770_v13  ;;  %v3956_v30 = vadd.f32 %v9751_v38, %v9745_v37 }
 0x443   : > { %3729 = vmax.xlane.f32.xlu0 %v3728_v53  ;;  %v9705_v48 = vpop.xlane.xlu1 %3696  ;;  %v3773_v19 = vsub.f32 %v10715_v43, %v9670_v44  ;;  %v9773_v13 = vpop.eup %6434 }
 0x444   : > { %v9730_v53 = vpop.xlane.xlu0 %3699  ;;  %v3856_v11 = vmul.f32 1.442695, %v3769_v34  ;;  %6448 = vpow2.f32 %v3852_v62  ;;  %v10718_v34 = vld [vmem:[#allocation26_spill] sm:$0xff]  ;;  %v9779_v18 = vpop.eup %6436 }
 0x445   : > { %v3775_v5 = vsub.f32 %v10718_v34, %v9676_v50  ;;  %6450 = vpow2.f32 %v3854_v27  ;;  %v3864_v62 = vmul.f32 1.442695, %v3773_v19  ;;  %v10720_v50 = vld [vmem:[#allocation28_spill] sm:$0xff]  ;;  %v9786_v27 = vadd.f32 %v10721_v49, %v3360_v45  ;;  %v10723_v19 = vld [vmem:[#allocation58_spill] sm:$0xff] }
 0x446   : > { %3732 = vmax.xlane.f32.xlu1 %v3731_v3  ;;  %v3772_v3 = vsub.f32 %v10713_v23, %v9670_v44  ;;  %v3860_v44 = vmul.f32 1.442695, %v3771_v9  ;;  %6452 = vpow2.f32 %v3856_v11  ;;  %v3777_v9 = vsub.f32 %v10720_v50, %v9705_v48  ;;  %v10728_v50 = vld [vmem:[#allocation57_spill] sm:$0xff] }
 0x447   : > { %3951 = vadd.xlane.f32.xlu0 %v3950_v59  ;;  %v3737_v59 = vmax.f32 %v9712_v7, %v9726_v25  ;;  %v9757_v17 = vpop.xlane.xlu1 %3702  ;;  %6454 = vpow2.f32 %v3858_v31  ;;  %v3868_v11 = vmul.f32 1.442695, %v3775_v5  ;;  %v3779_v38 = vsub.f32 %v10723_v19, %v9730_v53 }
 0x448   : > { %v9771_v36 = vpop.xlane.xlu0 %3705  ;;  %v3862_v23 = vmul.f32 1.442695, %v3772_v3  ;;  %v3866_v3 = vmul.f32 1.442695, %v3774_v6  ;;  %6456 = vpow2.f32 %v3860_v44  ;;  %v3780_v31 = vsub.f32 %v9441_v4, %v9757_v17  ;;  %v10725_v44 = vld [vmem:[#allocation30_spill] sm:$0xff]  ;;  %v10727_v4 = vld [vmem:[#allocation31_spill] sm:$0xff] }
 0x449   : > { %v3872_v45 = vmul.f32 1.442695, %v3777_v9  ;;  %v3783_v9 = vsub.f32 %v10728_v50, %v9771_v36 }
 0x44a   : > { %3954 = vadd.xlane.f32.xlu1 %v3953_v28  ;;  %6458 = vpow2.f32 %v3862_v23 }
 0x44b   : > { %3735 = vmax.xlane.f32.xlu0 %v3734_v1  ;;  %v5444_v20 = vpop.f32.mrb[96].mxu0  ;;  %v10719_v1 = vld [vmem:[#allocation27_spill] sm:$0xff]  ;;  %6460 = vpow2.f32 %v3864_v62  ;;  %v3743_v62 = vmax.f32 %v9760_v58, %v9786_v27 }
 0x44c   : > { %v3776_v28 = vsub.f32 %v10719_v1, %v9705_v48  ;;  %v5445_v43 = vpop.f32.mrb[97].mxu0  ;;  %v10722_v1 = vld [vmem:[#allocation29_spill] sm:$0xff]  ;;  %v3709_v48 = vpop.xlane.xlu1 %3708  ;;  %6462 = vpow2.f32 %v3866_v3  ;;  %v3878_v3 = vmul.f32 1.442695, %v3780_v31 }
 0x44d   : > { %v9783_v34 = vadd.f32 %v5445_v43, %v5444_v20  ;;  %v5447_v47 = vpop.f32.mrb[98].mxu0  ;;  %v3778_v15 = vsub.f32 %v10722_v1, %v9730_v53  ;;  %v9794_v43 = vpop.eup %6438  ;;  %v3781_v53 = vsub.f32 %v10725_v44, %v9757_v17  ;;  %6464 = vpow2.f32 %v3868_v11 }
 0x44e   : > { %3738 = vmax.xlane.f32.xlu1 %v3737_v59  ;;  %v5448_v37 = vpop.f32.mrb[99].mxu0  ;;  %10724 = vst [vmem:[#allocation10_spill] sm:$0xff] %v9794_v43  ;;  %v3870_v49 = vmul.f32 1.442695, %v3776_v28  ;;  %v3959_v59 = vadd.f32 %v9779_v18, %v9773_v13  ;;  %v9800_v6 = vpop.eup %6440  ;;  %v3782_v28 = vsub.f32 %v10727_v4, %v9771_v36  ;;  %v3876_v17 = vmul.f32 1.442695, %v3779_v38 }
 0x44f   : > { %3957 = vadd.xlane.f32.xlu0 %v3956_v30  ;;  %v9792_v20 = vadd.f32 %v5448_v37, %v5447_v47  ;;  %v3712_v5 = vpop.xlane.xlu0 %3711  ;;  %v9806_v37 = vpop.eup %6442  ;;  %v3874_v23 = vmul.f32 1.442695, %v3778_v15  ;;  %v3784_v15 = vsub.f32 %v9471_v2, %v3709_v48  ;;  %v3962_v19 = vadd.f32 %v9800_v6, %v9794_v43 }
 0x450   : > { %10726 = vst [vmem:[#allocation38_spill] sm:$0xff] %v9806_v37  ;;  %v9810_v30 = vpop.eup %6444  ;;  %6466 = vpow2.f32 %v3870_v49  ;;  %v3785_v44 = vsub.f32 %v9474_v10, %v3709_v48  ;;  %v3715_v11 = vpop.xlane.xlu1 %3714  ;;  %v3882_v36 = vmul.f32 1.442695, %v3782_v28  ;;  %v3786_v49 = vsub.f32 %v9482_v22, %v3712_v5 }
 0x451   : > { %v9816_v1 = vpop.eup %6446  ;;  %6468 = vpow2.f32 %v3872_v45  ;;  %v3965_v2 = vadd.f32 %v9810_v30, %v9806_v37  ;;  %v3884_v45 = vmul.f32 1.442695, %v3783_v9  ;;  %v3886_v22 = vmul.f32 1.442695, %v3784_v15 }
 0x452   : > { %3960 = vadd.xlane.f32.xlu1 %v3959_v59  ;;  %10729 = vst [vmem:[#allocation39_spill] sm:$0xff] %v9816_v1  ;;  %v3880_v59 = vmul.f32 1.442695, %v3781_v53  ;;  %6470 = vpow2.f32 %v3874_v23  ;;  %v10731_v53 = vld [vmem:[#allocation32_spill] sm:$0xff]  ;;  %v3788_v28 = vsub.f32 %v9501_v33, %v3715_v11 }
 0x453   : > { %3741 = vmax.xlane.f32.xlu0 %v3740_v26  ;;  %v9821_v26 = vpop.eup %6448  ;;  %6472 = vpow2.f32 %v3876_v17  ;;  %v3787_v10 = vsub.f32 %v10731_v53, %v3712_v5  ;;  %v3718_v48 = vpop.xlane.xlu0 %3717  ;;  %v3888_v17 = vmul.f32 1.442695, %v3785_v44  ;;  %v3789_v5 = vsub.f32 %v9506_v52, %v3715_v11  ;;  %v10736_v53 = vld [vmem:[#allocation33_spill] sm:$0xff] }
 0x454   : > { %v9824_v4 = vpop.eup %6450  ;;  %6474 = vpow2.f32 %v3878_v3  ;;  %v3790_v3 = vsub.f32 %v9510_v56, %v3718_v48  ;;  %v3894_v44 = vmul.f32 1.442695, %v3788_v28 }
 0x455   : > { %v5450_v38 = vpop.f32.mrb[100].mxu0  ;;  %10730 = vst [vmem:[#allocation63_spill] sm:$0xff] %v9824_v4  ;;  %v9829_v50 = vpop.eup %6452  ;;  %6476 = vpow2.f32 %v3880_v59  ;;  %v3892_v15 = vmul.f32 1.442695, %v3787_v10 }
 0x456   : > { %3744 = vmax.xlane.f32.xlu1 %v3743_v62  ;;  %v5451_v31 = vpop.f32.mrb[101].mxu0  ;;  %v9834_v23 = vpop.eup %6454  ;;  %6478 = vpow2.f32 %v3882_v36  ;;  %v3971_v11 = vadd.f32 %v9829_v50, %v9824_v4  ;;  %v3898_v10 = vmul.f32 1.442695, %v3790_v3 }
 0x457   : > { %3963 = vadd.xlane.f32.xlu0 %v3962_v19  ;;  %v9832_v47 = vadd.f32 %v5451_v31, %v5450_v38  ;;  %v5453_v43 = vpop.f32.mrb[102].mxu0  ;;  %10732 = vst [vmem:[#allocation40_spill] sm:$0xff] %v9834_v23  ;;  %v3968_v19 = vadd.f32 %v9821_v26, %v9816_v1  ;;  %v9839_v37 = vpop.eup %6456  ;;  %v3890_v31 = vmul.f32 1.442695, %v3786_v49  ;;  %6480 = vpow2.f32 %v3884_v45 }
 0x458   : > { %v5454_v62 = vpop.f32.mrb[103].mxu0  ;;  %10733 = vst [vmem:[#allocation41_spill] sm:$0xff] %v9839_v37  ;;  %v9844_v38 = vpop.eup %6458  ;;  %v3791_v1 = vsub.f32 %v10736_v53, %v3718_v48  ;;  %6482 = vpow2.f32 %v3886_v22  ;;  %v3974_v56 = vadd.f32 %v9839_v37, %v9834_v23  ;;  %v3896_v49 = vmul.f32 1.442695, %v3789_v5 }
 0x459   : > { %v9842_v9 = vadd.f32 %v5454_v62, %v5453_v43  ;;  %10734 = vst [vmem:[#allocation59_spill] sm:$0xff] %v9844_v38  ;;  %v9847_v33 = vpop.eup %6460  ;;  %v3721_v59 = vpop.xlane.xlu1 %3720  ;;  %6484 = vpow2.f32 %v3888_v17 }
 0x45a   : > { %3966 = vadd.xlane.f32.xlu1 %v3965_v2  ;;  %10735 = vst [vmem:[#allocation42_spill] sm:$0xff] %v9847_v33  ;;  %v9852_v43 = vpop.eup %6462  ;;  %6486 = vpow2.f32 %v3890_v31  ;;  %v3792_v48 = vsub.f32 %v9525_v55, %v3721_v59  ;;  %v3900_v62 = vmul.f32 1.442695, %v3791_v1  ;;  %v3977_v31 = vadd.f32 %v9847_v33, %v9844_v38 }
 0x45b   : > { %3969 = vadd.xlane.f32.xlu0 %v3968_v19  ;;  %10737 = vst [vmem:[#allocation43_spill] sm:$0xff] %v9852_v43  ;;  %v9858_v36 = vpop.eup %6464  ;;  %6488 = vpow2.f32 %v3892_v15  ;;  %v10741_v19 = vld [vmem:[#allocation54_spill] sm:$0xff] }
 0x45c   : > { %10738 = vst [vmem:[#allocation44_spill] sm:$0xff] %v9858_v36  ;;  %v9860_v45 = vpop.eup %6466  ;;  %v3793_v53 = vsub.f32 %v10741_v19, %v3721_v59  ;;  %6490 = vpow2.f32 %v3894_v44  ;;  %v3980_v55 = vadd.f32 %v9858_v36, %v9852_v43  ;;  %v3902_v59 = vmul.f32 1.442695, %v3792_v48 }
 0x45d   : > { %v5456_v2 = vpop.f32.mrb[104].mxu0  ;;  %10739 = vst [vmem:[#allocation45_spill] sm:$0xff] %v9860_v45  ;;  %v9863_v28 = vpop.eup %6468  ;;  %6492 = vpow2.f32 %v3896_v49 }
 0x45e   : > { %3972 = vadd.xlane.f32.xlu1 %v3971_v11  ;;  %v5457_v22 = vpop.f32.mrb[105].mxu0  ;;  %10740 = vst [vmem:[#allocation65_spill] sm:$0xff] %v9863_v28  ;;  %v9868_v5 = vpop.eup %6470  ;;  %6494 = vpow2.f32 %v3898_v10  ;;  %v3904_v44 = vmul.f32 1.442695, %v3793_v53  ;;  %v3983_v49 = vadd.f32 %v9863_v28, %v9860_v45 }
 0x45f   : > { %3975 = vadd.xlane.f32.xlu0 %v3974_v56  ;;  %v9866_v52 = vadd.f32 %v5457_v22, %v5456_v2  ;;  %v5459_v17 = vpop.f32.mrb[106].mxu0  ;;  %10742 = vst [vmem:[#allocation4_spill] sm:$0xff] %v9868_v5  ;;  %v9874_v3 = vpop.eup %6472  ;;  %6496 = vpow2.f32 %v3900_v62 }
 0x460   : > { %v5460_v23 = vpop.f32.mrb[107].mxu0  ;;  %10743 = vst [vmem:[#allocation46_spill] sm:$0xff] %v9874_v3  ;;  %v9878_v1 = vpop.eup %6474  ;;  %6498 = vpow2.f32 %v3902_v59 }
 0x461   : > { %v9876_v15 = vadd.f32 %v5460_v23, %v5459_v17  ;;  %10744 = vst [vmem:[#allocation47_spill] sm:$0xff] %v9878_v1  ;;  %v9880_v11 = vpop.eup %6476  ;;  %v3986_v23 = vadd.f32 %v9874_v3, %v9868_v5  ;;  %6500 = vpow2.f32 %v3904_v44 }
 0x462   : > { %3978 = vadd.xlane.f32.xlu1 %v3977_v31  ;;  %10745 = vst [vmem:[#allocation67_spill] sm:$0xff] %v9880_v11  ;;  %v9884_v2 = vpop.eup %6478  ;;  %v3989_v56 = vadd.f32 %v9880_v11, %v9878_v1 }
 0x463   : > { %3981 = vadd.xlane.f32.xlu0 %v3980_v55  ;;  %10746 = vst [vmem:[#allocation48_spill] sm:$0xff] %v9884_v2  ;;  %v9890_v22 = vpop.eup %6480 }
 0x464   : > { %10747 = vst [vmem:[#allocation49_spill] sm:$0xff] %v9890_v22  ;;  %v9892_v48 = vpop.eup %6482  ;;  %v3992_v5 = vadd.f32 %v9890_v22, %v9884_v2 }
 0x465   : > { %v5462_v10 = vpop.f32.mrb[108].mxu0  ;;  %10748 = vst [vmem:[#allocation3_spill] sm:$0xff] %v9892_v48  ;;  %v9894_v19 = vpop.eup %6484 }
 0x466   : > { %3984 = vadd.xlane.f32.xlu1 %v3983_v49  ;;  %v5463_v62 = vpop.f32.mrb[109].mxu0  ;;  %10749 = vst [vmem:[#allocation50_spill] sm:$0xff] %v9894_v19  ;;  %v9898_v31 = vpop.eup %6486 }
 0x467   : > { %3987 = vadd.xlane.f32.xlu0 %v3986_v23  ;;  %v9896_v53 = vadd.f32 %v5463_v62, %v5462_v10  ;;  %v5465_v17 = vpop.f32.mrb[110].mxu0  ;;  %10750 = vst [vmem:[#allocation51_spill] sm:$0xff] %v9898_v31  ;;  %v9904_v3 = vpop.eup %6488  ;;  %v3995_v62 = vadd.f32 %v9894_v19, %v9892_v48 }
 0x468   : > { %v5466_v55 = vpop.f32.mrb[111].mxu0  ;;  %10751 = vst [vmem:[#allocation52_spill] sm:$0xff] %v9904_v3  ;;  %v9908_v49 = vpop.eup %6490  ;;  %v3998_v2 = vadd.f32 %v9904_v3, %v9898_v31 }
 0x469   : > { %v9906_v59 = vadd.f32 %v5466_v55, %v5465_v17  ;;  %10752 = vst [vmem:[#allocation53_spill] sm:$0xff] %v9908_v49  ;;  %v9910_v44 = vpop.eup %6492 }
 0x46a   : > { %3990 = vadd.xlane.f32.xlu1 %v3989_v56  ;;  %10753 = vst [vmem:[#allocation55_spill] sm:$0xff] %v9910_v44  ;;  %v9914_v10 = vpop.eup %6494  ;;  %v4001_v43 = vadd.f32 %v9910_v44, %v9908_v49 }
 0x46b   : > { %3993 = vadd.xlane.f32.xlu0 %v3992_v5  ;;  %10754 = vst [vmem:[#allocation56_spill] sm:$0xff] %v9914_v10  ;;  %v9920_v22 = vpop.eup %6496 }
 0x46c   : > { %10755 = vst [vmem:[#allocation8_spill] sm:$0xff] %v9920_v22  ;;  %v9924_v1 = vpop.eup %6498  ;;  %v4004_v48 = vadd.f32 %v9920_v22, %v9914_v10 }
 0x46d   : > { %v5468_v17 = vpop.f32.mrb[112].mxu0  ;;  %10756 = vst [vmem:[#allocation9_spill] sm:$0xff] %v9924_v1  ;;  %v9930_v19 = vpop.eup %6500 }
 0x46e   : > { %3996 = vadd.xlane.f32.xlu1 %v3995_v62  ;;  %v5469_v55 = vpop.f32.mrb[113].mxu0  ;;  %10757 = vst [vmem:[#allocation7_spill] sm:$0xff] %v9930_v19  ;;  %v4007_v62 = vadd.f32 %v9930_v19, %v9924_v1 }
 0x46f   : > { %3999 = vadd.xlane.f32.xlu0 %v3998_v2  ;;  %v9922_v5 = vadd.f32 %v5469_v55, %v5468_v17  ;;  %v5471_v56 = vpop.f32.mrb[114].mxu0 }
 0x470   : > { %v5472_v23 = vpop.f32.mrb[115].mxu0 }
 0x471   : > { %v9932_v31 = vadd.f32 %v5472_v23, %v5471_v56 }
 0x472   : > { %4002 = vadd.xlane.f32.xlu1 %v4001_v43 }
 0x473   : > { %4005 = vadd.xlane.f32.xlu0 %v4004_v48 }
 0x475   : > { %v5474_v17 = vpop.f32.mrb[116].mxu0 }
 0x476   : > { %4008 = vadd.xlane.f32.xlu1 %v4007_v62  ;;  %v5475_v55 = vpop.f32.mrb[117].mxu0 }
 0x477   : > { %v9938_v3 = vadd.f32 %v5475_v55, %v5474_v17  ;;  %v5477_v49 = vpop.f32.mrb[118].mxu0 }
 0x478   : > { %v5478_v44 = vpop.f32.mrb[119].mxu0 }
 0x479   : > { %v9940_v10 = vadd.f32 %v5478_v44, %v5477_v49 }
 0x47d   : > { %v5480_v43 = vpop.f32.mrb[120].mxu0 }
 0x47e   : > { %v5481_v48 = vpop.f32.mrb[121].mxu0 }
 0x47f   : > { %v9944_v56 = vadd.f32 %v5481_v48, %v5480_v43  ;;  %v5483_v2 = vpop.f32.mrb[122].mxu0 }
 0x480   : > { %v5484_v22 = vpop.f32.mrb[123].mxu0 }
 0x481   : > { %v9946_v11 = vadd.f32 %v5484_v22, %v5483_v2 }
 0x485   : > { %v5486_v17 = vpop.f32.mrb[124].mxu0 }
 0x486   : > { %v5487_v55 = vpop.f32.mrb[125].mxu0 }
 0x487   : > { %v9950_v1 = vadd.f32 %v5487_v55, %v5486_v17  ;;  %v5489_v49 = vpop.f32.mrb[126].mxu0  ;;  %v10758_v17 = vpack.c.bf16 %v9792_v20, %v9783_v34  ;;  %v10760_v20 = vpack.c.bf16 %v9876_v15, %v9866_v52 }
 0x488   : > { %v5490_v44 = vpop.f32.mrb[127].mxu0 }
 0x489   : > { %v9952_v19 = vadd.f32 %v5490_v44, %v5489_v49 }
 0x48d   : > { %v5492_v43 = vpop.f32.mrb[128].mxu0 }
 0x48e   : > { %v5493_v48 = vpop.f32.mrb[129].mxu0 }
 0x48f   : > { %v5494_v45 = vadd.f32 %v5493_v48, %v5492_v43  ;;  %v5495_v36 = vpop.f32.mrb[130].mxu0  ;;  %v10759_v43 = vpack.c.bf16 %v9842_v9, %v9832_v47  ;;  %v10761_v47 = vpack.c.bf16 %v9906_v59, %v9896_v53 }
 0x490   : > { %v5496_v22 = vpop.f32.mrb[131].mxu0 }
 0x491   : > { %v5497_v2 = vadd.f32 %v5496_v22, %v5495_v36 }
 0x493   : > { %v4170_v28 = vpack.c.bf16 %v5497_v2, %v5494_v45 }
 0x495   : > { %v5498_v38 = vpop.f32.mrb[132].mxu0  ;;  %5588 = vmatprep.subr.bf16.mxu0 %v4170_v28 }
 0x496   : > { %v5499_v62 = vpop.f32.mrb[133].mxu0  ;;  %5589 = vmatpush3.bf16.msra.mxu0 %v10758_v17 }
 0x497   : > { %v5500_v55 = vadd.f32 %v5499_v62, %v5498_v38  ;;  %v5501_v49 = vpop.f32.mrb[134].mxu0 }
 0x498   : > { %v5502_v44 = vpop.f32.mrb[135].mxu0 }
 0x499   : > { %v5503_v37 = vadd.f32 %v5502_v44, %v5501_v49 }
 0x49b   : > { %v4171_v33 = vpack.c.bf16 %v5503_v37, %v5500_v55 }
 0x49d   : > { %v5504_v23 = vpop.f32.mrb[136].mxu0  ;;  %5590 = vmatprep.subr.bf16.mxu0 %v4171_v33 }
 0x49e   : > { %v5505_v4 = vpop.f32.mrb[137].mxu0  ;;  %5591 = vmatpush3.bf16.msra.mxu0 %v10759_v43 }
 0x49f   : > { %v5506_v36 = vadd.f32 %v5505_v4, %v5504_v23  ;;  %v5507_v45 = vpop.f32.mrb[138].mxu0 }
 0x4a0   : > { %v5508_v28 = vpop.f32.mrb[139].mxu0 }
 0x4a1   : > { %v5509_v48 = vadd.f32 %v5508_v28, %v5507_v45 }
 0x4a3   : > { %v4172_v22 = vpack.c.bf16 %v5509_v48, %v5506_v36 }
 0x4a5   : > { %v5510_v2 = vpop.f32.mrb[140].mxu0  ;;  %5592 = vmatprep.subr.bf16.mxu0 %v4172_v22 }
 0x4a6   : > { %v5511_v34 = vpop.f32.mrb[141].mxu0  ;;  %5593 = vmatpush3.bf16.msra.mxu0 %v10760_v20 }
 0x4a7   : > { %v5512_v37 = vadd.f32 %v5511_v34, %v5510_v2  ;;  %v5513_v38 = vpop.f32.mrb[142].mxu0 }
 0x4a8   : > { %v5514_v33 = vpop.f32.mrb[143].mxu0 }
 0x4a9   : > { %v5515_v62 = vadd.f32 %v5514_v33, %v5513_v38 }
 0x4ab   : > { %v4173_v17 = vpack.c.bf16 %v5515_v62, %v5512_v37 }
 0x4ad   : > { %5594 = vmatprep.subr.bf16.mxu0 %v4173_v17 }
 0x4ae   : > { %5595 = vmatpush3.bf16.msra.mxu0 %v10761_v47 }
 0x4c4   : > { %v3940_v4 = vpop.xlane.xlu0 %3939 }
 0x4c5   : > { %6502 = vrcp.f32 %v3940_v4 }
 0x4c7   : > { %v3943_v9 = vpop.xlane.xlu1 %3942 }
 0x4c8   : > { %v3724_v23 = vpop.xlane.xlu0 %3723  ;;  %6504 = vrcp.f32 %v3943_v9 }
 0x4c9   : > { %v3794_v55 = vsub.f32 %v9583_v41, %v3724_v23  ;;  %v3795_v52 = vsub.f32 %v9586_v42, %v3724_v23 }
 0x4cb   : > { %v3906_v15 = vmul.f32 1.442695, %v3794_v55  ;;  %v3908_v49 = vmul.f32 1.442695, %v3795_v52  ;;  %v3727_v44 = vpop.xlane.xlu1 %3726 }
 0x4cc   : > { %v9970_v43 = vpop.xlane.xlu0 %3945  ;;  %v3796_v36 = vsub.f32 %v9609_v12, %v3727_v44  ;;  %v3797_v53 = vsub.f32 %v9612_v51, %v3727_v44 }
 0x4cd   : > { %6506 = vpow2.f32 %v3906_v15 }
 0x4ce   : > { %6508 = vpow2.f32 %v3908_v49  ;;  %v3910_v59 = vmul.f32 1.442695, %v3796_v36  ;;  %v3912_v45 = vmul.f32 1.442695, %v3797_v53 }
 0x4cf   : > { %v9974_v28 = vpop.xlane.xlu1 %3948  ;;  %v6503_v22 = vpop.eup %6502 }
 0x4d0   : > { %v3730_v48 = vpop.xlane.xlu0 %3729  ;;  %6510 = vpow2.f32 %v3910_v59  ;;  %v9979_v12 = vmul.f32 %v6503_v22, %v9576_v29  ;;  %v4067_v33 = vmul.f32 %v6503_v22, %v9579_v61 }
 0x4d1   : > { %v3798_v41 = vsub.f32 %v9638_v63, %v3730_v48  ;;  %v3799_v42 = vsub.f32 %v9641_v0, %v3730_v48  ;;  %6512 = vpow2.f32 %v3912_v45 }
 0x4d2   : > { %v6505_v2 = vpop.eup %6504 }
 0x4d3   : > { %v3914_v34 = vmul.f32 1.442695, %v3798_v41  ;;  %v3916_v20 = vmul.f32 1.442695, %v3799_v42  ;;  %v9982_v51 = vmul.f32 %v6505_v2, %v9598_v57  ;;  %v3733_v37 = vpop.xlane.xlu1 %3732  ;;  %v4069_v62 = vmul.f32 %v6505_v2, %v9601_v16 }
 0x4d4   : > { %v9984_v38 = vpop.xlane.xlu0 %3951  ;;  %v3800_v63 = vsub.f32 %v9655_v54, %v3733_v37  ;;  %v3801_v0 = vsub.f32 %v9666_v35, %v3733_v37 }
 0x4d5   : > { %6514 = vpow2.f32 %v3914_v34  ;;  %v4131_v17 = vpack.c.bf16 %v4069_v62, %v4067_v33  ;;  %v4130_v29 = vpack.c.bf16 %v9982_v51, %v9979_v12  ;;  %v10766_v51 = vld [vmem:[#allocation35_spill] sm:$0xff] }
 0x4d6   : > { %6516 = vpow2.f32 %v3916_v20  ;;  %v3918_v57 = vmul.f32 1.442695, %v3800_v63  ;;  %v3920_v4 = vmul.f32 1.442695, %v3801_v0 }
 0x4d7   : > { %v9992_v47 = vpop.eup %6506  ;;  %v9996_v23 = vpop.xlane.xlu1 %3954  ;;  %4210 = vmatprep.mubr.bf16.mxu0 %v4131_v17 }
 0x4d8   : > { %v9994_v9 = vpop.eup %6508  ;;  %v3736_v61 = vpop.xlane.xlu0 %3735  ;;  %6518 = vpow2.f32 %v3918_v57 }
 0x4d9   : > { %v3802_v16 = vsub.f32 %v9685_v32, %v3736_v61  ;;  %v3803_v54 = vsub.f32 %v9688_v40, %v3736_v61  ;;  %v4010_v35 = vadd.f32 %v9994_v9, %v9992_v47  ;;  %6520 = vpow2.f32 %v3920_v4 }
 0x4da   : > { %v10002_v55 = vpop.eup %6510 }
 0x4db   : > { %v3922_v52 = vmul.f32 1.442695, %v3802_v16  ;;  %v3924_v15 = vmul.f32 1.442695, %v3803_v54  ;;  %4011 = vadd.xlane.f32.xlu0 %v4010_v35  ;;  %v10004_v49 = vpop.eup %6512  ;;  %v3739_v44 = vpop.xlane.xlu1 %3738 }
 0x4dc   : > { %v10006_v36 = vpop.xlane.xlu0 %3957  ;;  %v3804_v53 = vsub.f32 %v9712_v7, %v3739_v44  ;;  %v3805_v32 = vsub.f32 %v9726_v25, %v3739_v44  ;;  %v4013_v40 = vadd.f32 %v10004_v49, %v10002_v55 }
 0x4dd   : > { %6522 = vpow2.f32 %v3922_v52 }
 0x4de   : > { %6524 = vpow2.f32 %v3924_v15  ;;  %v3926_v45 = vmul.f32 1.442695, %v3804_v53  ;;  %v3928_v48 = vmul.f32 1.442695, %v3805_v32  ;;  %4014 = vadd.xlane.f32.xlu1 %v4013_v40 }
 0x4df   : > { %v10012_v59 = vpop.eup %6514  ;;  %v10016_v41 = vpop.xlane.xlu1 %3960 }
 0x4e0   : > { %v10014_v22 = vpop.eup %6516  ;;  %v3742_v42 = vpop.xlane.xlu0 %3741  ;;  %6526 = vpow2.f32 %v3926_v45 }
 0x4e1   : > { %v3806_v2 = vsub.f32 %v9733_v39, %v3742_v42  ;;  %v3807_v7 = vsub.f32 %v9738_v21, %v3742_v42  ;;  %v4016_v25 = vadd.f32 %v10014_v22, %v10012_v59  ;;  %6528 = vpow2.f32 %v3928_v48 }
 0x4e2   : > { %v10022_v34 = vpop.eup %6518 }
 0x4e3   : > { %v3930_v20 = vmul.f32 1.442695, %v3806_v2  ;;  %v3932_v37 = vmul.f32 1.442695, %v3807_v7  ;;  %4017 = vadd.xlane.f32.xlu0 %v4016_v25  ;;  %v10024_v33 = vpop.eup %6520  ;;  %v3745_v62 = vpop.xlane.xlu1 %3744 }
 0x4e4   : > { %v3808_v63 = vsub.f32 %v9760_v58, %v3745_v62  ;;  %v3809_v0 = vsub.f32 %v9786_v27, %v3745_v62  ;;  %v4019_v39 = vadd.f32 %v10024_v33, %v10022_v34  ;;  %v10762_v62 = vpack.c.bf16 %v9932_v31, %v9922_v5  ;;  %v3964_v12 = vpop.xlane.xlu0 %3963 }
 0x4e5   : > { %6530 = vpow2.f32 %v3930_v20 }
 0x4e6   : > { %6532 = vpow2.f32 %v3932_v37  ;;  %v3934_v17 = vmul.f32 1.442695, %v3808_v63  ;;  %v3936_v57 = vmul.f32 1.442695, %v3809_v0  ;;  %4020 = vadd.xlane.f32.xlu1 %v4019_v39 }
 0x4e7   : > { %v10030_v21 = vpop.eup %6522 }
 0x4e8   : > { %v10032_v4 = vpop.eup %6524  ;;  %6534 = vpow2.f32 %v3934_v17 }
 0x4e9   : > { %v4022_v61 = vadd.f32 %v10032_v4, %v10030_v21  ;;  %6536 = vpow2.f32 %v3936_v57 }
 0x4ea   : > { %v10036_v16 = vpop.eup %6526  ;;  %6538 = vrcp.f32 %v9974_v28 }
 0x4eb   : > { %4023 = vadd.xlane.f32.xlu0 %v4022_v61  ;;  %v10038_v58 = vpop.eup %6528  ;;  %6540 = vrcp.f32 %v9970_v43 }
 0x4ec   : > { %v4025_v27 = vadd.f32 %v10038_v58, %v10036_v16  ;;  %6542 = vrcp.f32 %v9996_v23 }
 0x4ed   : > { %6544 = vrcp.f32 %v9984_v38 }
 0x4ee   : > { %4026 = vadd.xlane.f32.xlu1 %v4025_v27  ;;  %v10763_v27 = vpack.c.bf16 %v9940_v10, %v9938_v3  ;;  %6546 = vrcp.f32 %v10016_v41  ;;  %v3967_v41 = vpop.xlane.xlu1 %3966 }
 0x4ef   : > { %v10042_v54 = vpop.eup %6530  ;;  %v5516_v52 = vpop.f32.mrb[144].mxu0  ;;  %6548 = vrcp.f32 %v10006_v36 }
 0x4f0   : > { %v10044_v35 = vpop.eup %6532  ;;  %v5517_v44 = vpop.f32.mrb[145].mxu0  ;;  %6550 = vrcp.f32 %v3967_v41  ;;  %v10773_v41 = vld [vmem:[#allocation63_spill] sm:$0xff] }
 0x4f1   : > { %v4028_v15 = vadd.f32 %v10044_v35, %v10042_v54  ;;  %v5518_v32 = vadd.f32 %v5517_v44, %v5516_v52  ;;  %v5519_v40 = vpop.f32.mrb[146].mxu0  ;;  %6552 = vrcp.f32 %v3964_v12  ;;  %v10774_v12 = vld [vmem:[#allocation42_spill] sm:$0xff] }
 0x4f2   : > { %v10048_v53 = vpop.eup %6534  ;;  %v5520_v48 = vpop.f32.mrb[147].mxu0 }
 0x4f3   : > { %4029 = vadd.xlane.f32.xlu0 %v4028_v15  ;;  %v10050_v45 = vpop.eup %6536  ;;  %v5521_v42 = vadd.f32 %v5520_v48, %v5519_v40  ;;  %v10764_v48 = vpack.c.bf16 %v9946_v11, %v9944_v56 }
 0x4f4   : > { %v4031_v2 = vadd.f32 %v10050_v45, %v10048_v53  ;;  %v6539_v28 = vpop.eup %6538 }
 0x4f5   : > { %v4174_v7 = vpack.c.bf16 %v5521_v42, %v5518_v32 }
 0x4f6   : > { %4032 = vadd.xlane.f32.xlu1 %v4031_v2 }
 0x4f7   : > { %v5522_v25 = vpop.f32.mrb[148].mxu0  ;;  %5596 = vmatprep.subr.bf16.mxu0 %v4174_v7  ;;  %v6541_v7 = vpop.eup %6540 }
 0x4f8   : > { %v5523_v20 = vpop.f32.mrb[149].mxu0  ;;  %5597 = vmatpush3.bf16.msra.mxu0 %v10762_v62  ;;  %v4071_v11 = vmul.f32 %v6541_v7, %v9620_v14  ;;  %v6543_v23 = vpop.eup %6542 }
 0x4f9   : > { %v5524_v37 = vadd.f32 %v5523_v20, %v5522_v25  ;;  %v5525_v63 = vpop.f32.mrb[150].mxu0  ;;  %v4073_v25 = vmul.f32 %v6539_v28, %v9652_v8  ;;  %v10765_v20 = vpack.c.bf16 %v9952_v19, %v9950_v1  ;;  %v4339_v8 = vld [vmem:[%s10357_s4] sm:$0xff]  ;;  %v4340_v1 = vld [vmem:[%s10357_s4 + $0x8] sm:$0xff]  ;;  %v6545_v14 = vpop.eup %6544  ;;  %v4072_v19 = vmul.f32 %v6539_v28, %v9635_v46  ;;  %v10767_v46 = vld [vmem:[#allocation36_spill] sm:$0xff] }
 0x4fa   : > { %v5526_v0 = vpop.f32.mrb[151].mxu0  ;;  %v6186_v38 = vpack.c.bf16 %v4340_v1, %v4339_v8  ;;  %v4077_v36 = vmul.f32 %v6543_v23, %v9721_v60 }
 0x4fb   : > { %v5527_v39 = vadd.f32 %v5526_v0, %v5525_v63  ;;  %v4133_v56 = vpack.c.bf16 %v4073_v25, %v4071_v11  ;;  %v6547_v0 = vpop.eup %6546 }
 0x4fc   : > { %6187 = vmatprep.subr.bf16.mxu1 %v6186_v38  ;;  %v4081_v60 = vmul.f32 %v6547_v0, %v9779_v18 }
 0x4fd   : > { %v4175_v17 = vpack.c.bf16 %v5527_v39, %v5524_v37  ;;  %v4070_v37 = vmul.f32 %v6541_v7, %v9606_v24  ;;  %6189 = vmatpush3.bf16.msra.mxu1 %v6186_v38  ;;  %v6549_v39 = vpop.eup %6548 }
 0x4ff   : > { %v5528_v57 = vpop.f32.mrb[152].mxu0  ;;  %5598 = vmatprep.subr.bf16.mxu0 %v4175_v17  ;;  %v4132_v62 = vpack.c.bf16 %v4072_v19, %v4070_v37  ;;  %v4076_v17 = vmul.f32 %v6543_v23, %v10767_v46  ;;  %v10772_v23 = vld [vmem:[#allocation10_spill] sm:$0xff] }
 0x500   : > { %v5529_v61 = vpop.f32.mrb[153].mxu0  ;;  %5599 = vmatpush3.bf16.msra.mxu0 %v10763_v27  ;;  %v3970_v27 = vpop.xlane.xlu0 %3969 }
 0x501   : > { %v5530_v52 = vadd.f32 %v5529_v61, %v5528_v57  ;;  %v5531_v15 = vpop.f32.mrb[154].mxu0  ;;  %v3973_v57 = vpop.xlane.xlu1 %3972  ;;  %v10768_v61 = vld [vmem:[#allocation34_spill] sm:$0xff] }
 0x502   : > { %v5532_v44 = vpop.f32.mrb[155].mxu0  ;;  %v4074_v24 = vmul.f32 %v6545_v14, %v10768_v61  ;;  %6554 = vrcp.f32 %v3973_v57  ;;  %v10777_v57 = vld [vmem:[#allocation59_spill] sm:$0xff] }
 0x503   : > { %v5533_v31 = vadd.f32 %v5532_v44, %v5531_v15  ;;  %6556 = vrcp.f32 %v3970_v27 }
 0x504   : > { %v4134_v44 = vpack.c.bf16 %v4076_v17, %v4074_v24  ;;  %v10778_v24 = vld [vmem:[#allocation65_spill] sm:$0xff] }
 0x505   : > { %v4176_v5 = vpack.c.bf16 %v5533_v31, %v5530_v52  ;;  %v10769_v52 = vld [vmem:[#allocation61_spill] sm:$0xff] }
 0x506   : > { %v4079_v15 = vmul.f32 %v6549_v39, %v10769_v52  ;;  %v10779_v52 = vld [vmem:[#allocation40_spill] sm:$0xff] }
 0x507   : > { %v5534_v32 = vpop.f32.mrb[156].mxu0  ;;  %5600 = vmatprep.subr.bf16.mxu0 %v4176_v5  ;;  %v6551_v5 = vpop.eup %6550 }
 0x508   : > { %v5535_v40 = vpop.f32.mrb[157].mxu0  ;;  %5601 = vmatpush3.bf16.msra.mxu0 %v10764_v48  ;;  %v4137_v31 = vpack.c.bf16 %v4081_v60, %v4079_v15  ;;  %v3979_v48 = vpop.xlane.xlu1 %3978 }
 0x509   : > { %v5536_v3 = vadd.f32 %v5535_v40, %v5534_v32  ;;  %v5537_v10 = vpop.f32.mrb[158].mxu0  ;;  %v6553_v32 = vpop.eup %6552  ;;  %v4080_v40 = vmul.f32 %v6547_v0, %v9773_v13  ;;  %6558 = vrcp.f32 %v3979_v48 }
 0x50a   : > { %v5538_v42 = vpop.f32.mrb[159].mxu0  ;;  %v4083_v28 = vmul.f32 %v6553_v32, %v9800_v6 }
 0x50b   : > { %v5539_v2 = vadd.f32 %v5538_v42, %v5537_v10  ;;  %v10770_v10 = vld [vmem:[#allocation37_spill] sm:$0xff]  ;;  %v3976_v42 = vpop.xlane.xlu0 %3975 }
 0x50c   : > { %v4078_v18 = vmul.f32 %v6549_v39, %v10770_v10  ;;  %6560 = vrcp.f32 %v3976_v42  ;;  %v10781_v10 = vld [vmem:[#allocation45_spill] sm:$0xff] }
 0x50d   : > { %v4177_v43 = vpack.c.bf16 %v5539_v2, %v5536_v3  ;;  %v4085_v3 = vmul.f32 %v6551_v5, %v9810_v30  ;;  %v4082_v30 = vmul.f32 %v6553_v32, %v10772_v23 }
 0x50e   : > { %v4136_v2 = vpack.c.bf16 %v4080_v40, %v4078_v18 }
 0x50f   : > { %5602 = vmatprep.subr.bf16.mxu0 %v4177_v43  ;;  %v4139_v7 = vpack.c.bf16 %v4085_v3, %v4083_v28  ;;  %v6555_v43 = vpop.eup %6554  ;;  %v3982_v8 = vpop.xlane.xlu0 %3981  ;;  %v10782_v28 = vld [vmem:[#allocation67_spill] sm:$0xff] }
 0x510   : > { %5603 = vmatpush3.bf16.msra.mxu0 %v10765_v20  ;;  %v6557_v25 = vpop.eup %6556  ;;  %v10771_v20 = vld [vmem:[#allocation38_spill] sm:$0xff]  ;;  %v4089_v13 = vmul.f32 %v6555_v43, %v9829_v50 }
 0x511   : > { %v4084_v11 = vmul.f32 %v6551_v5, %v10771_v20  ;;  %v4087_v1 = vmul.f32 %v6557_v25, %v9821_v26  ;;  %v10784_v20 = vld [vmem:[#allocation46_spill] sm:$0xff] }
 0x513   : > { %4211 = vmatmul.mubr.bf16.vlgmr.msra.gmra.mrb[160].mxu0 %v4130_v29  ;;  %v4075_v29 = vmul.f32 %v6545_v14, %v10766_v51  ;;  %v4138_v6 = vpack.c.bf16 %v4084_v11, %v4082_v30  ;;  %v4141_v14 = vpack.c.bf16 %v4089_v13, %v4087_v1  ;;  %v6559_v19 = vpop.eup %6558 }
 0x514   : > { %4218 = vmatprep.mubr.bf16.mxu0 %v4133_v56  ;;  %v3985_v56 = vpop.xlane.xlu1 %3984  ;;  %v4093_v51 = vmul.f32 %v6559_v19, %v10774_v12  ;;  %v4092_v60 = vmul.f32 %v6559_v19, %v10777_v57  ;;  %v10792_v57 = vld [vmem:[#allocation52_spill] sm:$0xff] }
 0x515   : > { %v4135_v63 = vpack.c.bf16 %v4077_v36, %v4075_v29  ;;  %6562 = vrcp.f32 %v3985_v56  ;;  %v4088_v36 = vmul.f32 %v6555_v43, %v10773_v41  ;;  %v10775_v29 = vld [vmem:[#allocation39_spill] sm:$0xff] }
 0x516   : > { %6564 = vrcp.f32 %v3982_v8  ;;  %v6561_v38 = vpop.eup %6560  ;;  %v4086_v50 = vmul.f32 %v6557_v25, %v10775_v29  ;;  %v10785_v8 = vld [vmem:[#allocation47_spill] sm:$0xff] }
 0x517   : > { %v4090_v15 = vmul.f32 %v6561_v38, %v10779_v52 }
 0x518   : > { %v3991_v37 = vpop.xlane.xlu1 %3990  ;;  %v4140_v26 = vpack.c.bf16 %v4088_v36, %v4086_v50 }
 0x519   : > { %6566 = vrcp.f32 %v3991_v37  ;;  %v4142_v32 = vpack.c.bf16 %v4092_v60, %v4090_v15  ;;  %v10788_v37 = vld [vmem:[#allocation49_spill] sm:$0xff] }
 0x51a   : > { %v10793_v15 = vld [vmem:[#allocation53_spill] sm:$0xff] }
 0x51b   : > { %4219 = vmatmul.mubr.bf16.gmra.mrb[164].mxu0 %v4132_v62  ;;  %v3988_v62 = vpop.xlane.xlu0 %3987 }
 0x51c   : > { %4226 = vmatprep.mubr.bf16.mxu0 %v4135_v63  ;;  %v10776_v63 = vld [vmem:[#allocation41_spill] sm:$0xff]  ;;  %6568 = vrcp.f32 %v3988_v62  ;;  %v3997_v61 = vpop.xlane.xlu1 %3996 }
 0x51d   : > { %v4091_v0 = vmul.f32 %v6561_v38, %v10776_v63  ;;  %6570 = vrcp.f32 %v3997_v61  ;;  %v10787_v38 = vld [vmem:[#allocation4_spill] sm:$0xff]  ;;  %v10789_v63 = vld [vmem:[#allocation3_spill] sm:$0xff] }
 0x51f   : > { %v4143_v39 = vpack.c.bf16 %v4093_v51, %v4091_v0  ;;  %v6563_v46 = vpop.eup %6562 }
 0x520   : > { %v6565_v17 = vpop.eup %6564  ;;  %v4097_v27 = vmul.f32 %v6563_v46, %v10778_v24  ;;  %v4096_v18 = vmul.f32 %v6563_v46, %v10781_v10  ;;  %v4003_v42 = vpop.xlane.xlu1 %4002  ;;  %v10791_v46 = vld [vmem:[#allocation48_spill] sm:$0xff] }
 0x523   : > { %4227 = vmatmul.mubr.bf16.gmra.mrb[168].mxu0 %v4134_v44  ;;  %v3994_v44 = vpop.xlane.xlu0 %3993  ;;  %v6567_v48 = vpop.eup %6566 }
 0x524   : > { %4234 = vmatprep.mubr.bf16.mxu0 %v4137_v31  ;;  %v10780_v31 = vld [vmem:[#allocation44_spill] sm:$0xff]  ;;  %6572 = vrcp.f32 %v3994_v44  ;;  %v4100_v1 = vmul.f32 %v6567_v48, %v10785_v8 }
 0x525   : > { %v4095_v5 = vmul.f32 %v6565_v17, %v10780_v31  ;;  %6574 = vrcp.f32 %v4003_v42  ;;  %v10794_v31 = vld [vmem:[#allocation7_spill] sm:$0xff]  ;;  %v10797_v42 = vld [vmem:[#allocation9_spill] sm:$0xff] }
 0x526   : > { %v6569_v3 = vpop.eup %6568 }
 0x527   : > { %v4145_v40 = vpack.c.bf16 %v4097_v27, %v4095_v5  ;;  %v4000_v25 = vpop.xlane.xlu0 %3999  ;;  %v4099_v11 = vmul.f32 %v6569_v3, %v10784_v20  ;;  %v6571_v23 = vpop.eup %6570  ;;  %v4098_v41 = vmul.f32 %v6569_v3, %v10787_v38 }
 0x528   : > { %6576 = vrcp.f32 %v4000_v25  ;;  %v4104_v0 = vmul.f32 %v6571_v23, %v10789_v63 }
 0x529   : > { %v4146_v51 = vpack.c.bf16 %v4100_v1, %v4098_v41 }
 0x52b   : > { %4235 = vmatmul.mubr.bf16.gmra.mrb[172].mxu0 %v4136_v2  ;;  %v4101_v2 = vmul.f32 %v6567_v48, %v10782_v28  ;;  %v4006_v36 = vpop.xlane.xlu0 %4005  ;;  %v10796_v48 = vld [vmem:[#allocation8_spill] sm:$0xff] }
 0x52c   : > { %4242 = vmatprep.mubr.bf16.mxu0 %v4139_v7  ;;  %v10783_v7 = vld [vmem:[#allocation43_spill] sm:$0xff] }
 0x52d   : > { %v4094_v43 = vmul.f32 %v6565_v17, %v10783_v7  ;;  %v4147_v13 = vpack.c.bf16 %v4101_v2, %v4099_v11  ;;  %v10798_v7 = vld [vmem:[#allocation56_spill] sm:$0xff] }
 0x52e   : > { %v6573_v30 = vpop.eup %6572 }
 0x52f   : > { %v4144_v56 = vpack.c.bf16 %v4096_v18, %v4094_v43  ;;  %v4103_v12 = vmul.f32 %v6573_v30, %v10788_v37  ;;  %v6575_v50 = vpop.eup %6574  ;;  %v4102_v17 = vmul.f32 %v6573_v30, %v10791_v46 }
 0x530   : > { %v4108_v44 = vmul.f32 %v6575_v50, %v10793_v15 }
 0x531   : > { %v4148_v61 = vpack.c.bf16 %v4104_v0, %v4102_v17 }
 0x532   : > { %v6577_v62 = vpop.eup %6576 }
 0x533   : > { %4243 = vmatmul.mubr.bf16.gmra.mrb[176].mxu0 %v4138_v6  ;;  %v4009_v6 = vpop.xlane.xlu1 %4008  ;;  %v4107_v60 = vmul.f32 %v6577_v62, %v10792_v57 }
 0x534   : > { %4250 = vmatprep.mubr.bf16.mxu0 %v4141_v14  ;;  %v10786_v14 = vld [vmem:[#allocation50_spill] sm:$0xff]  ;;  %6578 = vrcp.f32 %v4009_v6 }
 0x535   : > { %v4105_v19 = vmul.f32 %v6571_v23, %v10786_v14  ;;  %6580 = vrcp.f32 %v4006_v36 }
 0x537   : > { %v4149_v29 = vpack.c.bf16 %v4105_v19, %v4103_v12 }
 0x53b   : > { %4251 = vmatmul.mubr.bf16.gmra.mrb[180].mxu0 %v4140_v26  ;;  %v10790_v26 = vld [vmem:[#allocation55_spill] sm:$0xff] }
 0x53c   : > { %4258 = vmatprep.mubr.bf16.mxu0 %v4143_v39  ;;  %v4109_v39 = vmul.f32 %v6575_v50, %v10790_v26 }
 0x53e   : > { %v4151_v24 = vpack.c.bf16 %v4109_v39, %v4107_v60  ;;  %v6579_v27 = vpop.eup %6578 }
 0x53f   : > { %v6581_v52 = vpop.eup %6580  ;;  %v4113_v5 = vmul.f32 %v6579_v27, %v10794_v31  ;;  %v4112_v28 = vmul.f32 %v6579_v27, %v10797_v42 }
 0x540   : > { %v4111_v3 = vmul.f32 %v6581_v52, %v10796_v48  ;;  %v4110_v43 = vmul.f32 %v6581_v52, %v10798_v7 }
 0x542   : > { %v4153_v18 = vpack.c.bf16 %v4113_v5, %v4111_v3  ;;  %v4152_v25 = vpack.c.bf16 %v4112_v28, %v4110_v43 }
 0x543   : > { %4259 = vmatmul.mubr.bf16.gmra.mrb[184].mxu0 %v4142_v32  ;;  %v10795_v32 = vld [vmem:[#allocation51_spill] sm:$0xff] }
 0x544   : > { %4266 = vmatprep.mubr.bf16.mxu0 %v4145_v40  ;;  %v4106_v40 = vmul.f32 %v6577_v62, %v10795_v32 }
 0x546   : > { %v4150_v10 = vpack.c.bf16 %v4108_v44, %v4106_v40 }
 0x54b   : > { %4267 = vmatmul.mubr.bf16.gmra.mrb[188].mxu0 %v4144_v56 }
 0x54c   : > { %4274 = vmatprep.mubr.bf16.mxu0 %v4147_v13 }
 0x553   : > { %4275 = vmatmul.mubr.bf16.gmra.mrb[192].mxu0 %v4146_v51 }
 0x554   : > { %4282 = vmatprep.mubr.bf16.mxu0 %v4149_v29 }
 0x55b   : > { %4283 = vmatmul.mubr.bf16.gmra.mrb[196].mxu0 %v4148_v61 }
 0x55c   : > { %4290 = vmatprep.mubr.bf16.mxu0 %v4151_v24 }
 0x563   : > { %4291 = vmatmul.mubr.bf16.gmra.mrb[200].mxu0 %v4150_v10 }
 0x564   : > { %4298 = vmatprep.mubr.bf16.mxu0 %v4153_v18 }
 0x568   : > { %v4012_v2 = vpop.xlane.xlu0 %4011 }
 0x569   : > { %6582 = vrcp.f32 %v4012_v2 }
 0x56b   : > { %v4015_v20 = vpop.xlane.xlu1 %4014  ;;  %4299 = vmatmul.mubr.bf16.gmra.mrb[204].mxu0 %v4152_v25 }
 0x56c   : > { %6584 = vrcp.f32 %v4015_v20 }
 0x570   : > { %v4018_v11 = vpop.xlane.xlu0 %4017 }
 0x571   : > { %6586 = vrcp.f32 %v4018_v11 }
 0x573   : > { %v4021_v56 = vpop.xlane.xlu1 %4020  ;;  %v6583_v13 = vpop.eup %6582 }
 0x574   : > { %6588 = vrcp.f32 %v4021_v56  ;;  %v4115_v8 = vmul.f32 %v6583_v13, %v9994_v9  ;;  %v4114_v6 = vmul.f32 %v6583_v13, %v9992_v47 }
 0x576   : > { %v6585_v23 = vpop.eup %6584 }
 0x577   : > { %v4117_v1 = vmul.f32 %v6585_v23, %v10004_v49  ;;  %v4116_v14 = vmul.f32 %v6585_v23, %v10002_v55 }
 0x578   : > { %v4024_v30 = vpop.xlane.xlu0 %4023 }
 0x579   : > { %v4155_v19 = vpack.c.bf16 %v4117_v1, %v4115_v8  ;;  %v4154_v38 = vpack.c.bf16 %v4116_v14, %v4114_v6  ;;  %6590 = vrcp.f32 %v4024_v30 }
 0x57b   : > { %v4027_v41 = vpop.xlane.xlu1 %4026  ;;  %4306 = vmatprep.mubr.bf16.mxu0 %v4155_v19  ;;  %v6587_v36 = vpop.eup %6586 }
 0x57c   : > { %6592 = vrcp.f32 %v4027_v41  ;;  %4307 = vmatmul.mubr.bf16.gmra.mrb[208].mxu0 %v4154_v38  ;;  %v4119_v51 = vmul.f32 %v6587_v36, %v10014_v22  ;;  %v4118_v49 = vmul.f32 %v6587_v36, %v10012_v59 }
 0x57e   : > { %v6589_v37 = vpop.eup %6588 }
 0x57f   : > { %v4121_v9 = vmul.f32 %v6589_v37, %v10024_v33  ;;  %v4120_v47 = vmul.f32 %v6589_v37, %v10022_v34 }
 0x580   : > { %v4030_v12 = vpop.xlane.xlu0 %4029 }
 0x581   : > { %v4157_v29 = vpack.c.bf16 %v4121_v9, %v4119_v51  ;;  %v4156_v55 = vpack.c.bf16 %v4120_v47, %v4118_v49  ;;  %6594 = vrcp.f32 %v4030_v12 }
 0x583   : > { %v4033_v50 = vpop.xlane.xlu1 %4032  ;;  %4314 = vmatprep.mubr.bf16.mxu0 %v4157_v29  ;;  %v6591_v62 = vpop.eup %6590 }
 0x584   : > { %6596 = vrcp.f32 %v4033_v50  ;;  %4315 = vmatmul.mubr.bf16.gmra.mrb[212].mxu0 %v4156_v55  ;;  %v4123_v0 = vmul.f32 %v6591_v62, %v10032_v4  ;;  %v4122_v22 = vmul.f32 %v6591_v62, %v10030_v21 }
 0x586   : > { %v6593_v63 = vpop.eup %6592 }
 0x587   : > { %v4125_v26 = vmul.f32 %v6593_v63, %v10038_v58  ;;  %v4124_v33 = vmul.f32 %v6593_v63, %v10036_v16 }
 0x589   : > { %v4159_v59 = vpack.c.bf16 %v4125_v26, %v4123_v0  ;;  %v4158_v39 = vpack.c.bf16 %v4124_v33, %v4122_v22 }
 0x58b   : > { %4322 = vmatprep.mubr.bf16.mxu0 %v4159_v59  ;;  %v6595_v34 = vpop.eup %6594 }
 0x58c   : > { %4323 = vmatmul.mubr.bf16.gmra.mrb[216].mxu0 %v4158_v39  ;;  %v4127_v17 = vmul.f32 %v6595_v34, %v10044_v35  ;;  %v4126_v60 = vmul.f32 %v6595_v34, %v10042_v54 }
 0x58e   : > { %v6597_v46 = vpop.eup %6596 }
 0x58f   : > { %v4129_v57 = vmul.f32 %v6597_v46, %v10050_v45  ;;  %v4128_v4 = vmul.f32 %v6597_v46, %v10048_v53 }
 0x591   : > { %v4161_v61 = vpack.c.bf16 %v4129_v57, %v4127_v17  ;;  %v4160_v58 = vpack.c.bf16 %v4128_v4, %v4126_v60 }
 0x593   : > { %4330 = vmatprep.mubr.bf16.mxu0 %v4161_v61 }
 0x594   : > { %4331 = vmatmul.mubr.bf16.gmra.mrb[220].mxu0 %v4160_v58 }
 0x5e6   : > { %v5604_v21 = vpop.f32.mrb[160].mxu0 }
 0x5e7   : > { %v5605_v16 = vpop.f32.mrb[161].mxu0 }
 0x5e8   : > { %v5606_v24 = vadd.f32 %v5605_v16, %v5604_v21  ;;  %v5607_v27 = vpop.f32.mrb[162].mxu0 }
 0x5e9   : > { %v5608_v52 = vpop.f32.mrb[163].mxu0 }
 0x5ea   : > { %v5609_v15 = vadd.f32 %v5608_v52, %v5607_v27  ;;  %6058 = vmatprep.mubr.msk.f32.mxu1 %vm2334_vm1, %v5606_v24 }
 0x5ec   : > { %6059 = vmatmul.mubr.msk.f32.vlgmr.msra.gmra.mrb[192].mxu1 %vm2334_vm1, %v5609_v15 }
 0x5ee   : > { %v5610_v35 = vpop.f32.mrb[164].mxu0 }
 0x5ef   : > { %v5611_v45 = vpop.f32.mrb[165].mxu0 }
 0x5f0   : > { %v5612_v44 = vadd.f32 %v5611_v45, %v5610_v35  ;;  %v5613_v54 = vpop.f32.mrb[166].mxu0 }
 0x5f1   : > { %v5614_v31 = vpop.f32.mrb[167].mxu0 }
 0x5f2   : > { %v5615_v53 = vadd.f32 %v5614_v31, %v5613_v54  ;;  %6061 = vmatprep.mubr.msk.f32.mxu1 %vm2334_vm1, %v5612_v44 }
 0x5f4   : > { %6062 = vmatmul.mubr.msk.f32.gmra.mrb[194].mxu1 %vm2334_vm1, %v5615_v53 }
 0x5f6   : > { %v5616_v5 = vpop.f32.mrb[168].mxu0 }
 0x5f7   : > { %v5617_v32 = vpop.f32.mrb[169].mxu0 }
 0x5f8   : > { %v5618_v40 = vadd.f32 %v5617_v32, %v5616_v5  ;;  %v5619_v48 = vpop.f32.mrb[170].mxu0 }
 0x5f9   : > { %v5620_v3 = vpop.f32.mrb[171].mxu0 }
 0x5fa   : > { %v5621_v10 = vadd.f32 %v5620_v3, %v5619_v48  ;;  %6064 = vmatprep.mubr.msk.f32.mxu1 %vm2334_vm1, %v5618_v40 }
 0x5fc   : > { %6065 = vmatmul.mubr.msk.f32.gmra.mrb[196].mxu1 %vm2334_vm1, %v5621_v10 }
 0x5fe   : > { %v5622_v18 = vpop.f32.mrb[172].mxu0 }
 0x5ff   : > { %v5623_v42 = vpop.f32.mrb[173].mxu0 }
 0x600   : > { %v5624_v28 = vadd.f32 %v5623_v42, %v5622_v18  ;;  %v5625_v2 = vpop.f32.mrb[174].mxu0 }
 0x601   : > { %v5626_v7 = vpop.f32.mrb[175].mxu0 }
 0x602   : > { %v5627_v43 = vadd.f32 %v5626_v7, %v5625_v2  ;;  %6067 = vmatprep.mubr.msk.f32.mxu1 %vm2334_vm1, %v5624_v28 }
 0x604   : > { %6068 = vmatmul.mubr.msk.f32.gmra.mrb[198].mxu1 %vm2334_vm1, %v5627_v43 }
 0x606   : > { %v5628_v25 = vpop.f32.mrb[176].mxu0 }
 0x607   : > { %v5629_v20 = vpop.f32.mrb[177].mxu0 }
 0x608   : > { %v5630_v11 = vadd.f32 %v5629_v20, %v5628_v25  ;;  %v5631_v56 = vpop.f32.mrb[178].mxu0 }
 0x609   : > { %v5632_v13 = vpop.f32.mrb[179].mxu0 }
 0x60a   : > { %v5633_v23 = vadd.f32 %v5632_v13, %v5631_v56  ;;  %6070 = vmatprep.mubr.msk.f32.mxu1 %vm2334_vm1, %v5630_v11 }
 0x60c   : > { %6071 = vmatmul.mubr.msk.f32.gmra.mrb[200].mxu1 %vm2334_vm1, %v5633_v23 }
 0x60e   : > { %v5634_v30 = vpop.f32.mrb[180].mxu0 }
 0x60f   : > { %v5635_v8 = vpop.f32.mrb[181].mxu0 }
 0x610   : > { %v5636_v1 = vadd.f32 %v5635_v8, %v5634_v30  ;;  %v5637_v6 = vpop.f32.mrb[182].mxu0 }
 0x611   : > { %v5638_v14 = vpop.f32.mrb[183].mxu0 }
 0x612   : > { %v5639_v19 = vadd.f32 %v5638_v14, %v5637_v6  ;;  %6073 = vmatprep.mubr.msk.f32.mxu1 %vm2334_vm1, %v5636_v1  ;;  %v10176_v1 = vld [vmem:[%s10358_s5] ss:$0 sm:$0xff] }
 0x613   : > { %v10181_v14 = vld [vmem:[%s10359_s6] ss:$0 sm:$0xff] }
 0x614   : > { %6074 = vmatmul.mubr.msk.f32.gmra.mrb[202].mxu1 %vm2334_vm1, %v5639_v19 }
 0x616   : > { %v5640_v38 = vpop.f32.mrb[184].mxu0 }
 0x617   : > { %v5641_v41 = vpop.f32.mrb[185].mxu0 }
 0x618   : > { %v5642_v36 = vadd.f32 %v5641_v41, %v5640_v38  ;;  %v5643_v37 = vpop.f32.mrb[186].mxu0 }
 0x619   : > { %v5644_v12 = vpop.f32.mrb[187].mxu0 }
 0x61a   : > { %v5645_v51 = vadd.f32 %v5644_v12, %v5643_v37  ;;  %6076 = vmatprep.mubr.msk.f32.mxu1 %vm2334_vm1, %v5642_v36 }
 0x61c   : > { %6077 = vmatmul.mubr.msk.f32.gmra.mrb[204].mxu1 %vm2334_vm1, %v5645_v51  ;;  %v6598_v51 = vld [vmem:[%s6740_s19 + $0x8] sm:$0xff] }
 0x61e   : > { %v5646_v9 = vpop.f32.mrb[188].mxu0 }
 0x61f   : > { %v5647_v49 = vpop.f32.mrb[189].mxu0 }
 0x620   : > { %v5648_v47 = vadd.f32 %v5647_v49, %v5646_v9  ;;  %v5649_v29 = vpop.f32.mrb[190].mxu0 }
 0x621   : > { %v5650_v55 = vpop.f32.mrb[191].mxu0 }
 0x622   : > { %v5651_v50 = vadd.f32 %v5650_v55, %v5649_v29  ;;  %6079 = vmatprep.mubr.msk.f32.mxu1 %vm2334_vm1, %v5648_v47  ;;  %v6599_v47 = vld [vmem:[%s6740_s19] sm:$0xff] }
 0x624   : > { %6080 = vmatmul.mubr.msk.f32.gmra.mrb[206].mxu1 %vm2334_vm1, %v5651_v50 }
 0x626   : > { %v5652_v62 = vpop.f32.mrb[192].mxu0 }
 0x627   : > { %v5653_v63 = vpop.f32.mrb[193].mxu0 }
 0x628   : > { %v5654_v0 = vadd.f32 %v5653_v63, %v5652_v62  ;;  %v5655_v26 = vpop.f32.mrb[194].mxu0 }
 0x629   : > { %v5656_v22 = vpop.f32.mrb[195].mxu0 }
 0x62a   : > { %v5657_v33 = vadd.f32 %v5656_v22, %v5655_v26  ;;  %6082 = vmatprep.mubr.msk.f32.mxu1 %vm2334_vm1, %v5654_v0 }
 0x62c   : > { %6083 = vmatmul.mubr.msk.f32.gmra.mrb[208].mxu1 %vm2334_vm1, %v5657_v33  ;;  %v6600_v33 = vld [vmem:[%s6740_s19 + $0x18] sm:$0xff] }
 0x62e   : > { %v5658_v59 = vpop.f32.mrb[196].mxu0 }
 0x62f   : > { %v5659_v39 = vpop.f32.mrb[197].mxu0 }
 0x630   : > { %v5660_v34 = vadd.f32 %v5659_v39, %v5658_v59  ;;  %v5661_v46 = vpop.f32.mrb[198].mxu0 }
 0x631   : > { %v5662_v17 = vpop.f32.mrb[199].mxu0 }
 0x632   : > { %v5663_v57 = vadd.f32 %v5662_v17, %v5661_v46  ;;  %6085 = vmatprep.mubr.msk.f32.mxu1 %vm2334_vm1, %v5660_v34  ;;  %v6601_v34 = vld [vmem:[%s6740_s19 + $0x10] sm:$0xff] }
 0x634   : > { %6086 = vmatmul.mubr.msk.f32.gmra.mrb[210].mxu1 %vm2334_vm1, %v5663_v57 }
 0x636   : > { %v5664_v60 = vpop.f32.mrb[200].mxu0 }
 0x637   : > { %v5665_v4 = vpop.f32.mrb[201].mxu0 }
 0x638   : > { %v5666_v61 = vadd.f32 %v5665_v4, %v5664_v60  ;;  %v5667_v58 = vpop.f32.mrb[202].mxu0 }
 0x639   : > { %v5668_v21 = vpop.f32.mrb[203].mxu0 }
 0x63a   : > { %v5669_v16 = vadd.f32 %v5668_v21, %v5667_v58  ;;  %6088 = vmatprep.mubr.msk.f32.mxu1 %vm2334_vm1, %v5666_v61 }
 0x63c   : > { %6089 = vmatmul.mubr.msk.f32.gmra.mrb[212].mxu1 %vm2334_vm1, %v5669_v16  ;;  %v6602_v16 = vld [vmem:[%s6740_s19 + $0x28] sm:$0xff] }
 0x63e   : > { %v5670_v24 = vpop.f32.mrb[204].mxu0 }
 0x63f   : > { %v5671_v27 = vpop.f32.mrb[205].mxu0 }
 0x640   : > { %v5672_v52 = vadd.f32 %v5671_v27, %v5670_v24  ;;  %v5673_v15 = vpop.f32.mrb[206].mxu0 }
 0x641   : > { %v5674_v35 = vpop.f32.mrb[207].mxu0 }
 0x642   : > { %v5675_v45 = vadd.f32 %v5674_v35, %v5673_v15  ;;  %6091 = vmatprep.mubr.msk.f32.mxu1 %vm2334_vm1, %v5672_v52  ;;  %v6603_v52 = vld [vmem:[%s6740_s19 + $0x20] sm:$0xff] }
 0x644   : > { %6092 = vmatmul.mubr.msk.f32.gmra.mrb[214].mxu1 %vm2334_vm1, %v5675_v45 }
 0x64f   : > { %v5676_v44 = vpop.f32.mrb[208].mxu0 }
 0x650   : > { %v5677_v54 = vpop.f32.mrb[209].mxu0 }
 0x651   : > { %v5678_v31 = vadd.f32 %v5677_v54, %v5676_v44  ;;  %v5679_v53 = vpop.f32.mrb[210].mxu0 }
 0x652   : > { %v5680_v5 = vpop.f32.mrb[211].mxu0 }
 0x653   : > { %v5681_v32 = vadd.f32 %v5680_v5, %v5679_v53  ;;  %6094 = vmatprep.mubr.msk.f32.mxu1 %vm2334_vm1, %v5678_v31 }
 0x655   : > { %6095 = vmatmul.mubr.msk.f32.gmra.mrb[216].mxu1 %vm2334_vm1, %v5681_v32  ;;  %v6604_v32 = vld [vmem:[%s6740_s19 + $0x38] sm:$0xff] }
 0x657   : > { %v5682_v40 = vpop.f32.mrb[212].mxu0 }
 0x658   : > { %v5683_v48 = vpop.f32.mrb[213].mxu0 }
 0x659   : > { %v5684_v3 = vadd.f32 %v5683_v48, %v5682_v40  ;;  %v5685_v10 = vpop.f32.mrb[214].mxu0 }
 0x65a   : > { %v5686_v18 = vpop.f32.mrb[215].mxu0 }
 0x65b   : > { %v5687_v42 = vadd.f32 %v5686_v18, %v5685_v10  ;;  %6097 = vmatprep.mubr.msk.f32.mxu1 %vm2334_vm1, %v5684_v3  ;;  %v6605_v3 = vld [vmem:[%s6740_s19 + $0x30] sm:$0xff] }
 0x65d   : > { %6098 = vmatmul.mubr.msk.f32.gmra.mrb[218].mxu1 %vm2334_vm1, %v5687_v42 }
 0x65f   : > { %v5688_v28 = vpop.f32.mrb[216].mxu0 }
 0x660   : > { %v5689_v2 = vpop.f32.mrb[217].mxu0 }
 0x661   : > { %v5690_v7 = vadd.f32 %v5689_v2, %v5688_v28  ;;  %v5691_v43 = vpop.f32.mrb[218].mxu0 }
 0x662   : > { %v5692_v25 = vpop.f32.mrb[219].mxu0 }
 0x663   : > { %v5693_v20 = vadd.f32 %v5692_v25, %v5691_v43  ;;  %6100 = vmatprep.mubr.msk.f32.mxu1 %vm2334_vm1, %v5690_v7 }
 0x665   : > { %6101 = vmatmul.mubr.msk.f32.gmra.mrb[220].mxu1 %vm2334_vm1, %v5693_v20  ;;  %v6606_v20 = vld [vmem:[%s6740_s19 + $0x48] sm:$0xff] }
 0x667   : > { %v5694_v11 = vpop.f32.mrb[220].mxu0 }
 0x668   : > { %v5695_v56 = vpop.f32.mrb[221].mxu0 }
 0x669   : > { %v5696_v13 = vadd.f32 %v5695_v56, %v5694_v11  ;;  %v5697_v23 = vpop.f32.mrb[222].mxu0 }
 0x66a   : > { %v5698_v30 = vpop.f32.mrb[223].mxu0 }
 0x66b   : > { %v5699_v8 = vadd.f32 %v5698_v30, %v5697_v23  ;;  %6103 = vmatprep.mubr.msk.f32.mxu1 %vm2334_vm1, %v5696_v13  ;;  %v6607_v13 = vld [vmem:[%s6740_s19 + $0x40] sm:$0xff] }
 0x66d   : > { %6104 = vmatmul.mubr.msk.f32.gmra.mrb[222].mxu1 %vm2334_vm1, %v5699_v8 }
 0x6bf   : > { %v6060_v6 = vpop.f32.mrb[192].mxu1 }
 0x6c0   : > { %v4516_v19 = vadd.f32 %v6060_v6, %v10176_v1  ;;  %v4510_v38 = vpop.f32.mrb[193].mxu1 }
 0x6c1   : > { %v4511_v41 = vadd.f32 %v10176_v1, %v4510_v38 }
 0x6c2   : > { %vm4670_vm9 = vcmp.ge.f32.partialorder %v4516_v19, 0.0  ;;  %v4709_v36 = vmul.f32 %v10181_v14, %v4516_v19 }
 0x6c3   : > { %vm4669_vm1 = vcmp.ge.f32.partialorder %v4511_v41, 0.0  ;;  %v4708_v37 = vmul.f32 %v10181_v14, %v4511_v41 }
 0x6c4   : > { %v4741_v12 = vsel %vm4670_vm9, %v4516_v19, %v4709_v36 }
 0x6c5   : > { %v4773_v9 = vadd.f32 %v6598_v51, %v4741_v12  ;;  %v4740_v49 = vsel %vm4669_vm1, %v4511_v41, %v4708_v37  ;;  %v6608_v37 = vld [vmem:[%s6740_s19 + $0x58] sm:$0xff] }
 0x6c6   : > { %v4772_v29 = vadd.f32 %v6599_v47, %v4740_v49 }
 0x6c7   : > { %4805 = vst.msk [vmem:[%s10192_s22 + $0x8] sm:$0xff] %vm381_vm0, %v4773_v9  ;;  %v6063_v55 = vpop.f32.mrb[194].mxu1  ;;  %v6609_v9 = vld [vmem:[%s6740_s19 + $0x50] sm:$0xff] }
 0x6c8   : > { %4804 = vst.msk [vmem:[%s10192_s22] sm:$0xff] %vm381_vm0, %v4772_v29  ;;  %v4526_v50 = vadd.f32 %v6063_v55, %v10176_v1  ;;  %v4520_v62 = vpop.f32.mrb[195].mxu1 }
 0x6c9   : > { %v4521_v63 = vadd.f32 %v10176_v1, %v4520_v62 }
 0x6ca   : > { %vm4672_vm11 = vcmp.ge.f32.partialorder %v4526_v50, 0.0  ;;  %v4711_v0 = vmul.f32 %v10181_v14, %v4526_v50 }
 0x6cb   : > { %vm4671_vm8 = vcmp.ge.f32.partialorder %v4521_v63, 0.0  ;;  %v4710_v26 = vmul.f32 %v10181_v14, %v4521_v63 }
 0x6cc   : > { %v4743_v22 = vsel %vm4672_vm11, %v4526_v50, %v4711_v0 }
 0x6cd   : > { %v4775_v59 = vadd.f32 %v6600_v33, %v4743_v22  ;;  %v4742_v39 = vsel %vm4671_vm8, %v4521_v63, %v4710_v26  ;;  %v6610_v26 = vld [vmem:[%s6740_s19 + $0x68] sm:$0xff] }
 0x6ce   : > { %v4774_v46 = vadd.f32 %v6601_v34, %v4742_v39 }
 0x6cf   : > { %4807 = vst.msk [vmem:[%s10192_s22 + $0x18] sm:$0xff] %vm381_vm0, %v4775_v59  ;;  %v6066_v17 = vpop.f32.mrb[196].mxu1  ;;  %v6611_v59 = vld [vmem:[%s6740_s19 + $0x60] sm:$0xff] }
 0x6d0   : > { %4806 = vst.msk [vmem:[%s10192_s22 + $0x10] sm:$0xff] %vm381_vm0, %v4774_v46  ;;  %v4536_v57 = vadd.f32 %v6066_v17, %v10176_v1  ;;  %v4530_v60 = vpop.f32.mrb[197].mxu1 }
 0x6d1   : > { %v4531_v4 = vadd.f32 %v10176_v1, %v4530_v60 }
 0x6d2   : > { %vm4674_vm10 = vcmp.ge.f32.partialorder %v4536_v57, 0.0  ;;  %v4713_v61 = vmul.f32 %v10181_v14, %v4536_v57 }
 0x6d3   : > { %vm4673_vm12 = vcmp.ge.f32.partialorder %v4531_v4, 0.0  ;;  %v4712_v58 = vmul.f32 %v10181_v14, %v4531_v4 }
 0x6d4   : > { %v4745_v21 = vsel %vm4674_vm10, %v4536_v57, %v4713_v61 }
 0x6d5   : > { %v4777_v24 = vadd.f32 %v6602_v16, %v4745_v21  ;;  %v4744_v27 = vsel %vm4673_vm12, %v4531_v4, %v4712_v58  ;;  %v6612_v58 = vld [vmem:[%s6740_s19 + $0x78] sm:$0xff] }
 0x6d6   : > { %v4776_v15 = vadd.f32 %v6603_v52, %v4744_v27 }
 0x6d7   : > { %4809 = vst.msk [vmem:[%s10192_s22 + $0x28] sm:$0xff] %vm381_vm0, %v4777_v24  ;;  %v6069_v35 = vpop.f32.mrb[198].mxu1  ;;  %v6613_v24 = vld [vmem:[%s6740_s19 + $0x70] sm:$0xff] }
 0x6d8   : > { %4808 = vst.msk [vmem:[%s10192_s22 + $0x20] sm:$0xff] %vm381_vm0, %v4776_v15  ;;  %v4546_v45 = vadd.f32 %v6069_v35, %v10176_v1  ;;  %v4540_v44 = vpop.f32.mrb[199].mxu1 }
 0x6d9   : > { %v4541_v54 = vadd.f32 %v10176_v1, %v4540_v44 }
 0x6da   : > { %vm4676_vm13 = vcmp.ge.f32.partialorder %v4546_v45, 0.0  ;;  %v4715_v31 = vmul.f32 %v10181_v14, %v4546_v45 }
 0x6db   : > { %vm4675_vm15 = vcmp.ge.f32.partialorder %v4541_v54, 0.0  ;;  %v4714_v53 = vmul.f32 %v10181_v14, %v4541_v54 }
 0x6dc   : > { %v4747_v5 = vsel %vm4676_vm13, %v4546_v45, %v4715_v31 }
 0x6dd   : > { %v4779_v40 = vadd.f32 %v6604_v32, %v4747_v5  ;;  %v4746_v48 = vsel %vm4675_vm15, %v4541_v54, %v4714_v53  ;;  %v6614_v53 = vld [vmem:[%s6740_s19 + $0x88] sm:$0xff] }
 0x6de   : > { %v4778_v10 = vadd.f32 %v6605_v3, %v4746_v48 }
 0x6df   : > { %4811 = vst.msk [vmem:[%s10192_s22 + $0x38] sm:$0xff] %vm381_vm0, %v4779_v40  ;;  %v6072_v18 = vpop.f32.mrb[200].mxu1  ;;  %v6615_v40 = vld [vmem:[%s6740_s19 + $0x80] sm:$0xff] }
 0x6e0   : > { %4810 = vst.msk [vmem:[%s10192_s22 + $0x30] sm:$0xff] %vm381_vm0, %v4778_v10  ;;  %v4556_v42 = vadd.f32 %v6072_v18, %v10176_v1  ;;  %v4550_v28 = vpop.f32.mrb[201].mxu1 }
 0x6e1   : > { %v4551_v2 = vadd.f32 %v10176_v1, %v4550_v28 }
 0x6e2   : > { %vm4678_vm3 = vcmp.ge.f32.partialorder %v4556_v42, 0.0  ;;  %v4717_v7 = vmul.f32 %v10181_v14, %v4556_v42 }
 0x6e3   : > { %vm4677_vm14 = vcmp.ge.f32.partialorder %v4551_v2, 0.0  ;;  %v4716_v43 = vmul.f32 %v10181_v14, %v4551_v2 }
 0x6e4   : > { %v4749_v25 = vsel %vm4678_vm3, %v4556_v42, %v4717_v7 }
 0x6e5   : > { %v4781_v11 = vadd.f32 %v6606_v20, %v4749_v25  ;;  %v4748_v56 = vsel %vm4677_vm14, %v4551_v2, %v4716_v43  ;;  %v6616_v43 = vld [vmem:[%s6740_s19 + $0x98] sm:$0xff] }
 0x6e6   : > { %v4780_v23 = vadd.f32 %v6607_v13, %v4748_v56 }
 0x6e7   : > { %4813 = vst.msk [vmem:[%s10192_s22 + $0x48] sm:$0xff] %vm381_vm0, %v4781_v11  ;;  %v6075_v30 = vpop.f32.mrb[202].mxu1  ;;  %v6617_v11 = vld [vmem:[%s6740_s19 + $0x90] sm:$0xff] }
 0x6e8   : > { %4812 = vst.msk [vmem:[%s10192_s22 + $0x40] sm:$0xff] %vm381_vm0, %v4780_v23  ;;  %v4566_v8 = vadd.f32 %v6075_v30, %v10176_v1  ;;  %v4560_v6 = vpop.f32.mrb[203].mxu1 }
 0x6e9   : > { %v4561_v19 = vadd.f32 %v10176_v1, %v4560_v6 }
 0x6ea   : > { %vm4680_vm2 = vcmp.ge.f32.partialorder %v4566_v8, 0.0  ;;  %v4719_v38 = vmul.f32 %v10181_v14, %v4566_v8 }
 0x6eb   : > { %vm4679_vm4 = vcmp.ge.f32.partialorder %v4561_v19, 0.0  ;;  %v4718_v41 = vmul.f32 %v10181_v14, %v4561_v19 }
 0x6ec   : > { %v4751_v36 = vsel %vm4680_vm2, %v4566_v8, %v4719_v38 }
 0x6ed   : > { %v4783_v12 = vadd.f32 %v6608_v37, %v4751_v36  ;;  %v4750_v51 = vsel %vm4679_vm4, %v4561_v19, %v4718_v41  ;;  %v6618_v41 = vld [vmem:[%s6740_s19 + $0xa8] sm:$0xff] }
 0x6ee   : > { %v4782_v49 = vadd.f32 %v6609_v9, %v4750_v51 }
 0x6ef   : > { %4815 = vst.msk [vmem:[%s10192_s22 + $0x58] sm:$0xff] %vm381_vm0, %v4783_v12  ;;  %v6078_v47 = vpop.f32.mrb[204].mxu1  ;;  %v6619_v12 = vld [vmem:[%s6740_s19 + $0xa0] sm:$0xff] }
 0x6f0   : > { %4814 = vst.msk [vmem:[%s10192_s22 + $0x50] sm:$0xff] %vm381_vm0, %v4782_v49  ;;  %v4576_v29 = vadd.f32 %v6078_v47, %v10176_v1  ;;  %v4570_v55 = vpop.f32.mrb[205].mxu1 }
 0x6f1   : > { %v4571_v50 = vadd.f32 %v10176_v1, %v4570_v55 }
 0x6f2   : > { %vm4682_vm5 = vcmp.ge.f32.partialorder %v4576_v29, 0.0  ;;  %v4721_v62 = vmul.f32 %v10181_v14, %v4576_v29 }
 0x6f3   : > { %vm4681_vm6 = vcmp.ge.f32.partialorder %v4571_v50, 0.0  ;;  %v4720_v63 = vmul.f32 %v10181_v14, %v4571_v50 }
 0x6f4   : > { %v4753_v0 = vsel %vm4682_vm5, %v4576_v29, %v4721_v62 }
 0x6f5   : > { %v4785_v22 = vadd.f32 %v6610_v26, %v4753_v0  ;;  %v4752_v33 = vsel %vm4681_vm6, %v4571_v50, %v4720_v63  ;;  %v6620_v63 = vld [vmem:[%s6740_s19 + $0xb8] sm:$0xff] }
 0x6f6   : > { %v4784_v39 = vadd.f32 %v6611_v59, %v4752_v33 }
 0x6f7   : > { %4817 = vst.msk [vmem:[%s10192_s22 + $0x68] sm:$0xff] %vm381_vm0, %v4785_v22  ;;  %v6081_v34 = vpop.f32.mrb[206].mxu1  ;;  %v6621_v22 = vld [vmem:[%s6740_s19 + $0xb0] sm:$0xff] }
 0x6f8   : > { %4816 = vst.msk [vmem:[%s10192_s22 + $0x60] sm:$0xff] %vm381_vm0, %v4784_v39  ;;  %v4586_v46 = vadd.f32 %v6081_v34, %v10176_v1  ;;  %v4580_v17 = vpop.f32.mrb[207].mxu1 }
 0x6f9   : > { %v4581_v57 = vadd.f32 %v10176_v1, %v4580_v17 }
 0x6fa   : > { %vm4684_vm7 = vcmp.ge.f32.partialorder %v4586_v46, 0.0  ;;  %v4723_v60 = vmul.f32 %v10181_v14, %v4586_v46 }
 0x6fb   : > { %vm4683_vm9 = vcmp.ge.f32.partialorder %v4581_v57, 0.0  ;;  %v4722_v4 = vmul.f32 %v10181_v14, %v4581_v57 }
 0x6fc   : > { %v4755_v61 = vsel %vm4684_vm7, %v4586_v46, %v4723_v60 }
 0x6fd   : > { %v4787_v21 = vadd.f32 %v6612_v58, %v4755_v61  ;;  %v4754_v16 = vsel %vm4683_vm9, %v4581_v57, %v4722_v4  ;;  %v6622_v4 = vld [vmem:[%s6740_s19 + $0xc8] sm:$0xff] }
 0x6fe   : > { %v4786_v27 = vadd.f32 %v6613_v24, %v4754_v16 }
 0x6ff   : > { %4819 = vst.msk [vmem:[%s10192_s22 + $0x78] sm:$0xff] %vm381_vm0, %v4787_v21  ;;  %v6084_v52 = vpop.f32.mrb[208].mxu1  ;;  %v6623_v21 = vld [vmem:[%s6740_s19 + $0xc0] sm:$0xff] }
 0x700   : > { %4818 = vst.msk [vmem:[%s10192_s22 + $0x70] sm:$0xff] %vm381_vm0, %v4786_v27  ;;  %v4596_v15 = vadd.f32 %v6084_v52, %v10176_v1  ;;  %v4590_v35 = vpop.f32.mrb[209].mxu1 }
 0x701   : > { %v4591_v45 = vadd.f32 %v10176_v1, %v4590_v35 }
 0x702   : > { %vm4686_vm1 = vcmp.ge.f32.partialorder %v4596_v15, 0.0  ;;  %v4725_v44 = vmul.f32 %v10181_v14, %v4596_v15 }
 0x703   : > { %vm4685_vm11 = vcmp.ge.f32.partialorder %v4591_v45, 0.0  ;;  %v4724_v54 = vmul.f32 %v10181_v14, %v4591_v45 }
 0x704   : > { %v4757_v31 = vsel %vm4686_vm1, %v4596_v15, %v4725_v44 }
 0x705   : > { %v4789_v5 = vadd.f32 %v6614_v53, %v4757_v31  ;;  %v4756_v32 = vsel %vm4685_vm11, %v4591_v45, %v4724_v54  ;;  %v6624_v54 = vld [vmem:[%s6740_s19 + $0xd8] sm:$0xff] }
 0x706   : > { %v4788_v48 = vadd.f32 %v6615_v40, %v4756_v32 }
 0x707   : > { %4821 = vst.msk [vmem:[%s10192_s22 + $0x88] sm:$0xff] %vm381_vm0, %v4789_v5  ;;  %v6087_v3 = vpop.f32.mrb[210].mxu1  ;;  %v6625_v5 = vld [vmem:[%s6740_s19 + $0xd0] sm:$0xff] }
 0x708   : > { %4820 = vst.msk [vmem:[%s10192_s22 + $0x80] sm:$0xff] %vm381_vm0, %v4788_v48  ;;  %v4606_v10 = vadd.f32 %v6087_v3, %v10176_v1  ;;  %v4600_v18 = vpop.f32.mrb[211].mxu1 }
 0x709   : > { %v4601_v42 = vadd.f32 %v10176_v1, %v4600_v18 }
 0x70a   : > { %vm4688_vm8 = vcmp.ge.f32.partialorder %v4606_v10, 0.0  ;;  %v4727_v28 = vmul.f32 %v10181_v14, %v4606_v10 }
 0x70b   : > { %vm4687_vm10 = vcmp.ge.f32.partialorder %v4601_v42, 0.0  ;;  %v4726_v2 = vmul.f32 %v10181_v14, %v4601_v42 }
 0x70c   : > { %v4759_v7 = vsel %vm4688_vm8, %v4606_v10, %v4727_v28 }
 0x70d   : > { %v4791_v25 = vadd.f32 %v6616_v43, %v4759_v7  ;;  %v4758_v20 = vsel %vm4687_vm10, %v4601_v42, %v4726_v2  ;;  %v6626_v2 = vld [vmem:[%s6740_s19 + $0xe8] sm:$0xff] }
 0x70e   : > { %v4790_v56 = vadd.f32 %v6617_v11, %v4758_v20 }
 0x70f   : > { %4823 = vst.msk [vmem:[%s10192_s22 + $0x98] sm:$0xff] %vm381_vm0, %v4791_v25  ;;  %v6090_v13 = vpop.f32.mrb[212].mxu1  ;;  %v6627_v25 = vld [vmem:[%s6740_s19 + $0xe0] sm:$0xff] }
 0x710   : > { %4822 = vst.msk [vmem:[%s10192_s22 + $0x90] sm:$0xff] %vm381_vm0, %v4790_v56  ;;  %v4616_v23 = vadd.f32 %v6090_v13, %v10176_v1  ;;  %v4610_v30 = vpop.f32.mrb[213].mxu1 }
 0x711   : > { %v4611_v8 = vadd.f32 %v10176_v1, %v4610_v30 }
 0x712   : > { %vm4690_vm12 = vcmp.ge.f32.partialorder %v4616_v23, 0.0  ;;  %v4729_v6 = vmul.f32 %v10181_v14, %v4616_v23 }
 0x713   : > { %vm4689_vm13 = vcmp.ge.f32.partialorder %v4611_v8, 0.0  ;;  %v4728_v19 = vmul.f32 %v10181_v14, %v4611_v8 }
 0x714   : > { %v4761_v38 = vsel %vm4690_vm12, %v4616_v23, %v4729_v6 }
 0x715   : > { %v4793_v36 = vadd.f32 %v6618_v41, %v4761_v38  ;;  %v4760_v37 = vsel %vm4689_vm13, %v4611_v8, %v4728_v19  ;;  %v6628_v19 = vld [vmem:[%s6740_s19 + $0xf8] sm:$0xff] }
 0x716   : > { %v4792_v51 = vadd.f32 %v6619_v12, %v4760_v37 }
 0x717   : > { %4825 = vst.msk [vmem:[%s10192_s22 + $0xa8] sm:$0xff] %vm381_vm0, %v4793_v36  ;;  %v6093_v9 = vpop.f32.mrb[214].mxu1  ;;  %v6629_v36 = vld [vmem:[%s6740_s19 + $0xf0] sm:$0xff] }
 0x718   : > { %4824 = vst.msk [vmem:[%s10192_s22 + $0xa0] sm:$0xff] %vm381_vm0, %v4792_v51  ;;  %v4626_v49 = vadd.f32 %v6093_v9, %v10176_v1  ;;  %v4620_v47 = vpop.f32.mrb[215].mxu1 }
 0x719   : > { %v4621_v29 = vadd.f32 %v10176_v1, %v4620_v47 }
 0x71a   : > { %vm4692_vm15 = vcmp.ge.f32.partialorder %v4626_v49, 0.0  ;;  %v4731_v55 = vmul.f32 %v10181_v14, %v4626_v49 }
 0x71b   : > { %vm4691_vm3 = vcmp.ge.f32.partialorder %v4621_v29, 0.0  ;;  %v4730_v50 = vmul.f32 %v10181_v14, %v4621_v29 }
 0x71c   : > { %v4763_v62 = vsel %vm4692_vm15, %v4626_v49, %v4731_v55 }
 0x71d   : > { %v4795_v0 = vadd.f32 %v6620_v63, %v4763_v62  ;;  %v4762_v26 = vsel %vm4691_vm3, %v4621_v29, %v4730_v50 }
 0x71e   : > { %v4794_v33 = vadd.f32 %v6621_v22, %v4762_v26 }
 0x71f   : > { %4827 = vst.msk [vmem:[%s10192_s22 + $0xb8] sm:$0xff] %vm381_vm0, %v4795_v0 }
 0x720   : > { %4826 = vst.msk [vmem:[%s10192_s22 + $0xb0] sm:$0xff] %vm381_vm0, %v4794_v33 }
 0x728   : > { %v6096_v59 = vpop.f32.mrb[216].mxu1 }
 0x729   : > { %v4636_v39 = vadd.f32 %v6096_v59, %v10176_v1  ;;  %v4630_v34 = vpop.f32.mrb[217].mxu1 }
 0x72a   : > { %v4631_v46 = vadd.f32 %v10176_v1, %v4630_v34 }
 0x72b   : > { %vm4694_vm14 = vcmp.ge.f32.partialorder %v4636_v39, 0.0  ;;  %v4733_v17 = vmul.f32 %v10181_v14, %v4636_v39 }
 0x72c   : > { %vm4693_vm2 = vcmp.ge.f32.partialorder %v4631_v46, 0.0  ;;  %v4732_v57 = vmul.f32 %v10181_v14, %v4631_v46 }
 0x72d   : > { %v4765_v60 = vsel %vm4694_vm14, %v4636_v39, %v4733_v17 }
 0x72e   : > { %v4797_v61 = vadd.f32 %v6622_v4, %v4765_v60  ;;  %v4764_v58 = vsel %vm4693_vm2, %v4631_v46, %v4732_v57 }
 0x72f   : > { %v4796_v16 = vadd.f32 %v6623_v21, %v4764_v58 }
 0x730   : > { %4829 = vst.msk [vmem:[%s10192_s22 + $0xc8] sm:$0xff] %vm381_vm0, %v4797_v61  ;;  %v6099_v24 = vpop.f32.mrb[218].mxu1 }
 0x731   : > { %4828 = vst.msk [vmem:[%s10192_s22 + $0xc0] sm:$0xff] %vm381_vm0, %v4796_v16  ;;  %v4646_v27 = vadd.f32 %v6099_v24, %v10176_v1  ;;  %v4640_v52 = vpop.f32.mrb[219].mxu1 }
 0x732   : > { %v4641_v15 = vadd.f32 %v10176_v1, %v4640_v52 }
 0x733   : > { %vm4696_vm4 = vcmp.ge.f32.partialorder %v4646_v27, 0.0  ;;  %v4735_v35 = vmul.f32 %v10181_v14, %v4646_v27 }
 0x734   : > { %vm4695_vm5 = vcmp.ge.f32.partialorder %v4641_v15, 0.0  ;;  %v4734_v45 = vmul.f32 %v10181_v14, %v4641_v15 }
 0x735   : > { %v4767_v44 = vsel %vm4696_vm4, %v4646_v27, %v4735_v35 }
 0x736   : > { %v4799_v31 = vadd.f32 %v6624_v54, %v4767_v44  ;;  %v4766_v53 = vsel %vm4695_vm5, %v4641_v15, %v4734_v45 }
 0x737   : > { %v4798_v32 = vadd.f32 %v6625_v5, %v4766_v53 }
 0x738   : > { %4831 = vst.msk [vmem:[%s10192_s22 + $0xd8] sm:$0xff] %vm381_vm0, %v4799_v31  ;;  %v6102_v40 = vpop.f32.mrb[220].mxu1 }
 0x739   : > { %4830 = vst.msk [vmem:[%s10192_s22 + $0xd0] sm:$0xff] %vm381_vm0, %v4798_v32  ;;  %v4656_v48 = vadd.f32 %v6102_v40, %v10176_v1  ;;  %v4650_v3 = vpop.f32.mrb[221].mxu1 }
 0x73a   : > { %v4651_v10 = vadd.f32 %v10176_v1, %v4650_v3 }
 0x73b   : > { %vm4698_vm6 = vcmp.ge.f32.partialorder %v4656_v48, 0.0  ;;  %v4737_v18 = vmul.f32 %v10181_v14, %v4656_v48 }
 0x73c   : > { %vm4697_vm7 = vcmp.ge.f32.partialorder %v4651_v10, 0.0  ;;  %v4736_v42 = vmul.f32 %v10181_v14, %v4651_v10 }
 0x73d   : > { %v4769_v28 = vsel %vm4698_vm6, %v4656_v48, %v4737_v18 }
 0x73e   : > { %v4801_v7 = vadd.f32 %v6626_v2, %v4769_v28  ;;  %v4768_v43 = vsel %vm4697_vm7, %v4651_v10, %v4736_v42 }
 0x73f   : > { %v4800_v20 = vadd.f32 %v6627_v25, %v4768_v43 }
 0x740   : > { %4833 = vst.msk [vmem:[%s10192_s22 + $0xe8] sm:$0xff] %vm381_vm0, %v4801_v7  ;;  %v6105_v11 = vpop.f32.mrb[222].mxu1 }
 0x741   : > { %4832 = vst.msk [vmem:[%s10192_s22 + $0xe0] sm:$0xff] %vm381_vm0, %v4800_v20  ;;  %v4666_v56 = vadd.f32 %v6105_v11, %v10176_v1  ;;  %v4660_v13 = vpop.f32.mrb[223].mxu1 }
 0x742   : > { %v4661_v23 = vadd.f32 %v10176_v1, %v4660_v13 }
 0x743   : > { %vm4700_vm9 = vcmp.ge.f32.partialorder %v4666_v56, 0.0  ;;  %v4739_v30 = vmul.f32 %v10181_v14, %v4666_v56 }
 0x744   : > { %vm4699_vm1 = vcmp.ge.f32.partialorder %v4661_v23, 0.0  ;;  %v4738_v8 = vmul.f32 %v10181_v14, %v4661_v23 }
 0x745   : > { %v4771_v6 = vsel %vm4700_vm9, %v4666_v56, %v4739_v30 }
 0x746   : > { %v4803_v38 = vadd.f32 %v6628_v19, %v4771_v6  ;;  %v4770_v41 = vsel %vm4699_vm1, %v4661_v23, %v4738_v8 }
 0x747   : > { %v4802_v37 = vadd.f32 %v6629_v36, %v4770_v41 }
 0x748   : > { %4835 = vst.msk [vmem:[%s10192_s22 + $0xf8] sm:$0xff] %vm381_vm0, %v4803_v38 }
 0x749   : > { %4834 = vst.msk [vmem:[%s10192_s22 + $0xf0] sm:$0xff] %vm381_vm0, %v4802_v37 }
 0x74a PF: > { %s19_s30 = sadd.s32 1, %s6636_s30  }
 0x74b   : > { %p16_p4 = scmp.ge.s32.totalorder %s19_s30, 4  }
 0x74d   :  { %18 = sbr.rel (!%p16_p4) target bundleno = 1 (0x1), region = 98 }

</bundles_post_ra>
